<compile_context>
chip_gen: v7x
topology: tpu7x:2x2x1
jax: 0.10.0
libtpu: 0.0.40
codegen_flags: <defaults>
</compile_context>

<pallas_src>
import functools
import math

import jax
import jax.numpy as jnp
from jax.experimental import pallas as pl
from jax.experimental.pallas import tpu as pltpu


MATMUL_DTYPE = jnp.bfloat16  # MXU-native operands; accumulation stays f32


def _round_up(x, m):
    return ((x + m - 1) // m) * m


# ----------------------------------------------------------------------------
# In-kernel compute helpers (operate on plain arrays, traced inside the kernel)
# ----------------------------------------------------------------------------
def _dot(a, b, dim_nums=None):
    a = a.astype(MATMUL_DTYPE)   # weights are already bf16 (pre-cast at init) -> no-op for them
    b = b.astype(MATMUL_DTYPE)
    if dim_nums is None:
        return jnp.dot(a, b, preferred_element_type=jnp.float32)
    return jax.lax.dot_general(a, b, dimension_numbers=dim_nums,
                               preferred_element_type=jnp.float32)


def _layernorm(y, g, b, eps=1e-5):
    # y: [S, D] f32; g/b: [1, D] f32
    mean = jnp.mean(y, axis=-1, keepdims=True)
    var = jnp.mean((y - mean) ** 2, axis=-1, keepdims=True)
    return (y - mean) * jax.lax.rsqrt(var + eps) * g + b


def _attn_block(x, kv, wq, bq, wkv, bkv, wo, bo, ln_g, ln_b, *, num_heads, mask):
    """Fused MHA block: QKV proj + attention + out-proj + residual + LayerNorm.

    x:  [Sq, Dq] f32 (residual stream), kv: [Sk, Dkv] f32, mask: None or [1, Sq, Sk] bool.
    """
    Sq = x.shape[0]
    D = wq.shape[-1]
    dh = D // num_heads
    scale = 1.0 / math.sqrt(dh)

    q = _dot(x, wq) + bq            # [Sq, D]  f32
    kvp = _dot(kv, wkv) + bkv       # [Sk, 2D] f32 (fused K/V projection)
    k = kvp[:, :D]
    v = kvp[:, D:]

    contract_last = (((1,), (1,)), ((), ()))  # q @ k^T without an explicit transpose
    # Scores for every head stacked on a leading (non-lane) axis -> ONE softmax over [H,Sq,Sk]
    # instead of num_heads separate softmaxes on quarter-filled vregs.
    s = jnp.stack(
        [_dot(q[:, h * dh:(h + 1) * dh], k[:, h * dh:(h + 1) * dh], contract_last)
         for h in range(num_heads)], axis=0) * scale                    # [H, Sq, Sk] f32
    if mask is not None:
        # scores stay f32, so a large-negative constant is safe (dtype-aware).
        s = jnp.where(mask, s, jnp.float32(-1e30))
    s = s - jnp.max(s, axis=-1, keepdims=True)
    p = jnp.exp(s)
    p = p * pl.reciprocal(jnp.sum(p, axis=-1, keepdims=True), approx=True)

    # per-head PV + Wo-row-block accumulation:
    #   concat_h(o_h) @ Wo == sum_h o_h @ Wo[h*dh:(h+1)*dh, :]   -> no concat / 3-D transpose
    acc = jnp.zeros((Sq, D), jnp.float32)
    for h in range(num_heads):
        oh = _dot(p[h], v[:, h * dh:(h + 1) * dh])                       # [Sq, dh]
        acc = acc + _dot(oh, wo[h * dh:(h + 1) * dh, :])                  # [Sq, D]
    o = acc + bo
    return _layernorm(x + o, ln_g, ln_b)


def _ffn_block(x, w1, b1, w2, b2, ln_g, ln_b):
    """Fused FFN block: fc1 + ReLU + fc2 + residual + LayerNorm (hidden stays in vregs/VMEM)."""
    h = jnp.maximum(_dot(x, w1) + b1, 0.0)
    o = _dot(h, w2) + b2
    return _layernorm(x + o, ln_g, ln_b)


# ----------------------------------------------------------------------------
# The single fused kernel: encoder stack + decoder stack + vocab projection
# ----------------------------------------------------------------------------
def _transformer_kernel(enc_in_ref, dec_in_ref,
                        e_wq, e_wkv, e_wo, e_w1, e_w2, e_sm,
                        d_swq, d_swkv, d_swo, d_cwq, d_cwkv, d_cwo,
                        d_w1, d_w2, d_sm,
                        p_w, p_b,
                        out_ref, *, num_heads):
    D = e_wq.shape[-1]      # encoder width
    F = e_w1.shape[-1]      # encoder FFN hidden
    Dw = d_swq.shape[-1]    # decoder width
    Fd = d_w1.shape[-1]     # decoder FFN hidden

    # ----------------- encoder stack (output stays resident in VMEM) -----------------
    x = enc_in_ref[0].astype(jnp.float32)                      # [Se, D]
    for l in range(e_wq.shape[0]):                             # static unroll over layers
        sp = e_sm[l]                                           # [9, pw] packed biases / LN params
        x = _attn_block(x, x,
                        e_wq[l], sp[0:1, :D], e_wkv[l], sp[1:2, :2 * D],
                        e_wo[l], sp[2:3, :D], sp[3:4, :D], sp[4:5, :D],
                        num_heads=num_heads, mask=None)
        x = _ffn_block(x, e_w1[l], sp[5:6, :F], e_w2[l], sp[6:7, :D],
                       sp[7:8, :D], sp[8:9, :D])
    enc = x                                                    # never leaves VMEM

    # ----------------- decoder stack -----------------
    y = dec_in_ref[0].astype(jnp.float32)                      # [Sw, Dw]
    Sw = y.shape[0]
    # causal mask built ONCE and reused across every decoder layer (hoisted out of the loop)
    row = jax.lax.broadcasted_iota(jnp.int32, (1, Sw, Sw), 1)
    col = jax.lax.broadcasted_iota(jnp.int32, (1, Sw, Sw), 2)
    causal = col <= row                                        # [1, Sw, Sw]

    for l in range(d_swq.shape[0]):
        sp = d_sm[l]                                           # [14, pw]
        # causal self-attention block
        y = _attn_block(y, y,
                        d_swq[l], sp[0:1, :Dw], d_swkv[l], sp[1:2, :2 * Dw],
                        d_swo[l], sp[2:3, :Dw], sp[3:4, :Dw], sp[4:5, :Dw],
                        num_heads=num_heads, mask=causal)
        # cross-attention block (keys/values from the resident encoder output)
        y = _attn_block(y, enc,
                        d_cwq[l], sp[5:6, :Dw], d_cwkv[l], sp[6:7, :2 * Dw],
                        d_cwo[l], sp[7:8, :Dw], sp[8:9, :Dw], sp[9:10, :Dw],
                        num_heads=num_heads, mask=None)
        # feed-forward block
        y = _ffn_block(y, d_w1[l], sp[10:11, :Fd], d_w2[l], sp[11:12, :Dw],
                       sp[12:13, :Dw], sp[13:14, :Dw])

    # ----------------- fused vocab projection (lane-dense padded width) -----------------
    logits = _dot(y, p_w[...]) + p_b[...]                      # [Sw, Npad]
    out_ref[0] = logits.astype(out_ref.dtype)


# ----------------------------------------------------------------------------
# Model glue (plain JAX): embeddings, positional encoding, parameters, forward
# ----------------------------------------------------------------------------
def get_position_encoding(seq_len, d, n=10000.0):
    """Scatter-free sinusoidal PE, [seq_len, d] (d assumed even); constant-folded under jit."""
    pos = jnp.arange(seq_len, dtype=jnp.float32)[:, None]
    i = jnp.arange(d // 2, dtype=jnp.float32)[None, :]
    ang = pos / jnp.power(n, 2.0 * i / d)
    return jnp.stack([jnp.sin(ang), jnp.cos(ang)], axis=-1).reshape(seq_len, d)


def _init_w(key, din, dout, scale=0.02):
    return jax.random.normal(key, (din, dout), jnp.float32) * scale


def _pack_rows(rows):
    """Pack a list of 1-D params into one lane-dense [n_rows, round_up(max_width,128)] f32 array."""
    width = _round_up(max(int(r.size) for r in rows), 128)
    padded = [jnp.pad(jnp.asarray(r, jnp.float32).reshape(1, -1),
                      ((0, 0), (0, width - int(r.size)))) for r in rows]
    return jnp.concatenate(padded, axis=0)


def init_params(key, *, pxl_size, emb_dim, num_heads, hidden_dim_ff, Wemb_dim,
                voc_size, num_encoder_layers, num_decoder_layers):
    D, Dw, F = emb_dim, Wemb_dim, hidden_dim_ff
    keys = jax.random.split(key, 3 + num_encoder_layers + num_decoder_layers)

    zD, oD = jnp.zeros((D,), jnp.float32), jnp.ones((D,), jnp.float32)
    zDw, oDw = jnp.zeros((Dw,), jnp.float32), jnp.ones((Dw,), jnp.float32)

    # ---- encoder layers (stacked over L) ----
    e_wq, e_wkv, e_wo, e_w1, e_w2, e_sm = [], [], [], [], [], []
    for li in range(num_encoder_layers):
        k1, k2, k3, k4, k5 = jax.random.split(keys[3 + li], 5)
        e_wq.append(_init_w(k1, D, D))
        e_wkv.append(_init_w(k2, D, 2 * D))          # fused K/V projection
        e_wo.append(_init_w(k3, D, D))
        e_w1.append(_init_w(k4, D, F))
        e_w2.append(_init_w(k5, F, D))
        e_sm.append(_pack_rows([zD, jnp.zeros((2 * D,)), zD, oD, zD,     # bq, bkv, bo, ln1g, ln1b
                                jnp.zeros((F,)), zD, oD, zD]))           # b1, b2, ln2g, ln2b

    # ---- decoder layers (stacked over L) ----
    d_swq, d_swkv, d_swo = [], [], []
    d_cwq, d_cwkv, d_cwo = [], [], []
    d_w1, d_w2, d_sm = [], [], []
    for li in range(num_decoder_layers):
        ks = jax.random.split(keys[3 + num_encoder_layers + li], 8)
        d_swq.append(_init_w(ks[0], Dw, Dw))
        d_swkv.append(_init_w(ks[1], Dw, 2 * Dw))
        d_swo.append(_init_w(ks[2], Dw, Dw))
        d_cwq.append(_init_w(ks[3], Dw, Dw))
        d_cwkv.append(_init_w(ks[4], D, 2 * Dw))     # cross-attn K/V come from the encoder output
        d_cwo.append(_init_w(ks[5], Dw, Dw))
        d_w1.append(_init_w(ks[6], Dw, F))
        d_w2.append(_init_w(ks[7], F, Dw))
        d_sm.append(_pack_rows([zDw, jnp.zeros((2 * Dw,)), zDw, oDw, zDw,   # self:  bq, bkv, bo, ln1g, ln1b
                                zDw, jnp.zeros((2 * Dw,)), zDw, oDw, zDw,   # cross: bq, bkv, bo, ln2g, ln2b
                                jnp.zeros((F,)), zDw, oDw, zDw]))           # ffn:   b1, b2, ln3g, ln3b

    n_pad = _round_up(voc_size, 128)
    proj_w = jnp.pad(_init_w(keys[2], Dw, voc_size), ((0, 0), (0, n_pad - voc_size)))

    def _stack_bf16(ts):
        return jnp.stack(ts).astype(MATMUL_DTYPE)   # weights pre-cast to bf16 ONCE here

    return {
        # defined in the reference __init__ but never used in forward() -- kept for parity
        "img_embedding": {"w": _init_w(keys[0], pxl_size, D),
                          "b": jnp.zeros((1, D), jnp.float32)},
        "word_embedding": jax.random.normal(keys[1], (voc_size, Dw), jnp.float32) * 0.02,
        "kernel": {
            "enc_wq": _stack_bf16(e_wq), "enc_wkv": _stack_bf16(e_wkv), "enc_wo": _stack_bf16(e_wo),
            "enc_w1": _stack_bf16(e_w1), "enc_w2": _stack_bf16(e_w2), "enc_sm": jnp.stack(e_sm),
            "dec_swq": _stack_bf16(d_swq), "dec_swkv": _stack_bf16(d_swkv), "dec_swo": _stack_bf16(d_swo),
            "dec_cwq": _stack_bf16(d_cwq), "dec_cwkv": _stack_bf16(d_cwkv), "dec_cwo": _stack_bf16(d_cwo),
            "dec_w1": _stack_bf16(d_w1), "dec_w2": _stack_bf16(d_w2), "dec_sm": jnp.stack(d_sm),
            "proj_w": proj_w.astype(MATMUL_DTYPE),
            "proj_b": jnp.zeros((1, n_pad), jnp.float32),
        },
    }


def transformer_forward(params, pxl_input, word_inpt, *, num_heads, voc_size):
    # --- image tokens + positional encoding (ViT-style encoder input) ---
    B, _, Se, D = pxl_input.shape
    enc_in = pxl_input.reshape(B, Se, D) + get_position_encoding(Se, D)[None]

    # --- word embedding + sinusoidal positional encoding ---
    # TODO(synk): embedding gather kept in XLA (jnp.take); no Pallas gather needed at this size.
    wemb = jnp.take(params["word_embedding"], word_inpt, axis=0)     # [B, Sw, Dw]
    _, Sw, Dw = wemb.shape
    dec_in = wemb + get_position_encoding(Sw, Dw)[None]

    kp = params["kernel"]
    order = ["enc_wq", "enc_wkv", "enc_wo", "enc_w1", "enc_w2", "enc_sm",
             "dec_swq", "dec_swkv", "dec_swo", "dec_cwq", "dec_cwkv", "dec_cwo",
             "dec_w1", "dec_w2", "dec_sm", "proj_w", "proj_b"]
    weight_args = [kp[n] for n in order]
    n_pad = kp["proj_w"].shape[-1]

    def _seq_spec(S, Dm):
        # [B, S, Dm] tensor, one batch element per grid step
        return pl.BlockSpec((1, S, Dm), lambda b: (b, 0, 0))

    def _rep_spec(t):
        # full parameter block, replicated across the batch grid axis (same block index every
        # step -> Pallas DMAs it into VMEM exactly once)
        return pl.BlockSpec(t.shape, lambda b, _n=t.ndim: (0,) * _n)

    in_specs = [_seq_spec(Se, D), _seq_spec(Sw, Dw)] + [_rep_spec(t) for t in weight_args]

    pred = pl.pallas_call(
        functools.partial(_transformer_kernel, num_heads=num_heads),
        out_shape=jax.ShapeDtypeStruct((B, Sw, n_pad), jnp.float32),
        grid=(B,),
        in_specs=in_specs,
        out_specs=_seq_spec(Sw, n_pad),
        compiler_params=pltpu.CompilerParams(dimension_semantics=("parallel",)),
    )(enc_in, dec_in, *weight_args)

    # padded vocab columns are zero-weight/zero-bias; slice back to the real vocabulary.
    return pred[:, :, :voc_size]


# ----------------------------------------------------------------------------
if __name__ == "__main__":
    # small, self-consistent config
    pxl_size = 32
    emb_dim = 32
    Wemb_dim = 32
    num_heads = 4
    hidden_dim_ff = 64
    Pemb_dim = 32      # unused (see TODO at top)
    new_dim = 32       # unused (see TODO at top)
    voc_size = 50
    num_encoder_layers = 2
    num_decoder_layers = 2

    batch = 2
    img_seq_len = 8
    word_seq_len = 8

    root = jax.random.PRNGKey(0)
    kp, kx, kw = jax.random.split(root, 3)

    params = init_params(
        kp, pxl_size=pxl_size, emb_dim=emb_dim, num_heads=num_heads,
        hidden_dim_ff=hidden_dim_ff, Wemb_dim=Wemb_dim, voc_size=voc_size,
        num_encoder_layers=num_encoder_layers, num_decoder_layers=num_decoder_layers)

    # pxl_input: [B, C=1, seq_len, emb_dim]  (image tokens already embedded, per reference forward)
    pxl_input = jax.random.normal(kx, (batch, 1, img_seq_len, emb_dim), jnp.float32)
    # word_inpt: [B, Wseq] token ids
    word_inpt = jax.random.randint(kw, (batch, word_seq_len), 0, voc_size, jnp.int32)

    fwd = jax.jit(functools.partial(transformer_forward,
                                    num_heads=num_heads, voc_size=voc_size))
    out = fwd(params, pxl_input, word_inpt)
    out = jax.block_until_ready(out)
    assert out.shape == (batch, word_seq_len, voc_size), out.shape
    assert bool(jnp.all(jnp.isfinite(out)))
    print("KERNEL_OK")
</pallas_src>

<mosaic_0001>
module attributes {stable_mosaic.version = 11 : i64} {
  func.func @_transformer_kernel(%arg0: i32, %arg1: memref<1x8x32xf32, #tpu.memory_space<vmem>>, %arg2: memref<1x8x32xf32, #tpu.memory_space<vmem>>, %arg3: memref<2x32x32xbf16, #tpu.memory_space<vmem>>, %arg4: memref<2x32x64xbf16, #tpu.memory_space<vmem>>, %arg5: memref<2x32x32xbf16, #tpu.memory_space<vmem>>, %arg6: memref<2x32x64xbf16, #tpu.memory_space<vmem>>, %arg7: memref<2x64x32xbf16, #tpu.memory_space<vmem>>, %arg8: memref<2x9x128xf32, #tpu.memory_space<vmem>>, %arg9: memref<2x32x32xbf16, #tpu.memory_space<vmem>>, %arg10: memref<2x32x64xbf16, #tpu.memory_space<vmem>>, %arg11: memref<2x32x32xbf16, #tpu.memory_space<vmem>>, %arg12: memref<2x32x32xbf16, #tpu.memory_space<vmem>>, %arg13: memref<2x32x64xbf16, #tpu.memory_space<vmem>>, %arg14: memref<2x32x32xbf16, #tpu.memory_space<vmem>>, %arg15: memref<2x32x64xbf16, #tpu.memory_space<vmem>>, %arg16: memref<2x64x32xbf16, #tpu.memory_space<vmem>>, %arg17: memref<2x14x128xf32, #tpu.memory_space<vmem>>, %arg18: memref<32x128xbf16, #tpu.memory_space<vmem>>, %arg19: memref<1x128xf32, #tpu.memory_space<vmem>>, %arg20: memref<1x8x128xf32, #tpu.memory_space<vmem>>) attributes {dimension_semantics = [#tpu.dimension_semantics<parallel>], iteration_bounds = array<i64: 2>, scalar_prefetch = 0 : i64, scratch_operands = 0 : i64, tpu.core_type = #tpu.core_type<tc>, window_params = [{transform_indices = @transform_0, window_bounds = array<i64: 1, 8, 32>}, {transform_indices = @transform_1, window_bounds = array<i64: 1, 8, 32>}, {pipeline_mode = #tpu.pipeline_mode<synchronous>, transform_indices = @transform_2, window_bounds = array<i64: 2, 32, 32>}, {pipeline_mode = #tpu.pipeline_mode<synchronous>, transform_indices = @transform_3, window_bounds = array<i64: 2, 32, 64>}, {pipeline_mode = #tpu.pipeline_mode<synchronous>, transform_indices = @transform_4, window_bounds = array<i64: 2, 32, 32>}, {pipeline_mode = #tpu.pipeline_mode<synchronous>, transform_indices = @transform_5, window_bounds = array<i64: 2, 32, 64>}, {pipeline_mode = #tpu.pipeline_mode<synchronous>, transform_indices = @transform_6, window_bounds = array<i64: 2, 64, 32>}, {pipeline_mode = #tpu.pipeline_mode<synchronous>, transform_indices = @transform_7, window_bounds = array<i64: 2, 9, 128>}, {pipeline_mode = #tpu.pipeline_mode<synchronous>, transform_indices = @transform_8, window_bounds = array<i64: 2, 32, 32>}, {pipeline_mode = #tpu.pipeline_mode<synchronous>, transform_indices = @transform_9, window_bounds = array<i64: 2, 32, 64>}, {pipeline_mode = #tpu.pipeline_mode<synchronous>, transform_indices = @transform_10, window_bounds = array<i64: 2, 32, 32>}, {pipeline_mode = #tpu.pipeline_mode<synchronous>, transform_indices = @transform_11, window_bounds = array<i64: 2, 32, 32>}, {pipeline_mode = #tpu.pipeline_mode<synchronous>, transform_indices = @transform_12, window_bounds = array<i64: 2, 32, 64>}, {pipeline_mode = #tpu.pipeline_mode<synchronous>, transform_indices = @transform_13, window_bounds = array<i64: 2, 32, 32>}, {pipeline_mode = #tpu.pipeline_mode<synchronous>, transform_indices = @transform_14, window_bounds = array<i64: 2, 32, 64>}, {pipeline_mode = #tpu.pipeline_mode<synchronous>, transform_indices = @transform_15, window_bounds = array<i64: 2, 64, 32>}, {pipeline_mode = #tpu.pipeline_mode<synchronous>, transform_indices = @transform_16, window_bounds = array<i64: 2, 14, 128>}, {pipeline_mode = #tpu.pipeline_mode<synchronous>, transform_indices = @transform_17, window_bounds = array<i64: 32, 128>}, {pipeline_mode = #tpu.pipeline_mode<synchronous>, transform_indices = @transform_18, window_bounds = array<i64: 1, 128>}, {transform_indices = @transform_19, window_bounds = array<i64: 1, 8, 128>}]} {
    %c0 = arith.constant 0 : index
    %c0_0 = arith.constant 0 : index
    %c0_1 = arith.constant 0 : index
    %0 = vector.load %arg1[%c0, %c0_0, %c0_1] : memref<1x8x32xf32, #tpu.memory_space<vmem>>, vector<1x8x32xf32>
    %1 = vector.shape_cast %0 : vector<1x8x32xf32> to vector<8x32xf32>
    %c0_2 = arith.constant 0 : index
    %c0_3 = arith.constant 0 : index
    %c0_4 = arith.constant 0 : index
    %2 = vector.load %arg8[%c0_2, %c0_3, %c0_4] : memref<2x9x128xf32, #tpu.memory_space<vmem>>, vector<1x9x128xf32>
    %3 = vector.shape_cast %2 : vector<1x9x128xf32> to vector<9x128xf32>
    %c0_5 = arith.constant 0 : index
    %c0_6 = arith.constant 0 : index
    %c0_7 = arith.constant 0 : index
    %4 = vector.load %arg3[%c0_5, %c0_6, %c0_7] : memref<2x32x32xbf16, #tpu.memory_space<vmem>>, vector<1x32x32xbf16>
    %5 = vector.shape_cast %4 : vector<1x32x32xbf16> to vector<32x32xbf16>
    %6 = vector.extract_strided_slice %3 {offsets = [0, 0], sizes = [1, 32], strides = [1, 1]} : vector<9x128xf32> to vector<1x32xf32>
    %c0_8 = arith.constant 0 : index
    %c0_9 = arith.constant 0 : index
    %c0_10 = arith.constant 0 : index
    %7 = vector.load %arg4[%c0_8, %c0_9, %c0_10] : memref<2x32x64xbf16, #tpu.memory_space<vmem>>, vector<1x32x64xbf16>
    %8 = vector.shape_cast %7 : vector<1x32x64xbf16> to vector<32x64xbf16>
    %9 = vector.extract_strided_slice %3 {offsets = [1, 0], sizes = [1, 64], strides = [1, 1]} : vector<9x128xf32> to vector<1x64xf32>
    %c0_11 = arith.constant 0 : index
    %c0_12 = arith.constant 0 : index
    %c0_13 = arith.constant 0 : index
    %10 = vector.load %arg5[%c0_11, %c0_12, %c0_13] : memref<2x32x32xbf16, #tpu.memory_space<vmem>>, vector<1x32x32xbf16>
    %11 = vector.shape_cast %10 : vector<1x32x32xbf16> to vector<32x32xbf16>
    %12 = vector.extract_strided_slice %3 {offsets = [2, 0], sizes = [1, 32], strides = [1, 1]} : vector<9x128xf32> to vector<1x32xf32>
    %13 = vector.extract_strided_slice %3 {offsets = [3, 0], sizes = [1, 32], strides = [1, 1]} : vector<9x128xf32> to vector<1x32xf32>
    %14 = vector.extract_strided_slice %3 {offsets = [4, 0], sizes = [1, 32], strides = [1, 1]} : vector<9x128xf32> to vector<1x32xf32>
    %15 = arith.truncf %1 : vector<8x32xf32> to vector<8x32xbf16>
    %cst = arith.constant dense<0.000000e+00> : vector<8x32xf32>
    %16 = tpu.matmul %15, %5, %cst {dimension_numbers = #tpu.dot_dimension_numbers<[1], [0], [0], [1], [0, 0, 1, 1], [], []>} : vector<8x32xbf16>, vector<32x32xbf16>, vector<8x32xf32> -> vector<8x32xf32>
    %17 = vector.broadcast %6 : vector<1x32xf32> to vector<8x32xf32>
    %18 = arith.addf %16, %17 : vector<8x32xf32>
    %19 = arith.truncf %1 : vector<8x32xf32> to vector<8x32xbf16>
    %cst_14 = arith.constant dense<0.000000e+00> : vector<8x64xf32>
    %20 = tpu.matmul %19, %8, %cst_14 {dimension_numbers = #tpu.dot_dimension_numbers<[1], [0], [0], [1], [0, 0, 1, 1], [], []>} : vector<8x32xbf16>, vector<32x64xbf16>, vector<8x64xf32> -> vector<8x64xf32>
    %21 = vector.broadcast %9 : vector<1x64xf32> to vector<8x64xf32>
    %22 = arith.addf %20, %21 : vector<8x64xf32>
    %23 = vector.extract_strided_slice %22 {offsets = [0, 0], sizes = [8, 32], strides = [1, 1]} : vector<8x64xf32> to vector<8x32xf32>
    %24 = vector.extract_strided_slice %22 {offsets = [0, 32], sizes = [8, 32], strides = [1, 1]} : vector<8x64xf32> to vector<8x32xf32>
    %25 = vector.extract_strided_slice %18 {offsets = [0, 0], sizes = [8, 8], strides = [1, 1]} : vector<8x32xf32> to vector<8x8xf32>
    %26 = vector.extract_strided_slice %23 {offsets = [0, 0], sizes = [8, 8], strides = [1, 1]} : vector<8x32xf32> to vector<8x8xf32>
    %27 = arith.truncf %25 : vector<8x8xf32> to vector<8x8xbf16>
    %28 = arith.truncf %26 : vector<8x8xf32> to vector<8x8xbf16>
    %cst_15 = arith.constant dense<0.000000e+00> : vector<8x8xf32>
    %29 = tpu.matmul %27, %28, %cst_15 {dimension_numbers = #tpu.dot_dimension_numbers<[1], [1], [0], [0], [0, 0, 1, 0], [], []>} : vector<8x8xbf16>, vector<8x8xbf16>, vector<8x8xf32> -> vector<8x8xf32>
    %30 = vector.extract_strided_slice %18 {offsets = [0, 8], sizes = [8, 8], strides = [1, 1]} : vector<8x32xf32> to vector<8x8xf32>
    %31 = vector.extract_strided_slice %23 {offsets = [0, 8], sizes = [8, 8], strides = [1, 1]} : vector<8x32xf32> to vector<8x8xf32>
    %32 = arith.truncf %30 : vector<8x8xf32> to vector<8x8xbf16>
    %33 = arith.truncf %31 : vector<8x8xf32> to vector<8x8xbf16>
    %cst_16 = arith.constant dense<0.000000e+00> : vector<8x8xf32>
    %34 = tpu.matmul %32, %33, %cst_16 {dimension_numbers = #tpu.dot_dimension_numbers<[1], [1], [0], [0], [0, 0, 1, 0], [], []>} : vector<8x8xbf16>, vector<8x8xbf16>, vector<8x8xf32> -> vector<8x8xf32>
    %35 = vector.extract_strided_slice %18 {offsets = [0, 16], sizes = [8, 8], strides = [1, 1]} : vector<8x32xf32> to vector<8x8xf32>
    %36 = vector.extract_strided_slice %23 {offsets = [0, 16], sizes = [8, 8], strides = [1, 1]} : vector<8x32xf32> to vector<8x8xf32>
    %37 = arith.truncf %35 : vector<8x8xf32> to vector<8x8xbf16>
    %38 = arith.truncf %36 : vector<8x8xf32> to vector<8x8xbf16>
    %cst_17 = arith.constant dense<0.000000e+00> : vector<8x8xf32>
    %39 = tpu.matmul %37, %38, %cst_17 {dimension_numbers = #tpu.dot_dimension_numbers<[1], [1], [0], [0], [0, 0, 1, 0], [], []>} : vector<8x8xbf16>, vector<8x8xbf16>, vector<8x8xf32> -> vector<8x8xf32>
    %40 = vector.extract_strided_slice %18 {offsets = [0, 24], sizes = [8, 8], strides = [1, 1]} : vector<8x32xf32> to vector<8x8xf32>
    %41 = vector.extract_strided_slice %23 {offsets = [0, 24], sizes = [8, 8], strides = [1, 1]} : vector<8x32xf32> to vector<8x8xf32>
    %42 = arith.truncf %40 : vector<8x8xf32> to vector<8x8xbf16>
    %43 = arith.truncf %41 : vector<8x8xf32> to vector<8x8xbf16>
    %cst_18 = arith.constant dense<0.000000e+00> : vector<8x8xf32>
    %44 = tpu.matmul %42, %43, %cst_18 {dimension_numbers = #tpu.dot_dimension_numbers<[1], [1], [0], [0], [0, 0, 1, 0], [], []>} : vector<8x8xbf16>, vector<8x8xbf16>, vector<8x8xf32> -> vector<8x8xf32>
    %45 = vector.shape_cast %29 : vector<8x8xf32> to vector<1x8x8xf32>
    %46 = vector.shape_cast %34 : vector<8x8xf32> to vector<1x8x8xf32>
    %47 = vector.shape_cast %39 : vector<8x8xf32> to vector<1x8x8xf32>
    %48 = vector.shape_cast %44 : vector<8x8xf32> to vector<1x8x8xf32>
    %49 = tpu.concatenate %45, %46, %47, %48 in 0 : vector<1x8x8xf32>, vector<1x8x8xf32>, vector<1x8x8xf32>, vector<1x8x8xf32> -> vector<4x8x8xf32>
    %cst_19 = arith.constant 0.353553385 : f32
    %50 = vector.broadcast %cst_19 : f32 to vector<4x8x8xf32>
    %51 = arith.mulf %49, %50 : vector<4x8x8xf32>
    %cst_20 = arith.constant dense<0xFF800000> : vector<4x8xf32>
    %52 = vector.multi_reduction <maximumf>, %51, %cst_20 [2] : vector<4x8x8xf32> to vector<4x8xf32>
    %53 = vector.shape_cast %52 : vector<4x8xf32> to vector<4x8x1xf32>
    %54 = vector.broadcast %53 : vector<4x8x1xf32> to vector<4x8x8xf32>
    %55 = arith.subf %51, %54 : vector<4x8x8xf32>
    %56 = math.exp %55 : vector<4x8x8xf32>
    %cst_21 = arith.constant dense<0.000000e+00> : vector<4x8xf32>
    %57 = vector.multi_reduction <add>, %56, %cst_21 [2] : vector<4x8x8xf32> to vector<4x8xf32>
    %58 = vector.shape_cast %57 : vector<4x8xf32> to vector<4x8x1xf32>
    %59 = tpu.reciprocal %58 {approx = true} : vector<4x8x1xf32> -> vector<4x8x1xf32>
    %60 = vector.broadcast %59 : vector<4x8x1xf32> to vector<4x8x8xf32>
    %61 = arith.mulf %56, %60 : vector<4x8x8xf32>
    %cst_22 = arith.constant 0.000000e+00 : f32
    %62 = vector.broadcast %cst_22 : f32 to vector<8x32xf32>
    %63 = vector.extract_strided_slice %61 {offsets = [0, 0, 0], sizes = [1, 8, 8], strides = [1, 1, 1]} : vector<4x8x8xf32> to vector<1x8x8xf32>
    %64 = vector.shape_cast %63 : vector<1x8x8xf32> to vector<8x8xf32>
    %65 = vector.extract_strided_slice %24 {offsets = [0, 0], sizes = [8, 8], strides = [1, 1]} : vector<8x32xf32> to vector<8x8xf32>
    %66 = arith.truncf %64 : vector<8x8xf32> to vector<8x8xbf16>
    %67 = arith.truncf %65 : vector<8x8xf32> to vector<8x8xbf16>
    %cst_23 = arith.constant dense<0.000000e+00> : vector<8x8xf32>
    %68 = tpu.matmul %66, %67, %cst_23 {dimension_numbers = #tpu.dot_dimension_numbers<[1], [0], [0], [1], [0, 0, 1, 1], [], []>} : vector<8x8xbf16>, vector<8x8xbf16>, vector<8x8xf32> -> vector<8x8xf32>
    %69 = vector.extract_strided_slice %11 {offsets = [0, 0], sizes = [8, 32], strides = [1, 1]} : vector<32x32xbf16> to vector<8x32xbf16>
    %70 = arith.truncf %68 : vector<8x8xf32> to vector<8x8xbf16>
    %cst_24 = arith.constant dense<0.000000e+00> : vector<8x32xf32>
    %71 = tpu.matmul %70, %69, %cst_24 {dimension_numbers = #tpu.dot_dimension_numbers<[1], [0], [0], [1], [0, 0, 1, 1], [], []>} : vector<8x8xbf16>, vector<8x32xbf16>, vector<8x32xf32> -> vector<8x32xf32>
    %72 = arith.addf %62, %71 : vector<8x32xf32>
    %73 = vector.extract_strided_slice %61 {offsets = [1, 0, 0], sizes = [1, 8, 8], strides = [1, 1, 1]} : vector<4x8x8xf32> to vector<1x8x8xf32>
    %74 = vector.shape_cast %73 : vector<1x8x8xf32> to vector<8x8xf32>
    %75 = vector.extract_strided_slice %24 {offsets = [0, 8], sizes = [8, 8], strides = [1, 1]} : vector<8x32xf32> to vector<8x8xf32>
    %76 = arith.truncf %74 : vector<8x8xf32> to vector<8x8xbf16>
    %77 = arith.truncf %75 : vector<8x8xf32> to vector<8x8xbf16>
    %cst_25 = arith.constant dense<0.000000e+00> : vector<8x8xf32>
    %78 = tpu.matmul %76, %77, %cst_25 {dimension_numbers = #tpu.dot_dimension_numbers<[1], [0], [0], [1], [0, 0, 1, 1], [], []>} : vector<8x8xbf16>, vector<8x8xbf16>, vector<8x8xf32> -> vector<8x8xf32>
    %79 = vector.extract_strided_slice %11 {offsets = [8, 0], sizes = [8, 32], strides = [1, 1]} : vector<32x32xbf16> to vector<8x32xbf16>
    %80 = arith.truncf %78 : vector<8x8xf32> to vector<8x8xbf16>
    %cst_26 = arith.constant dense<0.000000e+00> : vector<8x32xf32>
    %81 = tpu.matmul %80, %79, %cst_26 {dimension_numbers = #tpu.dot_dimension_numbers<[1], [0], [0], [1], [0, 0, 1, 1], [], []>} : vector<8x8xbf16>, vector<8x32xbf16>, vector<8x32xf32> -> vector<8x32xf32>
    %82 = arith.addf %72, %81 : vector<8x32xf32>
    %83 = vector.extract_strided_slice %61 {offsets = [2, 0, 0], sizes = [1, 8, 8], strides = [1, 1, 1]} : vector<4x8x8xf32> to vector<1x8x8xf32>
    %84 = vector.shape_cast %83 : vector<1x8x8xf32> to vector<8x8xf32>
    %85 = vector.extract_strided_slice %24 {offsets = [0, 16], sizes = [8, 8], strides = [1, 1]} : vector<8x32xf32> to vector<8x8xf32>
    %86 = arith.truncf %84 : vector<8x8xf32> to vector<8x8xbf16>
    %87 = arith.truncf %85 : vector<8x8xf32> to vector<8x8xbf16>
    %cst_27 = arith.constant dense<0.000000e+00> : vector<8x8xf32>
    %88 = tpu.matmul %86, %87, %cst_27 {dimension_numbers = #tpu.dot_dimension_numbers<[1], [0], [0], [1], [0, 0, 1, 1], [], []>} : vector<8x8xbf16>, vector<8x8xbf16>, vector<8x8xf32> -> vector<8x8xf32>
    %89 = vector.extract_strided_slice %11 {offsets = [16, 0], sizes = [8, 32], strides = [1, 1]} : vector<32x32xbf16> to vector<8x32xbf16>
    %90 = arith.truncf %88 : vector<8x8xf32> to vector<8x8xbf16>
    %cst_28 = arith.constant dense<0.000000e+00> : vector<8x32xf32>
    %91 = tpu.matmul %90, %89, %cst_28 {dimension_numbers = #tpu.dot_dimension_numbers<[1], [0], [0], [1], [0, 0, 1, 1], [], []>} : vector<8x8xbf16>, vector<8x32xbf16>, vector<8x32xf32> -> vector<8x32xf32>
    %92 = arith.addf %82, %91 : vector<8x32xf32>
    %93 = vector.extract_strided_slice %61 {offsets = [3, 0, 0], sizes = [1, 8, 8], strides = [1, 1, 1]} : vector<4x8x8xf32> to vector<1x8x8xf32>
    %94 = vector.shape_cast %93 : vector<1x8x8xf32> to vector<8x8xf32>
    %95 = vector.extract_strided_slice %24 {offsets = [0, 24], sizes = [8, 8], strides = [1, 1]} : vector<8x32xf32> to vector<8x8xf32>
    %96 = arith.truncf %94 : vector<8x8xf32> to vector<8x8xbf16>
    %97 = arith.truncf %95 : vector<8x8xf32> to vector<8x8xbf16>
    %cst_29 = arith.constant dense<0.000000e+00> : vector<8x8xf32>
    %98 = tpu.matmul %96, %97, %cst_29 {dimension_numbers = #tpu.dot_dimension_numbers<[1], [0], [0], [1], [0, 0, 1, 1], [], []>} : vector<8x8xbf16>, vector<8x8xbf16>, vector<8x8xf32> -> vector<8x8xf32>
    %99 = vector.extract_strided_slice %11 {offsets = [24, 0], sizes = [8, 32], strides = [1, 1]} : vector<32x32xbf16> to vector<8x32xbf16>
    %100 = arith.truncf %98 : vector<8x8xf32> to vector<8x8xbf16>
    %cst_30 = arith.constant dense<0.000000e+00> : vector<8x32xf32>
    %101 = tpu.matmul %100, %99, %cst_30 {dimension_numbers = #tpu.dot_dimension_numbers<[1], [0], [0], [1], [0, 0, 1, 1], [], []>} : vector<8x8xbf16>, vector<8x32xbf16>, vector<8x32xf32> -> vector<8x32xf32>
    %102 = arith.addf %92, %101 : vector<8x32xf32>
    %103 = vector.broadcast %12 : vector<1x32xf32> to vector<8x32xf32>
    %104 = arith.addf %102, %103 : vector<8x32xf32>
    %105 = arith.addf %1, %104 : vector<8x32xf32>
    %cst_31 = arith.constant dense<0.000000e+00> : vector<8xf32>
    %106 = vector.multi_reduction <add>, %105, %cst_31 [1] : vector<8x32xf32> to vector<8xf32>
    %107 = vector.shape_cast %106 : vector<8xf32> to vector<8x1xf32>
    %cst_32 = arith.constant 3.200000e+01 : f32
    %108 = vector.broadcast %cst_32 : f32 to vector<8x1xf32>
    %109 = arith.divf %107, %108 : vector<8x1xf32>
    %110 = vector.broadcast %109 : vector<8x1xf32> to vector<8x32xf32>
    %111 = arith.subf %105, %110 : vector<8x32xf32>
    %112 = arith.mulf %111, %111 : vector<8x32xf32>
    %cst_33 = arith.constant dense<0.000000e+00> : vector<8xf32>
    %113 = vector.multi_reduction <add>, %112, %cst_33 [1] : vector<8x32xf32> to vector<8xf32>
    %114 = vector.shape_cast %113 : vector<8xf32> to vector<8x1xf32>
    %cst_34 = arith.constant 3.200000e+01 : f32
    %115 = vector.broadcast %cst_34 : f32 to vector<8x1xf32>
    %116 = arith.divf %114, %115 : vector<8x1xf32>
    %117 = vector.broadcast %109 : vector<8x1xf32> to vector<8x32xf32>
    %118 = arith.subf %105, %117 : vector<8x32xf32>
    %cst_35 = arith.constant 9.99999974E-6 : f32
    %119 = vector.broadcast %cst_35 : f32 to vector<8x1xf32>
    %120 = arith.addf %116, %119 : vector<8x1xf32>
    %121 = math.rsqrt %120 : vector<8x1xf32>
    %122 = vector.broadcast %121 : vector<8x1xf32> to vector<8x32xf32>
    %123 = arith.mulf %118, %122 : vector<8x32xf32>
    %124 = vector.broadcast %13 : vector<1x32xf32> to vector<8x32xf32>
    %125 = arith.mulf %123, %124 : vector<8x32xf32>
    %126 = vector.broadcast %14 : vector<1x32xf32> to vector<8x32xf32>
    %127 = arith.addf %125, %126 : vector<8x32xf32>
    %c0_36 = arith.constant 0 : index
    %c0_37 = arith.constant 0 : index
    %c0_38 = arith.constant 0 : index
    %128 = vector.load %arg6[%c0_36, %c0_37, %c0_38] : memref<2x32x64xbf16, #tpu.memory_space<vmem>>, vector<1x32x64xbf16>
    %129 = vector.shape_cast %128 : vector<1x32x64xbf16> to vector<32x64xbf16>
    %130 = vector.extract_strided_slice %3 {offsets = [5, 0], sizes = [1, 64], strides = [1, 1]} : vector<9x128xf32> to vector<1x64xf32>
    %c0_39 = arith.constant 0 : index
    %c0_40 = arith.constant 0 : index
    %c0_41 = arith.constant 0 : index
    %131 = vector.load %arg7[%c0_39, %c0_40, %c0_41] : memref<2x64x32xbf16, #tpu.memory_space<vmem>>, vector<1x64x32xbf16>
    %132 = vector.shape_cast %131 : vector<1x64x32xbf16> to vector<64x32xbf16>
    %133 = vector.extract_strided_slice %3 {offsets = [6, 0], sizes = [1, 32], strides = [1, 1]} : vector<9x128xf32> to vector<1x32xf32>
    %134 = vector.extract_strided_slice %3 {offsets = [7, 0], sizes = [1, 32], strides = [1, 1]} : vector<9x128xf32> to vector<1x32xf32>
    %135 = vector.extract_strided_slice %3 {offsets = [8, 0], sizes = [1, 32], strides = [1, 1]} : vector<9x128xf32> to vector<1x32xf32>
    %136 = arith.truncf %127 : vector<8x32xf32> to vector<8x32xbf16>
    %cst_42 = arith.constant dense<0.000000e+00> : vector<8x64xf32>
    %137 = tpu.matmul %136, %129, %cst_42 {dimension_numbers = #tpu.dot_dimension_numbers<[1], [0], [0], [1], [0, 0, 1, 1], [], []>} : vector<8x32xbf16>, vector<32x64xbf16>, vector<8x64xf32> -> vector<8x64xf32>
    %138 = vector.broadcast %130 : vector<1x64xf32> to vector<8x64xf32>
    %139 = arith.addf %137, %138 : vector<8x64xf32>
    %cst_43 = arith.constant 0.000000e+00 : f32
    %140 = vector.broadcast %cst_43 : f32 to vector<8x64xf32>
    %141 = arith.maximumf %139, %140 : vector<8x64xf32>
    %142 = arith.truncf %141 : vector<8x64xf32> to vector<8x64xbf16>
    %cst_44 = arith.constant dense<0.000000e+00> : vector<8x32xf32>
    %143 = tpu.matmul %142, %132, %cst_44 {dimension_numbers = #tpu.dot_dimension_numbers<[1], [0], [0], [1], [0, 0, 1, 1], [], []>} : vector<8x64xbf16>, vector<64x32xbf16>, vector<8x32xf32> -> vector<8x32xf32>
    %144 = vector.broadcast %133 : vector<1x32xf32> to vector<8x32xf32>
    %145 = arith.addf %143, %144 : vector<8x32xf32>
    %146 = arith.addf %127, %145 : vector<8x32xf32>
    %cst_45 = arith.constant dense<0.000000e+00> : vector<8xf32>
    %147 = vector.multi_reduction <add>, %146, %cst_45 [1] : vector<8x32xf32> to vector<8xf32>
    %148 = vector.shape_cast %147 : vector<8xf32> to vector<8x1xf32>
    %cst_46 = arith.constant 3.200000e+01 : f32
    %149 = vector.broadcast %cst_46 : f32 to vector<8x1xf32>
    %150 = arith.divf %148, %149 : vector<8x1xf32>
    %151 = vector.broadcast %150 : vector<8x1xf32> to vector<8x32xf32>
    %152 = arith.subf %146, %151 : vector<8x32xf32>
    %153 = arith.mulf %152, %152 : vector<8x32xf32>
    %cst_47 = arith.constant dense<0.000000e+00> : vector<8xf32>
    %154 = vector.multi_reduction <add>, %153, %cst_47 [1] : vector<8x32xf32> to vector<8xf32>
    %155 = vector.shape_cast %154 : vector<8xf32> to vector<8x1xf32>
    %cst_48 = arith.constant 3.200000e+01 : f32
    %156 = vector.broadcast %cst_48 : f32 to vector<8x1xf32>
    %157 = arith.divf %155, %156 : vector<8x1xf32>
    %158 = vector.broadcast %150 : vector<8x1xf32> to vector<8x32xf32>
    %159 = arith.subf %146, %158 : vector<8x32xf32>
    %cst_49 = arith.constant 9.99999974E-6 : f32
    %160 = vector.broadcast %cst_49 : f32 to vector<8x1xf32>
    %161 = arith.addf %157, %160 : vector<8x1xf32>
    %162 = math.rsqrt %161 : vector<8x1xf32>
    %163 = vector.broadcast %162 : vector<8x1xf32> to vector<8x32xf32>
    %164 = arith.mulf %159, %163 : vector<8x32xf32>
    %165 = vector.broadcast %134 : vector<1x32xf32> to vector<8x32xf32>
    %166 = arith.mulf %164, %165 : vector<8x32xf32>
    %167 = vector.broadcast %135 : vector<1x32xf32> to vector<8x32xf32>
    %168 = arith.addf %166, %167 : vector<8x32xf32>
    %c1 = arith.constant 1 : index
    %c0_50 = arith.constant 0 : index
    %c0_51 = arith.constant 0 : index
    %169 = vector.load %arg8[%c1, %c0_50, %c0_51] : memref<2x9x128xf32, #tpu.memory_space<vmem>>, vector<1x9x128xf32>
    %170 = vector.shape_cast %169 : vector<1x9x128xf32> to vector<9x128xf32>
    %c1_52 = arith.constant 1 : index
    %c0_53 = arith.constant 0 : index
    %c0_54 = arith.constant 0 : index
    %171 = vector.load %arg3[%c1_52, %c0_53, %c0_54] : memref<2x32x32xbf16, #tpu.memory_space<vmem>>, vector<1x32x32xbf16>
    %172 = vector.shape_cast %171 : vector<1x32x32xbf16> to vector<32x32xbf16>
    %173 = vector.extract_strided_slice %170 {offsets = [0, 0], sizes = [1, 32], strides = [1, 1]} : vector<9x128xf32> to vector<1x32xf32>
    %c1_55 = arith.constant 1 : index
    %c0_56 = arith.constant 0 : index
    %c0_57 = arith.constant 0 : index
    %174 = vector.load %arg4[%c1_55, %c0_56, %c0_57] : memref<2x32x64xbf16, #tpu.memory_space<vmem>>, vector<1x32x64xbf16>
    %175 = vector.shape_cast %174 : vector<1x32x64xbf16> to vector<32x64xbf16>
    %176 = vector.extract_strided_slice %170 {offsets = [1, 0], sizes = [1, 64], strides = [1, 1]} : vector<9x128xf32> to vector<1x64xf32>
    %c1_58 = arith.constant 1 : index
    %c0_59 = arith.constant 0 : index
    %c0_60 = arith.constant 0 : index
    %177 = vector.load %arg5[%c1_58, %c0_59, %c0_60] : memref<2x32x32xbf16, #tpu.memory_space<vmem>>, vector<1x32x32xbf16>
    %178 = vector.shape_cast %177 : vector<1x32x32xbf16> to vector<32x32xbf16>
    %179 = vector.extract_strided_slice %170 {offsets = [2, 0], sizes = [1, 32], strides = [1, 1]} : vector<9x128xf32> to vector<1x32xf32>
    %180 = vector.extract_strided_slice %170 {offsets = [3, 0], sizes = [1, 32], strides = [1, 1]} : vector<9x128xf32> to vector<1x32xf32>
    %181 = vector.extract_strided_slice %170 {offsets = [4, 0], sizes = [1, 32], strides = [1, 1]} : vector<9x128xf32> to vector<1x32xf32>
    %182 = arith.truncf %168 : vector<8x32xf32> to vector<8x32xbf16>
    %cst_61 = arith.constant dense<0.000000e+00> : vector<8x32xf32>
    %183 = tpu.matmul %182, %172, %cst_61 {dimension_numbers = #tpu.dot_dimension_numbers<[1], [0], [0], [1], [0, 0, 1, 1], [], []>} : vector<8x32xbf16>, vector<32x32xbf16>, vector<8x32xf32> -> vector<8x32xf32>
    %184 = vector.broadcast %173 : vector<1x32xf32> to vector<8x32xf32>
    %185 = arith.addf %183, %184 : vector<8x32xf32>
    %186 = arith.truncf %168 : vector<8x32xf32> to vector<8x32xbf16>
    %cst_62 = arith.constant dense<0.000000e+00> : vector<8x64xf32>
    %187 = tpu.matmul %186, %175, %cst_62 {dimension_numbers = #tpu.dot_dimension_numbers<[1], [0], [0], [1], [0, 0, 1, 1], [], []>} : vector<8x32xbf16>, vector<32x64xbf16>, vector<8x64xf32> -> vector<8x64xf32>
    %188 = vector.broadcast %176 : vector<1x64xf32> to vector<8x64xf32>
    %189 = arith.addf %187, %188 : vector<8x64xf32>
    %190 = vector.extract_strided_slice %189 {offsets = [0, 0], sizes = [8, 32], strides = [1, 1]} : vector<8x64xf32> to vector<8x32xf32>
    %191 = vector.extract_strided_slice %189 {offsets = [0, 32], sizes = [8, 32], strides = [1, 1]} : vector<8x64xf32> to vector<8x32xf32>
    %192 = vector.extract_strided_slice %185 {offsets = [0, 0], sizes = [8, 8], strides = [1, 1]} : vector<8x32xf32> to vector<8x8xf32>
    %193 = vector.extract_strided_slice %190 {offsets = [0, 0], sizes = [8, 8], strides = [1, 1]} : vector<8x32xf32> to vector<8x8xf32>
    %194 = arith.truncf %192 : vector<8x8xf32> to vector<8x8xbf16>
    %195 = arith.truncf %193 : vector<8x8xf32> to vector<8x8xbf16>
    %cst_63 = arith.constant dense<0.000000e+00> : vector<8x8xf32>
    %196 = tpu.matmul %194, %195, %cst_63 {dimension_numbers = #tpu.dot_dimension_numbers<[1], [1], [0], [0], [0, 0, 1, 0], [], []>} : vector<8x8xbf16>, vector<8x8xbf16>, vector<8x8xf32> -> vector<8x8xf32>
    %197 = vector.extract_strided_slice %185 {offsets = [0, 8], sizes = [8, 8], strides = [1, 1]} : vector<8x32xf32> to vector<8x8xf32>
    %198 = vector.extract_strided_slice %190 {offsets = [0, 8], sizes = [8, 8], strides = [1, 1]} : vector<8x32xf32> to vector<8x8xf32>
    %199 = arith.truncf %197 : vector<8x8xf32> to vector<8x8xbf16>
    %200 = arith.truncf %198 : vector<8x8xf32> to vector<8x8xbf16>
    %cst_64 = arith.constant dense<0.000000e+00> : vector<8x8xf32>
    %201 = tpu.matmul %199, %200, %cst_64 {dimension_numbers = #tpu.dot_dimension_numbers<[1], [1], [0], [0], [0, 0, 1, 0], [], []>} : vector<8x8xbf16>, vector<8x8xbf16>, vector<8x8xf32> -> vector<8x8xf32>
    %202 = vector.extract_strided_slice %185 {offsets = [0, 16], sizes = [8, 8], strides = [1, 1]} : vector<8x32xf32> to vector<8x8xf32>
    %203 = vector.extract_strided_slice %190 {offsets = [0, 16], sizes = [8, 8], strides = [1, 1]} : vector<8x32xf32> to vector<8x8xf32>
    %204 = arith.truncf %202 : vector<8x8xf32> to vector<8x8xbf16>
    %205 = arith.truncf %203 : vector<8x8xf32> to vector<8x8xbf16>
    %cst_65 = arith.constant dense<0.000000e+00> : vector<8x8xf32>
    %206 = tpu.matmul %204, %205, %cst_65 {dimension_numbers = #tpu.dot_dimension_numbers<[1], [1], [0], [0], [0, 0, 1, 0], [], []>} : vector<8x8xbf16>, vector<8x8xbf16>, vector<8x8xf32> -> vector<8x8xf32>
    %207 = vector.extract_strided_slice %185 {offsets = [0, 24], sizes = [8, 8], strides = [1, 1]} : vector<8x32xf32> to vector<8x8xf32>
    %208 = vector.extract_strided_slice %190 {offsets = [0, 24], sizes = [8, 8], strides = [1, 1]} : vector<8x32xf32> to vector<8x8xf32>
    %209 = arith.truncf %207 : vector<8x8xf32> to vector<8x8xbf16>
    %210 = arith.truncf %208 : vector<8x8xf32> to vector<8x8xbf16>
    %cst_66 = arith.constant dense<0.000000e+00> : vector<8x8xf32>
    %211 = tpu.matmul %209, %210, %cst_66 {dimension_numbers = #tpu.dot_dimension_numbers<[1], [1], [0], [0], [0, 0, 1, 0], [], []>} : vector<8x8xbf16>, vector<8x8xbf16>, vector<8x8xf32> -> vector<8x8xf32>
    %212 = vector.shape_cast %196 : vector<8x8xf32> to vector<1x8x8xf32>
    %213 = vector.shape_cast %201 : vector<8x8xf32> to vector<1x8x8xf32>
    %214 = vector.shape_cast %206 : vector<8x8xf32> to vector<1x8x8xf32>
    %215 = vector.shape_cast %211 : vector<8x8xf32> to vector<1x8x8xf32>
    %216 = tpu.concatenate %212, %213, %214, %215 in 0 : vector<1x8x8xf32>, vector<1x8x8xf32>, vector<1x8x8xf32>, vector<1x8x8xf32> -> vector<4x8x8xf32>
    %cst_67 = arith.constant 0.353553385 : f32
    %217 = vector.broadcast %cst_67 : f32 to vector<4x8x8xf32>
    %218 = arith.mulf %216, %217 : vector<4x8x8xf32>
    %cst_68 = arith.constant dense<0xFF800000> : vector<4x8xf32>
    %219 = vector.multi_reduction <maximumf>, %218, %cst_68 [2] : vector<4x8x8xf32> to vector<4x8xf32>
    %220 = vector.shape_cast %219 : vector<4x8xf32> to vector<4x8x1xf32>
    %221 = vector.broadcast %220 : vector<4x8x1xf32> to vector<4x8x8xf32>
    %222 = arith.subf %218, %221 : vector<4x8x8xf32>
    %223 = math.exp %222 : vector<4x8x8xf32>
    %cst_69 = arith.constant dense<0.000000e+00> : vector<4x8xf32>
    %224 = vector.multi_reduction <add>, %223, %cst_69 [2] : vector<4x8x8xf32> to vector<4x8xf32>
    %225 = vector.shape_cast %224 : vector<4x8xf32> to vector<4x8x1xf32>
    %226 = tpu.reciprocal %225 {approx = true} : vector<4x8x1xf32> -> vector<4x8x1xf32>
    %227 = vector.broadcast %226 : vector<4x8x1xf32> to vector<4x8x8xf32>
    %228 = arith.mulf %223, %227 : vector<4x8x8xf32>
    %cst_70 = arith.constant 0.000000e+00 : f32
    %229 = vector.broadcast %cst_70 : f32 to vector<8x32xf32>
    %230 = vector.extract_strided_slice %228 {offsets = [0, 0, 0], sizes = [1, 8, 8], strides = [1, 1, 1]} : vector<4x8x8xf32> to vector<1x8x8xf32>
    %231 = vector.shape_cast %230 : vector<1x8x8xf32> to vector<8x8xf32>
    %232 = vector.extract_strided_slice %191 {offsets = [0, 0], sizes = [8, 8], strides = [1, 1]} : vector<8x32xf32> to vector<8x8xf32>
    %233 = arith.truncf %231 : vector<8x8xf32> to vector<8x8xbf16>
    %234 = arith.truncf %232 : vector<8x8xf32> to vector<8x8xbf16>
    %cst_71 = arith.constant dense<0.000000e+00> : vector<8x8xf32>
    %235 = tpu.matmul %233, %234, %cst_71 {dimension_numbers = #tpu.dot_dimension_numbers<[1], [0], [0], [1], [0, 0, 1, 1], [], []>} : vector<8x8xbf16>, vector<8x8xbf16>, vector<8x8xf32> -> vector<8x8xf32>
    %236 = vector.extract_strided_slice %178 {offsets = [0, 0], sizes = [8, 32], strides = [1, 1]} : vector<32x32xbf16> to vector<8x32xbf16>
    %237 = arith.truncf %235 : vector<8x8xf32> to vector<8x8xbf16>
    %cst_72 = arith.constant dense<0.000000e+00> : vector<8x32xf32>
    %238 = tpu.matmul %237, %236, %cst_72 {dimension_numbers = #tpu.dot_dimension_numbers<[1], [0], [0], [1], [0, 0, 1, 1], [], []>} : vector<8x8xbf16>, vector<8x32xbf16>, vector<8x32xf32> -> vector<8x32xf32>
    %239 = arith.addf %229, %238 : vector<8x32xf32>
    %240 = vector.extract_strided_slice %228 {offsets = [1, 0, 0], sizes = [1, 8, 8], strides = [1, 1, 1]} : vector<4x8x8xf32> to vector<1x8x8xf32>
    %241 = vector.shape_cast %240 : vector<1x8x8xf32> to vector<8x8xf32>
    %242 = vector.extract_strided_slice %191 {offsets = [0, 8], sizes = [8, 8], strides = [1, 1]} : vector<8x32xf32> to vector<8x8xf32>
    %243 = arith.truncf %241 : vector<8x8xf32> to vector<8x8xbf16>
    %244 = arith.truncf %242 : vector<8x8xf32> to vector<8x8xbf16>
    %cst_73 = arith.constant dense<0.000000e+00> : vector<8x8xf32>
    %245 = tpu.matmul %243, %244, %cst_73 {dimension_numbers = #tpu.dot_dimension_numbers<[1], [0], [0], [1], [0, 0, 1, 1], [], []>} : vector<8x8xbf16>, vector<8x8xbf16>, vector<8x8xf32> -> vector<8x8xf32>
    %246 = vector.extract_strided_slice %178 {offsets = [8, 0], sizes = [8, 32], strides = [1, 1]} : vector<32x32xbf16> to vector<8x32xbf16>
    %247 = arith.truncf %245 : vector<8x8xf32> to vector<8x8xbf16>
    %cst_74 = arith.constant dense<0.000000e+00> : vector<8x32xf32>
    %248 = tpu.matmul %247, %246, %cst_74 {dimension_numbers = #tpu.dot_dimension_numbers<[1], [0], [0], [1], [0, 0, 1, 1], [], []>} : vector<8x8xbf16>, vector<8x32xbf16>, vector<8x32xf32> -> vector<8x32xf32>
    %249 = arith.addf %239, %248 : vector<8x32xf32>
    %250 = vector.extract_strided_slice %228 {offsets = [2, 0, 0], sizes = [1, 8, 8], strides = [1, 1, 1]} : vector<4x8x8xf32> to vector<1x8x8xf32>
    %251 = vector.shape_cast %250 : vector<1x8x8xf32> to vector<8x8xf32>
    %252 = vector.extract_strided_slice %191 {offsets = [0, 16], sizes = [8, 8], strides = [1, 1]} : vector<8x32xf32> to vector<8x8xf32>
    %253 = arith.truncf %251 : vector<8x8xf32> to vector<8x8xbf16>
    %254 = arith.truncf %252 : vector<8x8xf32> to vector<8x8xbf16>
    %cst_75 = arith.constant dense<0.000000e+00> : vector<8x8xf32>
    %255 = tpu.matmul %253, %254, %cst_75 {dimension_numbers = #tpu.dot_dimension_numbers<[1], [0], [0], [1], [0, 0, 1, 1], [], []>} : vector<8x8xbf16>, vector<8x8xbf16>, vector<8x8xf32> -> vector<8x8xf32>
    %256 = vector.extract_strided_slice %178 {offsets = [16, 0], sizes = [8, 32], strides = [1, 1]} : vector<32x32xbf16> to vector<8x32xbf16>
    %257 = arith.truncf %255 : vector<8x8xf32> to vector<8x8xbf16>
    %cst_76 = arith.constant dense<0.000000e+00> : vector<8x32xf32>
    %258 = tpu.matmul %257, %256, %cst_76 {dimension_numbers = #tpu.dot_dimension_numbers<[1], [0], [0], [1], [0, 0, 1, 1], [], []>} : vector<8x8xbf16>, vector<8x32xbf16>, vector<8x32xf32> -> vector<8x32xf32>
    %259 = arith.addf %249, %258 : vector<8x32xf32>
    %260 = vector.extract_strided_slice %228 {offsets = [3, 0, 0], sizes = [1, 8, 8], strides = [1, 1, 1]} : vector<4x8x8xf32> to vector<1x8x8xf32>
    %261 = vector.shape_cast %260 : vector<1x8x8xf32> to vector<8x8xf32>
    %262 = vector.extract_strided_slice %191 {offsets = [0, 24], sizes = [8, 8], strides = [1, 1]} : vector<8x32xf32> to vector<8x8xf32>
    %263 = arith.truncf %261 : vector<8x8xf32> to vector<8x8xbf16>
    %264 = arith.truncf %262 : vector<8x8xf32> to vector<8x8xbf16>
    %cst_77 = arith.constant dense<0.000000e+00> : vector<8x8xf32>
    %265 = tpu.matmul %263, %264, %cst_77 {dimension_numbers = #tpu.dot_dimension_numbers<[1], [0], [0], [1], [0, 0, 1, 1], [], []>} : vector<8x8xbf16>, vector<8x8xbf16>, vector<8x8xf32> -> vector<8x8xf32>
    %266 = vector.extract_strided_slice %178 {offsets = [24, 0], sizes = [8, 32], strides = [1, 1]} : vector<32x32xbf16> to vector<8x32xbf16>
    %267 = arith.truncf %265 : vector<8x8xf32> to vector<8x8xbf16>
    %cst_78 = arith.constant dense<0.000000e+00> : vector<8x32xf32>
    %268 = tpu.matmul %267, %266, %cst_78 {dimension_numbers = #tpu.dot_dimension_numbers<[1], [0], [0], [1], [0, 0, 1, 1], [], []>} : vector<8x8xbf16>, vector<8x32xbf16>, vector<8x32xf32> -> vector<8x32xf32>
    %269 = arith.addf %259, %268 : vector<8x32xf32>
    %270 = vector.broadcast %179 : vector<1x32xf32> to vector<8x32xf32>
    %271 = arith.addf %269, %270 : vector<8x32xf32>
    %272 = arith.addf %168, %271 : vector<8x32xf32>
    %cst_79 = arith.constant dense<0.000000e+00> : vector<8xf32>
    %273 = vector.multi_reduction <add>, %272, %cst_79 [1] : vector<8x32xf32> to vector<8xf32>
    %274 = vector.shape_cast %273 : vector<8xf32> to vector<8x1xf32>
    %cst_80 = arith.constant 3.200000e+01 : f32
    %275 = vector.broadcast %cst_80 : f32 to vector<8x1xf32>
    %276 = arith.divf %274, %275 : vector<8x1xf32>
    %277 = vector.broadcast %276 : vector<8x1xf32> to vector<8x32xf32>
    %278 = arith.subf %272, %277 : vector<8x32xf32>
    %279 = arith.mulf %278, %278 : vector<8x32xf32>
    %cst_81 = arith.constant dense<0.000000e+00> : vector<8xf32>
    %280 = vector.multi_reduction <add>, %279, %cst_81 [1] : vector<8x32xf32> to vector<8xf32>
    %281 = vector.shape_cast %280 : vector<8xf32> to vector<8x1xf32>
    %cst_82 = arith.constant 3.200000e+01 : f32
    %282 = vector.broadcast %cst_82 : f32 to vector<8x1xf32>
    %283 = arith.divf %281, %282 : vector<8x1xf32>
    %284 = vector.broadcast %276 : vector<8x1xf32> to vector<8x32xf32>
    %285 = arith.subf %272, %284 : vector<8x32xf32>
    %cst_83 = arith.constant 9.99999974E-6 : f32
    %286 = vector.broadcast %cst_83 : f32 to vector<8x1xf32>
    %287 = arith.addf %283, %286 : vector<8x1xf32>
    %288 = math.rsqrt %287 : vector<8x1xf32>
    %289 = vector.broadcast %288 : vector<8x1xf32> to vector<8x32xf32>
    %290 = arith.mulf %285, %289 : vector<8x32xf32>
    %291 = vector.broadcast %180 : vector<1x32xf32> to vector<8x32xf32>
    %292 = arith.mulf %290, %291 : vector<8x32xf32>
    %293 = vector.broadcast %181 : vector<1x32xf32> to vector<8x32xf32>
    %294 = arith.addf %292, %293 : vector<8x32xf32>
    %c1_84 = arith.constant 1 : index
    %c0_85 = arith.constant 0 : index
    %c0_86 = arith.constant 0 : index
    %295 = vector.load %arg6[%c1_84, %c0_85, %c0_86] : memref<2x32x64xbf16, #tpu.memory_space<vmem>>, vector<1x32x64xbf16>
    %296 = vector.shape_cast %295 : vector<1x32x64xbf16> to vector<32x64xbf16>
    %297 = vector.extract_strided_slice %170 {offsets = [5, 0], sizes = [1, 64], strides = [1, 1]} : vector<9x128xf32> to vector<1x64xf32>
    %c1_87 = arith.constant 1 : index
    %c0_88 = arith.constant 0 : index
    %c0_89 = arith.constant 0 : index
    %298 = vector.load %arg7[%c1_87, %c0_88, %c0_89] : memref<2x64x32xbf16, #tpu.memory_space<vmem>>, vector<1x64x32xbf16>
    %299 = vector.shape_cast %298 : vector<1x64x32xbf16> to vector<64x32xbf16>
    %300 = vector.extract_strided_slice %170 {offsets = [6, 0], sizes = [1, 32], strides = [1, 1]} : vector<9x128xf32> to vector<1x32xf32>
    %301 = vector.extract_strided_slice %170 {offsets = [7, 0], sizes = [1, 32], strides = [1, 1]} : vector<9x128xf32> to vector<1x32xf32>
    %302 = vector.extract_strided_slice %170 {offsets = [8, 0], sizes = [1, 32], strides = [1, 1]} : vector<9x128xf32> to vector<1x32xf32>
    %303 = arith.truncf %294 : vector<8x32xf32> to vector<8x32xbf16>
    %cst_90 = arith.constant dense<0.000000e+00> : vector<8x64xf32>
    %304 = tpu.matmul %303, %296, %cst_90 {dimension_numbers = #tpu.dot_dimension_numbers<[1], [0], [0], [1], [0, 0, 1, 1], [], []>} : vector<8x32xbf16>, vector<32x64xbf16>, vector<8x64xf32> -> vector<8x64xf32>
    %305 = vector.broadcast %297 : vector<1x64xf32> to vector<8x64xf32>
    %306 = arith.addf %304, %305 : vector<8x64xf32>
    %cst_91 = arith.constant 0.000000e+00 : f32
    %307 = vector.broadcast %cst_91 : f32 to vector<8x64xf32>
    %308 = arith.maximumf %306, %307 : vector<8x64xf32>
    %309 = arith.truncf %308 : vector<8x64xf32> to vector<8x64xbf16>
    %cst_92 = arith.constant dense<0.000000e+00> : vector<8x32xf32>
    %310 = tpu.matmul %309, %299, %cst_92 {dimension_numbers = #tpu.dot_dimension_numbers<[1], [0], [0], [1], [0, 0, 1, 1], [], []>} : vector<8x64xbf16>, vector<64x32xbf16>, vector<8x32xf32> -> vector<8x32xf32>
    %311 = vector.broadcast %300 : vector<1x32xf32> to vector<8x32xf32>
    %312 = arith.addf %310, %311 : vector<8x32xf32>
    %313 = arith.addf %294, %312 : vector<8x32xf32>
    %cst_93 = arith.constant dense<0.000000e+00> : vector<8xf32>
    %314 = vector.multi_reduction <add>, %313, %cst_93 [1] : vector<8x32xf32> to vector<8xf32>
    %315 = vector.shape_cast %314 : vector<8xf32> to vector<8x1xf32>
    %cst_94 = arith.constant 3.200000e+01 : f32
    %316 = vector.broadcast %cst_94 : f32 to vector<8x1xf32>
    %317 = arith.divf %315, %316 : vector<8x1xf32>
    %318 = vector.broadcast %317 : vector<8x1xf32> to vector<8x32xf32>
    %319 = arith.subf %313, %318 : vector<8x32xf32>
    %320 = arith.mulf %319, %319 : vector<8x32xf32>
    %cst_95 = arith.constant dense<0.000000e+00> : vector<8xf32>
    %321 = vector.multi_reduction <add>, %320, %cst_95 [1] : vector<8x32xf32> to vector<8xf32>
    %322 = vector.shape_cast %321 : vector<8xf32> to vector<8x1xf32>
    %cst_96 = arith.constant 3.200000e+01 : f32
    %323 = vector.broadcast %cst_96 : f32 to vector<8x1xf32>
    %324 = arith.divf %322, %323 : vector<8x1xf32>
    %325 = vector.broadcast %317 : vector<8x1xf32> to vector<8x32xf32>
    %326 = arith.subf %313, %325 : vector<8x32xf32>
    %cst_97 = arith.constant 9.99999974E-6 : f32
    %327 = vector.broadcast %cst_97 : f32 to vector<8x1xf32>
    %328 = arith.addf %324, %327 : vector<8x1xf32>
    %329 = math.rsqrt %328 : vector<8x1xf32>
    %330 = vector.broadcast %329 : vector<8x1xf32> to vector<8x32xf32>
    %331 = arith.mulf %326, %330 : vector<8x32xf32>
    %332 = vector.broadcast %301 : vector<1x32xf32> to vector<8x32xf32>
    %333 = arith.mulf %331, %332 : vector<8x32xf32>
    %334 = vector.broadcast %302 : vector<1x32xf32> to vector<8x32xf32>
    %335 = arith.addf %333, %334 : vector<8x32xf32>
    %c0_98 = arith.constant 0 : index
    %c0_99 = arith.constant 0 : index
    %c0_100 = arith.constant 0 : index
    %336 = vector.load %arg2[%c0_98, %c0_99, %c0_100] : memref<1x8x32xf32, #tpu.memory_space<vmem>>, vector<1x8x32xf32>
    %337 = vector.shape_cast %336 : vector<1x8x32xf32> to vector<8x32xf32>
    %338 = tpu.iota {dimensions = array<i32: 1>} : vector<1x8x8xi32>
    %339 = tpu.iota {dimensions = array<i32: 2>} : vector<1x8x8xi32>
    %340 = arith.cmpi sle, %339, %338 : vector<1x8x8xi32>
    %c0_101 = arith.constant 0 : index
    %c0_102 = arith.constant 0 : index
    %c0_103 = arith.constant 0 : index
    %341 = vector.load %arg17[%c0_101, %c0_102, %c0_103] : memref<2x14x128xf32, #tpu.memory_space<vmem>>, vector<1x14x128xf32>
    %342 = vector.shape_cast %341 : vector<1x14x128xf32> to vector<14x128xf32>
    %c0_104 = arith.constant 0 : index
    %c0_105 = arith.constant 0 : index
    %c0_106 = arith.constant 0 : index
    %343 = vector.load %arg9[%c0_104, %c0_105, %c0_106] : memref<2x32x32xbf16, #tpu.memory_space<vmem>>, vector<1x32x32xbf16>
    %344 = vector.shape_cast %343 : vector<1x32x32xbf16> to vector<32x32xbf16>
    %345 = vector.extract_strided_slice %342 {offsets = [0, 0], sizes = [1, 32], strides = [1, 1]} : vector<14x128xf32> to vector<1x32xf32>
    %c0_107 = arith.constant 0 : index
    %c0_108 = arith.constant 0 : index
    %c0_109 = arith.constant 0 : index
    %346 = vector.load %arg10[%c0_107, %c0_108, %c0_109] : memref<2x32x64xbf16, #tpu.memory_space<vmem>>, vector<1x32x64xbf16>
    %347 = vector.shape_cast %346 : vector<1x32x64xbf16> to vector<32x64xbf16>
    %348 = vector.extract_strided_slice %342 {offsets = [1, 0], sizes = [1, 64], strides = [1, 1]} : vector<14x128xf32> to vector<1x64xf32>
    %c0_110 = arith.constant 0 : index
    %c0_111 = arith.constant 0 : index
    %c0_112 = arith.constant 0 : index
    %349 = vector.load %arg11[%c0_110, %c0_111, %c0_112] : memref<2x32x32xbf16, #tpu.memory_space<vmem>>, vector<1x32x32xbf16>
    %350 = vector.shape_cast %349 : vector<1x32x32xbf16> to vector<32x32xbf16>
    %351 = vector.extract_strided_slice %342 {offsets = [2, 0], sizes = [1, 32], strides = [1, 1]} : vector<14x128xf32> to vector<1x32xf32>
    %352 = vector.extract_strided_slice %342 {offsets = [3, 0], sizes = [1, 32], strides = [1, 1]} : vector<14x128xf32> to vector<1x32xf32>
    %353 = vector.extract_strided_slice %342 {offsets = [4, 0], sizes = [1, 32], strides = [1, 1]} : vector<14x128xf32> to vector<1x32xf32>
    %354 = arith.truncf %337 : vector<8x32xf32> to vector<8x32xbf16>
    %cst_113 = arith.constant dense<0.000000e+00> : vector<8x32xf32>
    %355 = tpu.matmul %354, %344, %cst_113 {dimension_numbers = #tpu.dot_dimension_numbers<[1], [0], [0], [1], [0, 0, 1, 1], [], []>} : vector<8x32xbf16>, vector<32x32xbf16>, vector<8x32xf32> -> vector<8x32xf32>
    %356 = vector.broadcast %345 : vector<1x32xf32> to vector<8x32xf32>
    %357 = arith.addf %355, %356 : vector<8x32xf32>
    %358 = arith.truncf %337 : vector<8x32xf32> to vector<8x32xbf16>
    %cst_114 = arith.constant dense<0.000000e+00> : vector<8x64xf32>
    %359 = tpu.matmul %358, %347, %cst_114 {dimension_numbers = #tpu.dot_dimension_numbers<[1], [0], [0], [1], [0, 0, 1, 1], [], []>} : vector<8x32xbf16>, vector<32x64xbf16>, vector<8x64xf32> -> vector<8x64xf32>
    %360 = vector.broadcast %348 : vector<1x64xf32> to vector<8x64xf32>
    %361 = arith.addf %359, %360 : vector<8x64xf32>
    %362 = vector.extract_strided_slice %361 {offsets = [0, 0], sizes = [8, 32], strides = [1, 1]} : vector<8x64xf32> to vector<8x32xf32>
    %363 = vector.extract_strided_slice %361 {offsets = [0, 32], sizes = [8, 32], strides = [1, 1]} : vector<8x64xf32> to vector<8x32xf32>
    %364 = vector.extract_strided_slice %357 {offsets = [0, 0], sizes = [8, 8], strides = [1, 1]} : vector<8x32xf32> to vector<8x8xf32>
    %365 = vector.extract_strided_slice %362 {offsets = [0, 0], sizes = [8, 8], strides = [1, 1]} : vector<8x32xf32> to vector<8x8xf32>
    %366 = arith.truncf %364 : vector<8x8xf32> to vector<8x8xbf16>
    %367 = arith.truncf %365 : vector<8x8xf32> to vector<8x8xbf16>
    %cst_115 = arith.constant dense<0.000000e+00> : vector<8x8xf32>
    %368 = tpu.matmul %366, %367, %cst_115 {dimension_numbers = #tpu.dot_dimension_numbers<[1], [1], [0], [0], [0, 0, 1, 0], [], []>} : vector<8x8xbf16>, vector<8x8xbf16>, vector<8x8xf32> -> vector<8x8xf32>
    %369 = vector.extract_strided_slice %357 {offsets = [0, 8], sizes = [8, 8], strides = [1, 1]} : vector<8x32xf32> to vector<8x8xf32>
    %370 = vector.extract_strided_slice %362 {offsets = [0, 8], sizes = [8, 8], strides = [1, 1]} : vector<8x32xf32> to vector<8x8xf32>
    %371 = arith.truncf %369 : vector<8x8xf32> to vector<8x8xbf16>
    %372 = arith.truncf %370 : vector<8x8xf32> to vector<8x8xbf16>
    %cst_116 = arith.constant dense<0.000000e+00> : vector<8x8xf32>
    %373 = tpu.matmul %371, %372, %cst_116 {dimension_numbers = #tpu.dot_dimension_numbers<[1], [1], [0], [0], [0, 0, 1, 0], [], []>} : vector<8x8xbf16>, vector<8x8xbf16>, vector<8x8xf32> -> vector<8x8xf32>
    %374 = vector.extract_strided_slice %357 {offsets = [0, 16], sizes = [8, 8], strides = [1, 1]} : vector<8x32xf32> to vector<8x8xf32>
    %375 = vector.extract_strided_slice %362 {offsets = [0, 16], sizes = [8, 8], strides = [1, 1]} : vector<8x32xf32> to vector<8x8xf32>
    %376 = arith.truncf %374 : vector<8x8xf32> to vector<8x8xbf16>
    %377 = arith.truncf %375 : vector<8x8xf32> to vector<8x8xbf16>
    %cst_117 = arith.constant dense<0.000000e+00> : vector<8x8xf32>
    %378 = tpu.matmul %376, %377, %cst_117 {dimension_numbers = #tpu.dot_dimension_numbers<[1], [1], [0], [0], [0, 0, 1, 0], [], []>} : vector<8x8xbf16>, vector<8x8xbf16>, vector<8x8xf32> -> vector<8x8xf32>
    %379 = vector.extract_strided_slice %357 {offsets = [0, 24], sizes = [8, 8], strides = [1, 1]} : vector<8x32xf32> to vector<8x8xf32>
    %380 = vector.extract_strided_slice %362 {offsets = [0, 24], sizes = [8, 8], strides = [1, 1]} : vector<8x32xf32> to vector<8x8xf32>
    %381 = arith.truncf %379 : vector<8x8xf32> to vector<8x8xbf16>
    %382 = arith.truncf %380 : vector<8x8xf32> to vector<8x8xbf16>
    %cst_118 = arith.constant dense<0.000000e+00> : vector<8x8xf32>
    %383 = tpu.matmul %381, %382, %cst_118 {dimension_numbers = #tpu.dot_dimension_numbers<[1], [1], [0], [0], [0, 0, 1, 0], [], []>} : vector<8x8xbf16>, vector<8x8xbf16>, vector<8x8xf32> -> vector<8x8xf32>
    %384 = vector.shape_cast %368 : vector<8x8xf32> to vector<1x8x8xf32>
    %385 = vector.shape_cast %373 : vector<8x8xf32> to vector<1x8x8xf32>
    %386 = vector.shape_cast %378 : vector<8x8xf32> to vector<1x8x8xf32>
    %387 = vector.shape_cast %383 : vector<8x8xf32> to vector<1x8x8xf32>
    %388 = tpu.concatenate %384, %385, %386, %387 in 0 : vector<1x8x8xf32>, vector<1x8x8xf32>, vector<1x8x8xf32>, vector<1x8x8xf32> -> vector<4x8x8xf32>
    %cst_119 = arith.constant 0.353553385 : f32
    %389 = vector.broadcast %cst_119 : f32 to vector<4x8x8xf32>
    %390 = arith.mulf %388, %389 : vector<4x8x8xf32>
    %cst_120 = arith.constant -1.000000e+30 : f32
    %391 = vector.shape_cast %340 : vector<1x8x8xi1> to vector<1x8x8xi1>
    %392 = vector.broadcast %391 : vector<1x8x8xi1> to vector<4x8x8xi1>
    %393 = vector.broadcast %cst_120 : f32 to vector<4x8x8xf32>
    %394 = arith.select %392, %390, %393 : vector<4x8x8xi1>, vector<4x8x8xf32>
    %cst_121 = arith.constant dense<0xFF800000> : vector<4x8xf32>
    %395 = vector.multi_reduction <maximumf>, %394, %cst_121 [2] : vector<4x8x8xf32> to vector<4x8xf32>
    %396 = vector.shape_cast %395 : vector<4x8xf32> to vector<4x8x1xf32>
    %397 = vector.broadcast %396 : vector<4x8x1xf32> to vector<4x8x8xf32>
    %398 = arith.subf %394, %397 : vector<4x8x8xf32>
    %399 = math.exp %398 : vector<4x8x8xf32>
    %cst_122 = arith.constant dense<0.000000e+00> : vector<4x8xf32>
    %400 = vector.multi_reduction <add>, %399, %cst_122 [2] : vector<4x8x8xf32> to vector<4x8xf32>
    %401 = vector.shape_cast %400 : vector<4x8xf32> to vector<4x8x1xf32>
    %402 = tpu.reciprocal %401 {approx = true} : vector<4x8x1xf32> -> vector<4x8x1xf32>
    %403 = vector.broadcast %402 : vector<4x8x1xf32> to vector<4x8x8xf32>
    %404 = arith.mulf %399, %403 : vector<4x8x8xf32>
    %cst_123 = arith.constant 0.000000e+00 : f32
    %405 = vector.broadcast %cst_123 : f32 to vector<8x32xf32>
    %406 = vector.extract_strided_slice %404 {offsets = [0, 0, 0], sizes = [1, 8, 8], strides = [1, 1, 1]} : vector<4x8x8xf32> to vector<1x8x8xf32>
    %407 = vector.shape_cast %406 : vector<1x8x8xf32> to vector<8x8xf32>
    %408 = vector.extract_strided_slice %363 {offsets = [0, 0], sizes = [8, 8], strides = [1, 1]} : vector<8x32xf32> to vector<8x8xf32>
    %409 = arith.truncf %407 : vector<8x8xf32> to vector<8x8xbf16>
    %410 = arith.truncf %408 : vector<8x8xf32> to vector<8x8xbf16>
    %cst_124 = arith.constant dense<0.000000e+00> : vector<8x8xf32>
    %411 = tpu.matmul %409, %410, %cst_124 {dimension_numbers = #tpu.dot_dimension_numbers<[1], [0], [0], [1], [0, 0, 1, 1], [], []>} : vector<8x8xbf16>, vector<8x8xbf16>, vector<8x8xf32> -> vector<8x8xf32>
    %412 = vector.extract_strided_slice %350 {offsets = [0, 0], sizes = [8, 32], strides = [1, 1]} : vector<32x32xbf16> to vector<8x32xbf16>
    %413 = arith.truncf %411 : vector<8x8xf32> to vector<8x8xbf16>
    %cst_125 = arith.constant dense<0.000000e+00> : vector<8x32xf32>
    %414 = tpu.matmul %413, %412, %cst_125 {dimension_numbers = #tpu.dot_dimension_numbers<[1], [0], [0], [1], [0, 0, 1, 1], [], []>} : vector<8x8xbf16>, vector<8x32xbf16>, vector<8x32xf32> -> vector<8x32xf32>
    %415 = arith.addf %405, %414 : vector<8x32xf32>
    %416 = vector.extract_strided_slice %404 {offsets = [1, 0, 0], sizes = [1, 8, 8], strides = [1, 1, 1]} : vector<4x8x8xf32> to vector<1x8x8xf32>
    %417 = vector.shape_cast %416 : vector<1x8x8xf32> to vector<8x8xf32>
    %418 = vector.extract_strided_slice %363 {offsets = [0, 8], sizes = [8, 8], strides = [1, 1]} : vector<8x32xf32> to vector<8x8xf32>
    %419 = arith.truncf %417 : vector<8x8xf32> to vector<8x8xbf16>
    %420 = arith.truncf %418 : vector<8x8xf32> to vector<8x8xbf16>
    %cst_126 = arith.constant dense<0.000000e+00> : vector<8x8xf32>
    %421 = tpu.matmul %419, %420, %cst_126 {dimension_numbers = #tpu.dot_dimension_numbers<[1], [0], [0], [1], [0, 0, 1, 1], [], []>} : vector<8x8xbf16>, vector<8x8xbf16>, vector<8x8xf32> -> vector<8x8xf32>
    %422 = vector.extract_strided_slice %350 {offsets = [8, 0], sizes = [8, 32], strides = [1, 1]} : vector<32x32xbf16> to vector<8x32xbf16>
    %423 = arith.truncf %421 : vector<8x8xf32> to vector<8x8xbf16>
    %cst_127 = arith.constant dense<0.000000e+00> : vector<8x32xf32>
    %424 = tpu.matmul %423, %422, %cst_127 {dimension_numbers = #tpu.dot_dimension_numbers<[1], [0], [0], [1], [0, 0, 1, 1], [], []>} : vector<8x8xbf16>, vector<8x32xbf16>, vector<8x32xf32> -> vector<8x32xf32>
    %425 = arith.addf %415, %424 : vector<8x32xf32>
    %426 = vector.extract_strided_slice %404 {offsets = [2, 0, 0], sizes = [1, 8, 8], strides = [1, 1, 1]} : vector<4x8x8xf32> to vector<1x8x8xf32>
    %427 = vector.shape_cast %426 : vector<1x8x8xf32> to vector<8x8xf32>
    %428 = vector.extract_strided_slice %363 {offsets = [0, 16], sizes = [8, 8], strides = [1, 1]} : vector<8x32xf32> to vector<8x8xf32>
    %429 = arith.truncf %427 : vector<8x8xf32> to vector<8x8xbf16>
    %430 = arith.truncf %428 : vector<8x8xf32> to vector<8x8xbf16>
    %cst_128 = arith.constant dense<0.000000e+00> : vector<8x8xf32>
    %431 = tpu.matmul %429, %430, %cst_128 {dimension_numbers = #tpu.dot_dimension_numbers<[1], [0], [0], [1], [0, 0, 1, 1], [], []>} : vector<8x8xbf16>, vector<8x8xbf16>, vector<8x8xf32> -> vector<8x8xf32>
    %432 = vector.extract_strided_slice %350 {offsets = [16, 0], sizes = [8, 32], strides = [1, 1]} : vector<32x32xbf16> to vector<8x32xbf16>
    %433 = arith.truncf %431 : vector<8x8xf32> to vector<8x8xbf16>
    %cst_129 = arith.constant dense<0.000000e+00> : vector<8x32xf32>
    %434 = tpu.matmul %433, %432, %cst_129 {dimension_numbers = #tpu.dot_dimension_numbers<[1], [0], [0], [1], [0, 0, 1, 1], [], []>} : vector<8x8xbf16>, vector<8x32xbf16>, vector<8x32xf32> -> vector<8x32xf32>
    %435 = arith.addf %425, %434 : vector<8x32xf32>
    %436 = vector.extract_strided_slice %404 {offsets = [3, 0, 0], sizes = [1, 8, 8], strides = [1, 1, 1]} : vector<4x8x8xf32> to vector<1x8x8xf32>
    %437 = vector.shape_cast %436 : vector<1x8x8xf32> to vector<8x8xf32>
    %438 = vector.extract_strided_slice %363 {offsets = [0, 24], sizes = [8, 8], strides = [1, 1]} : vector<8x32xf32> to vector<8x8xf32>
    %439 = arith.truncf %437 : vector<8x8xf32> to vector<8x8xbf16>
    %440 = arith.truncf %438 : vector<8x8xf32> to vector<8x8xbf16>
    %cst_130 = arith.constant dense<0.000000e+00> : vector<8x8xf32>
    %441 = tpu.matmul %439, %440, %cst_130 {dimension_numbers = #tpu.dot_dimension_numbers<[1], [0], [0], [1], [0, 0, 1, 1], [], []>} : vector<8x8xbf16>, vector<8x8xbf16>, vector<8x8xf32> -> vector<8x8xf32>
    %442 = vector.extract_strided_slice %350 {offsets = [24, 0], sizes = [8, 32], strides = [1, 1]} : vector<32x32xbf16> to vector<8x32xbf16>
    %443 = arith.truncf %441 : vector<8x8xf32> to vector<8x8xbf16>
    %cst_131 = arith.constant dense<0.000000e+00> : vector<8x32xf32>
    %444 = tpu.matmul %443, %442, %cst_131 {dimension_numbers = #tpu.dot_dimension_numbers<[1], [0], [0], [1], [0, 0, 1, 1], [], []>} : vector<8x8xbf16>, vector<8x32xbf16>, vector<8x32xf32> -> vector<8x32xf32>
    %445 = arith.addf %435, %444 : vector<8x32xf32>
    %446 = vector.broadcast %351 : vector<1x32xf32> to vector<8x32xf32>
    %447 = arith.addf %445, %446 : vector<8x32xf32>
    %448 = arith.addf %337, %447 : vector<8x32xf32>
    %cst_132 = arith.constant dense<0.000000e+00> : vector<8xf32>
    %449 = vector.multi_reduction <add>, %448, %cst_132 [1] : vector<8x32xf32> to vector<8xf32>
    %450 = vector.shape_cast %449 : vector<8xf32> to vector<8x1xf32>
    %cst_133 = arith.constant 3.200000e+01 : f32
    %451 = vector.broadcast %cst_133 : f32 to vector<8x1xf32>
    %452 = arith.divf %450, %451 : vector<8x1xf32>
    %453 = vector.broadcast %452 : vector<8x1xf32> to vector<8x32xf32>
    %454 = arith.subf %448, %453 : vector<8x32xf32>
    %455 = arith.mulf %454, %454 : vector<8x32xf32>
    %cst_134 = arith.constant dense<0.000000e+00> : vector<8xf32>
    %456 = vector.multi_reduction <add>, %455, %cst_134 [1] : vector<8x32xf32> to vector<8xf32>
    %457 = vector.shape_cast %456 : vector<8xf32> to vector<8x1xf32>
    %cst_135 = arith.constant 3.200000e+01 : f32
    %458 = vector.broadcast %cst_135 : f32 to vector<8x1xf32>
    %459 = arith.divf %457, %458 : vector<8x1xf32>
    %460 = vector.broadcast %452 : vector<8x1xf32> to vector<8x32xf32>
    %461 = arith.subf %448, %460 : vector<8x32xf32>
    %cst_136 = arith.constant 9.99999974E-6 : f32
    %462 = vector.broadcast %cst_136 : f32 to vector<8x1xf32>
    %463 = arith.addf %459, %462 : vector<8x1xf32>
    %464 = math.rsqrt %463 : vector<8x1xf32>
    %465 = vector.broadcast %464 : vector<8x1xf32> to vector<8x32xf32>
    %466 = arith.mulf %461, %465 : vector<8x32xf32>
    %467 = vector.broadcast %352 : vector<1x32xf32> to vector<8x32xf32>
    %468 = arith.mulf %466, %467 : vector<8x32xf32>
    %469 = vector.broadcast %353 : vector<1x32xf32> to vector<8x32xf32>
    %470 = arith.addf %468, %469 : vector<8x32xf32>
    %c0_137 = arith.constant 0 : index
    %c0_138 = arith.constant 0 : index
    %c0_139 = arith.constant 0 : index
    %471 = vector.load %arg12[%c0_137, %c0_138, %c0_139] : memref<2x32x32xbf16, #tpu.memory_space<vmem>>, vector<1x32x32xbf16>
    %472 = vector.shape_cast %471 : vector<1x32x32xbf16> to vector<32x32xbf16>
    %473 = vector.extract_strided_slice %342 {offsets = [5, 0], sizes = [1, 32], strides = [1, 1]} : vector<14x128xf32> to vector<1x32xf32>
    %c0_140 = arith.constant 0 : index
    %c0_141 = arith.constant 0 : index
    %c0_142 = arith.constant 0 : index
    %474 = vector.load %arg13[%c0_140, %c0_141, %c0_142] : memref<2x32x64xbf16, #tpu.memory_space<vmem>>, vector<1x32x64xbf16>
    %475 = vector.shape_cast %474 : vector<1x32x64xbf16> to vector<32x64xbf16>
    %476 = vector.extract_strided_slice %342 {offsets = [6, 0], sizes = [1, 64], strides = [1, 1]} : vector<14x128xf32> to vector<1x64xf32>
    %c0_143 = arith.constant 0 : index
    %c0_144 = arith.constant 0 : index
    %c0_145 = arith.constant 0 : index
    %477 = vector.load %arg14[%c0_143, %c0_144, %c0_145] : memref<2x32x32xbf16, #tpu.memory_space<vmem>>, vector<1x32x32xbf16>
    %478 = vector.shape_cast %477 : vector<1x32x32xbf16> to vector<32x32xbf16>
    %479 = vector.extract_strided_slice %342 {offsets = [7, 0], sizes = [1, 32], strides = [1, 1]} : vector<14x128xf32> to vector<1x32xf32>
    %480 = vector.extract_strided_slice %342 {offsets = [8, 0], sizes = [1, 32], strides = [1, 1]} : vector<14x128xf32> to vector<1x32xf32>
    %481 = vector.extract_strided_slice %342 {offsets = [9, 0], sizes = [1, 32], strides = [1, 1]} : vector<14x128xf32> to vector<1x32xf32>
    %482 = arith.truncf %470 : vector<8x32xf32> to vector<8x32xbf16>
    %cst_146 = arith.constant dense<0.000000e+00> : vector<8x32xf32>
    %483 = tpu.matmul %482, %472, %cst_146 {dimension_numbers = #tpu.dot_dimension_numbers<[1], [0], [0], [1], [0, 0, 1, 1], [], []>} : vector<8x32xbf16>, vector<32x32xbf16>, vector<8x32xf32> -> vector<8x32xf32>
    %484 = vector.broadcast %473 : vector<1x32xf32> to vector<8x32xf32>
    %485 = arith.addf %483, %484 : vector<8x32xf32>
    %486 = arith.truncf %335 : vector<8x32xf32> to vector<8x32xbf16>
    %cst_147 = arith.constant dense<0.000000e+00> : vector<8x64xf32>
    %487 = tpu.matmul %486, %475, %cst_147 {dimension_numbers = #tpu.dot_dimension_numbers<[1], [0], [0], [1], [0, 0, 1, 1], [], []>} : vector<8x32xbf16>, vector<32x64xbf16>, vector<8x64xf32> -> vector<8x64xf32>
    %488 = vector.broadcast %476 : vector<1x64xf32> to vector<8x64xf32>
    %489 = arith.addf %487, %488 : vector<8x64xf32>
    %490 = vector.extract_strided_slice %489 {offsets = [0, 0], sizes = [8, 32], strides = [1, 1]} : vector<8x64xf32> to vector<8x32xf32>
    %491 = vector.extract_strided_slice %489 {offsets = [0, 32], sizes = [8, 32], strides = [1, 1]} : vector<8x64xf32> to vector<8x32xf32>
    %492 = vector.extract_strided_slice %485 {offsets = [0, 0], sizes = [8, 8], strides = [1, 1]} : vector<8x32xf32> to vector<8x8xf32>
    %493 = vector.extract_strided_slice %490 {offsets = [0, 0], sizes = [8, 8], strides = [1, 1]} : vector<8x32xf32> to vector<8x8xf32>
    %494 = arith.truncf %492 : vector<8x8xf32> to vector<8x8xbf16>
    %495 = arith.truncf %493 : vector<8x8xf32> to vector<8x8xbf16>
    %cst_148 = arith.constant dense<0.000000e+00> : vector<8x8xf32>
    %496 = tpu.matmul %494, %495, %cst_148 {dimension_numbers = #tpu.dot_dimension_numbers<[1], [1], [0], [0], [0, 0, 1, 0], [], []>} : vector<8x8xbf16>, vector<8x8xbf16>, vector<8x8xf32> -> vector<8x8xf32>
    %497 = vector.extract_strided_slice %485 {offsets = [0, 8], sizes = [8, 8], strides = [1, 1]} : vector<8x32xf32> to vector<8x8xf32>
    %498 = vector.extract_strided_slice %490 {offsets = [0, 8], sizes = [8, 8], strides = [1, 1]} : vector<8x32xf32> to vector<8x8xf32>
    %499 = arith.truncf %497 : vector<8x8xf32> to vector<8x8xbf16>
    %500 = arith.truncf %498 : vector<8x8xf32> to vector<8x8xbf16>
    %cst_149 = arith.constant dense<0.000000e+00> : vector<8x8xf32>
    %501 = tpu.matmul %499, %500, %cst_149 {dimension_numbers = #tpu.dot_dimension_numbers<[1], [1], [0], [0], [0, 0, 1, 0], [], []>} : vector<8x8xbf16>, vector<8x8xbf16>, vector<8x8xf32> -> vector<8x8xf32>
    %502 = vector.extract_strided_slice %485 {offsets = [0, 16], sizes = [8, 8], strides = [1, 1]} : vector<8x32xf32> to vector<8x8xf32>
    %503 = vector.extract_strided_slice %490 {offsets = [0, 16], sizes = [8, 8], strides = [1, 1]} : vector<8x32xf32> to vector<8x8xf32>
    %504 = arith.truncf %502 : vector<8x8xf32> to vector<8x8xbf16>
    %505 = arith.truncf %503 : vector<8x8xf32> to vector<8x8xbf16>
    %cst_150 = arith.constant dense<0.000000e+00> : vector<8x8xf32>
    %506 = tpu.matmul %504, %505, %cst_150 {dimension_numbers = #tpu.dot_dimension_numbers<[1], [1], [0], [0], [0, 0, 1, 0], [], []>} : vector<8x8xbf16>, vector<8x8xbf16>, vector<8x8xf32> -> vector<8x8xf32>
    %507 = vector.extract_strided_slice %485 {offsets = [0, 24], sizes = [8, 8], strides = [1, 1]} : vector<8x32xf32> to vector<8x8xf32>
    %508 = vector.extract_strided_slice %490 {offsets = [0, 24], sizes = [8, 8], strides = [1, 1]} : vector<8x32xf32> to vector<8x8xf32>
    %509 = arith.truncf %507 : vector<8x8xf32> to vector<8x8xbf16>
    %510 = arith.truncf %508 : vector<8x8xf32> to vector<8x8xbf16>
    %cst_151 = arith.constant dense<0.000000e+00> : vector<8x8xf32>
    %511 = tpu.matmul %509, %510, %cst_151 {dimension_numbers = #tpu.dot_dimension_numbers<[1], [1], [0], [0], [0, 0, 1, 0], [], []>} : vector<8x8xbf16>, vector<8x8xbf16>, vector<8x8xf32> -> vector<8x8xf32>
    %512 = vector.shape_cast %496 : vector<8x8xf32> to vector<1x8x8xf32>
    %513 = vector.shape_cast %501 : vector<8x8xf32> to vector<1x8x8xf32>
    %514 = vector.shape_cast %506 : vector<8x8xf32> to vector<1x8x8xf32>
    %515 = vector.shape_cast %511 : vector<8x8xf32> to vector<1x8x8xf32>
    %516 = tpu.concatenate %512, %513, %514, %515 in 0 : vector<1x8x8xf32>, vector<1x8x8xf32>, vector<1x8x8xf32>, vector<1x8x8xf32> -> vector<4x8x8xf32>
    %cst_152 = arith.constant 0.353553385 : f32
    %517 = vector.broadcast %cst_152 : f32 to vector<4x8x8xf32>
    %518 = arith.mulf %516, %517 : vector<4x8x8xf32>
    %cst_153 = arith.constant dense<0xFF800000> : vector<4x8xf32>
    %519 = vector.multi_reduction <maximumf>, %518, %cst_153 [2] : vector<4x8x8xf32> to vector<4x8xf32>
    %520 = vector.shape_cast %519 : vector<4x8xf32> to vector<4x8x1xf32>
    %521 = vector.broadcast %520 : vector<4x8x1xf32> to vector<4x8x8xf32>
    %522 = arith.subf %518, %521 : vector<4x8x8xf32>
    %523 = math.exp %522 : vector<4x8x8xf32>
    %cst_154 = arith.constant dense<0.000000e+00> : vector<4x8xf32>
    %524 = vector.multi_reduction <add>, %523, %cst_154 [2] : vector<4x8x8xf32> to vector<4x8xf32>
    %525 = vector.shape_cast %524 : vector<4x8xf32> to vector<4x8x1xf32>
    %526 = tpu.reciprocal %525 {approx = true} : vector<4x8x1xf32> -> vector<4x8x1xf32>
    %527 = vector.broadcast %526 : vector<4x8x1xf32> to vector<4x8x8xf32>
    %528 = arith.mulf %523, %527 : vector<4x8x8xf32>
    %cst_155 = arith.constant 0.000000e+00 : f32
    %529 = vector.broadcast %cst_155 : f32 to vector<8x32xf32>
    %530 = vector.extract_strided_slice %528 {offsets = [0, 0, 0], sizes = [1, 8, 8], strides = [1, 1, 1]} : vector<4x8x8xf32> to vector<1x8x8xf32>
    %531 = vector.shape_cast %530 : vector<1x8x8xf32> to vector<8x8xf32>
    %532 = vector.extract_strided_slice %491 {offsets = [0, 0], sizes = [8, 8], strides = [1, 1]} : vector<8x32xf32> to vector<8x8xf32>
    %533 = arith.truncf %531 : vector<8x8xf32> to vector<8x8xbf16>
    %534 = arith.truncf %532 : vector<8x8xf32> to vector<8x8xbf16>
    %cst_156 = arith.constant dense<0.000000e+00> : vector<8x8xf32>
    %535 = tpu.matmul %533, %534, %cst_156 {dimension_numbers = #tpu.dot_dimension_numbers<[1], [0], [0], [1], [0, 0, 1, 1], [], []>} : vector<8x8xbf16>, vector<8x8xbf16>, vector<8x8xf32> -> vector<8x8xf32>
    %536 = vector.extract_strided_slice %478 {offsets = [0, 0], sizes = [8, 32], strides = [1, 1]} : vector<32x32xbf16> to vector<8x32xbf16>
    %537 = arith.truncf %535 : vector<8x8xf32> to vector<8x8xbf16>
    %cst_157 = arith.constant dense<0.000000e+00> : vector<8x32xf32>
    %538 = tpu.matmul %537, %536, %cst_157 {dimension_numbers = #tpu.dot_dimension_numbers<[1], [0], [0], [1], [0, 0, 1, 1], [], []>} : vector<8x8xbf16>, vector<8x32xbf16>, vector<8x32xf32> -> vector<8x32xf32>
    %539 = arith.addf %529, %538 : vector<8x32xf32>
    %540 = vector.extract_strided_slice %528 {offsets = [1, 0, 0], sizes = [1, 8, 8], strides = [1, 1, 1]} : vector<4x8x8xf32> to vector<1x8x8xf32>
    %541 = vector.shape_cast %540 : vector<1x8x8xf32> to vector<8x8xf32>
    %542 = vector.extract_strided_slice %491 {offsets = [0, 8], sizes = [8, 8], strides = [1, 1]} : vector<8x32xf32> to vector<8x8xf32>
    %543 = arith.truncf %541 : vector<8x8xf32> to vector<8x8xbf16>
    %544 = arith.truncf %542 : vector<8x8xf32> to vector<8x8xbf16>
    %cst_158 = arith.constant dense<0.000000e+00> : vector<8x8xf32>
    %545 = tpu.matmul %543, %544, %cst_158 {dimension_numbers = #tpu.dot_dimension_numbers<[1], [0], [0], [1], [0, 0, 1, 1], [], []>} : vector<8x8xbf16>, vector<8x8xbf16>, vector<8x8xf32> -> vector<8x8xf32>
    %546 = vector.extract_strided_slice %478 {offsets = [8, 0], sizes = [8, 32], strides = [1, 1]} : vector<32x32xbf16> to vector<8x32xbf16>
    %547 = arith.truncf %545 : vector<8x8xf32> to vector<8x8xbf16>
    %cst_159 = arith.constant dense<0.000000e+00> : vector<8x32xf32>
    %548 = tpu.matmul %547, %546, %cst_159 {dimension_numbers = #tpu.dot_dimension_numbers<[1], [0], [0], [1], [0, 0, 1, 1], [], []>} : vector<8x8xbf16>, vector<8x32xbf16>, vector<8x32xf32> -> vector<8x32xf32>
    %549 = arith.addf %539, %548 : vector<8x32xf32>
    %550 = vector.extract_strided_slice %528 {offsets = [2, 0, 0], sizes = [1, 8, 8], strides = [1, 1, 1]} : vector<4x8x8xf32> to vector<1x8x8xf32>
    %551 = vector.shape_cast %550 : vector<1x8x8xf32> to vector<8x8xf32>
    %552 = vector.extract_strided_slice %491 {offsets = [0, 16], sizes = [8, 8], strides = [1, 1]} : vector<8x32xf32> to vector<8x8xf32>
    %553 = arith.truncf %551 : vector<8x8xf32> to vector<8x8xbf16>
    %554 = arith.truncf %552 : vector<8x8xf32> to vector<8x8xbf16>
    %cst_160 = arith.constant dense<0.000000e+00> : vector<8x8xf32>
    %555 = tpu.matmul %553, %554, %cst_160 {dimension_numbers = #tpu.dot_dimension_numbers<[1], [0], [0], [1], [0, 0, 1, 1], [], []>} : vector<8x8xbf16>, vector<8x8xbf16>, vector<8x8xf32> -> vector<8x8xf32>
    %556 = vector.extract_strided_slice %478 {offsets = [16, 0], sizes = [8, 32], strides = [1, 1]} : vector<32x32xbf16> to vector<8x32xbf16>
    %557 = arith.truncf %555 : vector<8x8xf32> to vector<8x8xbf16>
    %cst_161 = arith.constant dense<0.000000e+00> : vector<8x32xf32>
    %558 = tpu.matmul %557, %556, %cst_161 {dimension_numbers = #tpu.dot_dimension_numbers<[1], [0], [0], [1], [0, 0, 1, 1], [], []>} : vector<8x8xbf16>, vector<8x32xbf16>, vector<8x32xf32> -> vector<8x32xf32>
    %559 = arith.addf %549, %558 : vector<8x32xf32>
    %560 = vector.extract_strided_slice %528 {offsets = [3, 0, 0], sizes = [1, 8, 8], strides = [1, 1, 1]} : vector<4x8x8xf32> to vector<1x8x8xf32>
    %561 = vector.shape_cast %560 : vector<1x8x8xf32> to vector<8x8xf32>
    %562 = vector.extract_strided_slice %491 {offsets = [0, 24], sizes = [8, 8], strides = [1, 1]} : vector<8x32xf32> to vector<8x8xf32>
    %563 = arith.truncf %561 : vector<8x8xf32> to vector<8x8xbf16>
    %564 = arith.truncf %562 : vector<8x8xf32> to vector<8x8xbf16>
    %cst_162 = arith.constant dense<0.000000e+00> : vector<8x8xf32>
    %565 = tpu.matmul %563, %564, %cst_162 {dimension_numbers = #tpu.dot_dimension_numbers<[1], [0], [0], [1], [0, 0, 1, 1], [], []>} : vector<8x8xbf16>, vector<8x8xbf16>, vector<8x8xf32> -> vector<8x8xf32>
    %566 = vector.extract_strided_slice %478 {offsets = [24, 0], sizes = [8, 32], strides = [1, 1]} : vector<32x32xbf16> to vector<8x32xbf16>
    %567 = arith.truncf %565 : vector<8x8xf32> to vector<8x8xbf16>
    %cst_163 = arith.constant dense<0.000000e+00> : vector<8x32xf32>
    %568 = tpu.matmul %567, %566, %cst_163 {dimension_numbers = #tpu.dot_dimension_numbers<[1], [0], [0], [1], [0, 0, 1, 1], [], []>} : vector<8x8xbf16>, vector<8x32xbf16>, vector<8x32xf32> -> vector<8x32xf32>
    %569 = arith.addf %559, %568 : vector<8x32xf32>
    %570 = vector.broadcast %479 : vector<1x32xf32> to vector<8x32xf32>
    %571 = arith.addf %569, %570 : vector<8x32xf32>
    %572 = arith.addf %470, %571 : vector<8x32xf32>
    %cst_164 = arith.constant dense<0.000000e+00> : vector<8xf32>
    %573 = vector.multi_reduction <add>, %572, %cst_164 [1] : vector<8x32xf32> to vector<8xf32>
    %574 = vector.shape_cast %573 : vector<8xf32> to vector<8x1xf32>
    %cst_165 = arith.constant 3.200000e+01 : f32
    %575 = vector.broadcast %cst_165 : f32 to vector<8x1xf32>
    %576 = arith.divf %574, %575 : vector<8x1xf32>
    %577 = vector.broadcast %576 : vector<8x1xf32> to vector<8x32xf32>
    %578 = arith.subf %572, %577 : vector<8x32xf32>
    %579 = arith.mulf %578, %578 : vector<8x32xf32>
    %cst_166 = arith.constant dense<0.000000e+00> : vector<8xf32>
    %580 = vector.multi_reduction <add>, %579, %cst_166 [1] : vector<8x32xf32> to vector<8xf32>
    %581 = vector.shape_cast %580 : vector<8xf32> to vector<8x1xf32>
    %cst_167 = arith.constant 3.200000e+01 : f32
    %582 = vector.broadcast %cst_167 : f32 to vector<8x1xf32>
    %583 = arith.divf %581, %582 : vector<8x1xf32>
    %584 = vector.broadcast %576 : vector<8x1xf32> to vector<8x32xf32>
    %585 = arith.subf %572, %584 : vector<8x32xf32>
    %cst_168 = arith.constant 9.99999974E-6 : f32
    %586 = vector.broadcast %cst_168 : f32 to vector<8x1xf32>
    %587 = arith.addf %583, %586 : vector<8x1xf32>
    %588 = math.rsqrt %587 : vector<8x1xf32>
    %589 = vector.broadcast %588 : vector<8x1xf32> to vector<8x32xf32>
    %590 = arith.mulf %585, %589 : vector<8x32xf32>
    %591 = vector.broadcast %480 : vector<1x32xf32> to vector<8x32xf32>
    %592 = arith.mulf %590, %591 : vector<8x32xf32>
    %593 = vector.broadcast %481 : vector<1x32xf32> to vector<8x32xf32>
    %594 = arith.addf %592, %593 : vector<8x32xf32>
    %c0_169 = arith.constant 0 : index
    %c0_170 = arith.constant 0 : index
    %c0_171 = arith.constant 0 : index
    %595 = vector.load %arg15[%c0_169, %c0_170, %c0_171] : memref<2x32x64xbf16, #tpu.memory_space<vmem>>, vector<1x32x64xbf16>
    %596 = vector.shape_cast %595 : vector<1x32x64xbf16> to vector<32x64xbf16>
    %597 = vector.extract_strided_slice %342 {offsets = [10, 0], sizes = [1, 64], strides = [1, 1]} : vector<14x128xf32> to vector<1x64xf32>
    %c0_172 = arith.constant 0 : index
    %c0_173 = arith.constant 0 : index
    %c0_174 = arith.constant 0 : index
    %598 = vector.load %arg16[%c0_172, %c0_173, %c0_174] : memref<2x64x32xbf16, #tpu.memory_space<vmem>>, vector<1x64x32xbf16>
    %599 = vector.shape_cast %598 : vector<1x64x32xbf16> to vector<64x32xbf16>
    %600 = vector.extract_strided_slice %342 {offsets = [11, 0], sizes = [1, 32], strides = [1, 1]} : vector<14x128xf32> to vector<1x32xf32>
    %601 = vector.extract_strided_slice %342 {offsets = [12, 0], sizes = [1, 32], strides = [1, 1]} : vector<14x128xf32> to vector<1x32xf32>
    %602 = vector.extract_strided_slice %342 {offsets = [13, 0], sizes = [1, 32], strides = [1, 1]} : vector<14x128xf32> to vector<1x32xf32>
    %603 = arith.truncf %594 : vector<8x32xf32> to vector<8x32xbf16>
    %cst_175 = arith.constant dense<0.000000e+00> : vector<8x64xf32>
    %604 = tpu.matmul %603, %596, %cst_175 {dimension_numbers = #tpu.dot_dimension_numbers<[1], [0], [0], [1], [0, 0, 1, 1], [], []>} : vector<8x32xbf16>, vector<32x64xbf16>, vector<8x64xf32> -> vector<8x64xf32>
    %605 = vector.broadcast %597 : vector<1x64xf32> to vector<8x64xf32>
    %606 = arith.addf %604, %605 : vector<8x64xf32>
    %cst_176 = arith.constant 0.000000e+00 : f32
    %607 = vector.broadcast %cst_176 : f32 to vector<8x64xf32>
    %608 = arith.maximumf %606, %607 : vector<8x64xf32>
    %609 = arith.truncf %608 : vector<8x64xf32> to vector<8x64xbf16>
    %cst_177 = arith.constant dense<0.000000e+00> : vector<8x32xf32>
    %610 = tpu.matmul %609, %599, %cst_177 {dimension_numbers = #tpu.dot_dimension_numbers<[1], [0], [0], [1], [0, 0, 1, 1], [], []>} : vector<8x64xbf16>, vector<64x32xbf16>, vector<8x32xf32> -> vector<8x32xf32>
    %611 = vector.broadcast %600 : vector<1x32xf32> to vector<8x32xf32>
    %612 = arith.addf %610, %611 : vector<8x32xf32>
    %613 = arith.addf %594, %612 : vector<8x32xf32>
    %cst_178 = arith.constant dense<0.000000e+00> : vector<8xf32>
    %614 = vector.multi_reduction <add>, %613, %cst_178 [1] : vector<8x32xf32> to vector<8xf32>
    %615 = vector.shape_cast %614 : vector<8xf32> to vector<8x1xf32>
    %cst_179 = arith.constant 3.200000e+01 : f32
    %616 = vector.broadcast %cst_179 : f32 to vector<8x1xf32>
    %617 = arith.divf %615, %616 : vector<8x1xf32>
    %618 = vector.broadcast %617 : vector<8x1xf32> to vector<8x32xf32>
    %619 = arith.subf %613, %618 : vector<8x32xf32>
    %620 = arith.mulf %619, %619 : vector<8x32xf32>
    %cst_180 = arith.constant dense<0.000000e+00> : vector<8xf32>
    %621 = vector.multi_reduction <add>, %620, %cst_180 [1] : vector<8x32xf32> to vector<8xf32>
    %622 = vector.shape_cast %621 : vector<8xf32> to vector<8x1xf32>
    %cst_181 = arith.constant 3.200000e+01 : f32
    %623 = vector.broadcast %cst_181 : f32 to vector<8x1xf32>
    %624 = arith.divf %622, %623 : vector<8x1xf32>
    %625 = vector.broadcast %617 : vector<8x1xf32> to vector<8x32xf32>
    %626 = arith.subf %613, %625 : vector<8x32xf32>
    %cst_182 = arith.constant 9.99999974E-6 : f32
    %627 = vector.broadcast %cst_182 : f32 to vector<8x1xf32>
    %628 = arith.addf %624, %627 : vector<8x1xf32>
    %629 = math.rsqrt %628 : vector<8x1xf32>
    %630 = vector.broadcast %629 : vector<8x1xf32> to vector<8x32xf32>
    %631 = arith.mulf %626, %630 : vector<8x32xf32>
    %632 = vector.broadcast %601 : vector<1x32xf32> to vector<8x32xf32>
    %633 = arith.mulf %631, %632 : vector<8x32xf32>
    %634 = vector.broadcast %602 : vector<1x32xf32> to vector<8x32xf32>
    %635 = arith.addf %633, %634 : vector<8x32xf32>
    %c1_183 = arith.constant 1 : index
    %c0_184 = arith.constant 0 : index
    %c0_185 = arith.constant 0 : index
    %636 = vector.load %arg17[%c1_183, %c0_184, %c0_185] : memref<2x14x128xf32, #tpu.memory_space<vmem>>, vector<1x14x128xf32>
    %637 = vector.shape_cast %636 : vector<1x14x128xf32> to vector<14x128xf32>
    %c1_186 = arith.constant 1 : index
    %c0_187 = arith.constant 0 : index
    %c0_188 = arith.constant 0 : index
    %638 = vector.load %arg9[%c1_186, %c0_187, %c0_188] : memref<2x32x32xbf16, #tpu.memory_space<vmem>>, vector<1x32x32xbf16>
    %639 = vector.shape_cast %638 : vector<1x32x32xbf16> to vector<32x32xbf16>
    %640 = vector.extract_strided_slice %637 {offsets = [0, 0], sizes = [1, 32], strides = [1, 1]} : vector<14x128xf32> to vector<1x32xf32>
    %c1_189 = arith.constant 1 : index
    %c0_190 = arith.constant 0 : index
    %c0_191 = arith.constant 0 : index
    %641 = vector.load %arg10[%c1_189, %c0_190, %c0_191] : memref<2x32x64xbf16, #tpu.memory_space<vmem>>, vector<1x32x64xbf16>
    %642 = vector.shape_cast %641 : vector<1x32x64xbf16> to vector<32x64xbf16>
    %643 = vector.extract_strided_slice %637 {offsets = [1, 0], sizes = [1, 64], strides = [1, 1]} : vector<14x128xf32> to vector<1x64xf32>
    %c1_192 = arith.constant 1 : index
    %c0_193 = arith.constant 0 : index
    %c0_194 = arith.constant 0 : index
    %644 = vector.load %arg11[%c1_192, %c0_193, %c0_194] : memref<2x32x32xbf16, #tpu.memory_space<vmem>>, vector<1x32x32xbf16>
    %645 = vector.shape_cast %644 : vector<1x32x32xbf16> to vector<32x32xbf16>
    %646 = vector.extract_strided_slice %637 {offsets = [2, 0], sizes = [1, 32], strides = [1, 1]} : vector<14x128xf32> to vector<1x32xf32>
    %647 = vector.extract_strided_slice %637 {offsets = [3, 0], sizes = [1, 32], strides = [1, 1]} : vector<14x128xf32> to vector<1x32xf32>
    %648 = vector.extract_strided_slice %637 {offsets = [4, 0], sizes = [1, 32], strides = [1, 1]} : vector<14x128xf32> to vector<1x32xf32>
    %649 = arith.truncf %635 : vector<8x32xf32> to vector<8x32xbf16>
    %cst_195 = arith.constant dense<0.000000e+00> : vector<8x32xf32>
    %650 = tpu.matmul %649, %639, %cst_195 {dimension_numbers = #tpu.dot_dimension_numbers<[1], [0], [0], [1], [0, 0, 1, 1], [], []>} : vector<8x32xbf16>, vector<32x32xbf16>, vector<8x32xf32> -> vector<8x32xf32>
    %651 = vector.broadcast %640 : vector<1x32xf32> to vector<8x32xf32>
    %652 = arith.addf %650, %651 : vector<8x32xf32>
    %653 = arith.truncf %635 : vector<8x32xf32> to vector<8x32xbf16>
    %cst_196 = arith.constant dense<0.000000e+00> : vector<8x64xf32>
    %654 = tpu.matmul %653, %642, %cst_196 {dimension_numbers = #tpu.dot_dimension_numbers<[1], [0], [0], [1], [0, 0, 1, 1], [], []>} : vector<8x32xbf16>, vector<32x64xbf16>, vector<8x64xf32> -> vector<8x64xf32>
    %655 = vector.broadcast %643 : vector<1x64xf32> to vector<8x64xf32>
    %656 = arith.addf %654, %655 : vector<8x64xf32>
    %657 = vector.extract_strided_slice %656 {offsets = [0, 0], sizes = [8, 32], strides = [1, 1]} : vector<8x64xf32> to vector<8x32xf32>
    %658 = vector.extract_strided_slice %656 {offsets = [0, 32], sizes = [8, 32], strides = [1, 1]} : vector<8x64xf32> to vector<8x32xf32>
    %659 = vector.extract_strided_slice %652 {offsets = [0, 0], sizes = [8, 8], strides = [1, 1]} : vector<8x32xf32> to vector<8x8xf32>
    %660 = vector.extract_strided_slice %657 {offsets = [0, 0], sizes = [8, 8], strides = [1, 1]} : vector<8x32xf32> to vector<8x8xf32>
    %661 = arith.truncf %659 : vector<8x8xf32> to vector<8x8xbf16>
    %662 = arith.truncf %660 : vector<8x8xf32> to vector<8x8xbf16>
    %cst_197 = arith.constant dense<0.000000e+00> : vector<8x8xf32>
    %663 = tpu.matmul %661, %662, %cst_197 {dimension_numbers = #tpu.dot_dimension_numbers<[1], [1], [0], [0], [0, 0, 1, 0], [], []>} : vector<8x8xbf16>, vector<8x8xbf16>, vector<8x8xf32> -> vector<8x8xf32>
    %664 = vector.extract_strided_slice %652 {offsets = [0, 8], sizes = [8, 8], strides = [1, 1]} : vector<8x32xf32> to vector<8x8xf32>
    %665 = vector.extract_strided_slice %657 {offsets = [0, 8], sizes = [8, 8], strides = [1, 1]} : vector<8x32xf32> to vector<8x8xf32>
    %666 = arith.truncf %664 : vector<8x8xf32> to vector<8x8xbf16>
    %667 = arith.truncf %665 : vector<8x8xf32> to vector<8x8xbf16>
    %cst_198 = arith.constant dense<0.000000e+00> : vector<8x8xf32>
    %668 = tpu.matmul %666, %667, %cst_198 {dimension_numbers = #tpu.dot_dimension_numbers<[1], [1], [0], [0], [0, 0, 1, 0], [], []>} : vector<8x8xbf16>, vector<8x8xbf16>, vector<8x8xf32> -> vector<8x8xf32>
    %669 = vector.extract_strided_slice %652 {offsets = [0, 16], sizes = [8, 8], strides = [1, 1]} : vector<8x32xf32> to vector<8x8xf32>
    %670 = vector.extract_strided_slice %657 {offsets = [0, 16], sizes = [8, 8], strides = [1, 1]} : vector<8x32xf32> to vector<8x8xf32>
    %671 = arith.truncf %669 : vector<8x8xf32> to vector<8x8xbf16>
    %672 = arith.truncf %670 : vector<8x8xf32> to vector<8x8xbf16>
    %cst_199 = arith.constant dense<0.000000e+00> : vector<8x8xf32>
    %673 = tpu.matmul %671, %672, %cst_199 {dimension_numbers = #tpu.dot_dimension_numbers<[1], [1], [0], [0], [0, 0, 1, 0], [], []>} : vector<8x8xbf16>, vector<8x8xbf16>, vector<8x8xf32> -> vector<8x8xf32>
    %674 = vector.extract_strided_slice %652 {offsets = [0, 24], sizes = [8, 8], strides = [1, 1]} : vector<8x32xf32> to vector<8x8xf32>
    %675 = vector.extract_strided_slice %657 {offsets = [0, 24], sizes = [8, 8], strides = [1, 1]} : vector<8x32xf32> to vector<8x8xf32>
    %676 = arith.truncf %674 : vector<8x8xf32> to vector<8x8xbf16>
    %677 = arith.truncf %675 : vector<8x8xf32> to vector<8x8xbf16>
    %cst_200 = arith.constant dense<0.000000e+00> : vector<8x8xf32>
    %678 = tpu.matmul %676, %677, %cst_200 {dimension_numbers = #tpu.dot_dimension_numbers<[1], [1], [0], [0], [0, 0, 1, 0], [], []>} : vector<8x8xbf16>, vector<8x8xbf16>, vector<8x8xf32> -> vector<8x8xf32>
    %679 = vector.shape_cast %663 : vector<8x8xf32> to vector<1x8x8xf32>
    %680 = vector.shape_cast %668 : vector<8x8xf32> to vector<1x8x8xf32>
    %681 = vector.shape_cast %673 : vector<8x8xf32> to vector<1x8x8xf32>
    %682 = vector.shape_cast %678 : vector<8x8xf32> to vector<1x8x8xf32>
    %683 = tpu.concatenate %679, %680, %681, %682 in 0 : vector<1x8x8xf32>, vector<1x8x8xf32>, vector<1x8x8xf32>, vector<1x8x8xf32> -> vector<4x8x8xf32>
    %cst_201 = arith.constant 0.353553385 : f32
    %684 = vector.broadcast %cst_201 : f32 to vector<4x8x8xf32>
    %685 = arith.mulf %683, %684 : vector<4x8x8xf32>
    %cst_202 = arith.constant -1.000000e+30 : f32
    %686 = vector.shape_cast %340 : vector<1x8x8xi1> to vector<1x8x8xi1>
    %687 = vector.broadcast %686 : vector<1x8x8xi1> to vector<4x8x8xi1>
    %688 = vector.broadcast %cst_202 : f32 to vector<4x8x8xf32>
    %689 = arith.select %687, %685, %688 : vector<4x8x8xi1>, vector<4x8x8xf32>
    %cst_203 = arith.constant dense<0xFF800000> : vector<4x8xf32>
    %690 = vector.multi_reduction <maximumf>, %689, %cst_203 [2] : vector<4x8x8xf32> to vector<4x8xf32>
    %691 = vector.shape_cast %690 : vector<4x8xf32> to vector<4x8x1xf32>
    %692 = vector.broadcast %691 : vector<4x8x1xf32> to vector<4x8x8xf32>
    %693 = arith.subf %689, %692 : vector<4x8x8xf32>
    %694 = math.exp %693 : vector<4x8x8xf32>
    %cst_204 = arith.constant dense<0.000000e+00> : vector<4x8xf32>
    %695 = vector.multi_reduction <add>, %694, %cst_204 [2] : vector<4x8x8xf32> to vector<4x8xf32>
    %696 = vector.shape_cast %695 : vector<4x8xf32> to vector<4x8x1xf32>
    %697 = tpu.reciprocal %696 {approx = true} : vector<4x8x1xf32> -> vector<4x8x1xf32>
    %698 = vector.broadcast %697 : vector<4x8x1xf32> to vector<4x8x8xf32>
    %699 = arith.mulf %694, %698 : vector<4x8x8xf32>
    %cst_205 = arith.constant 0.000000e+00 : f32
    %700 = vector.broadcast %cst_205 : f32 to vector<8x32xf32>
    %701 = vector.extract_strided_slice %699 {offsets = [0, 0, 0], sizes = [1, 8, 8], strides = [1, 1, 1]} : vector<4x8x8xf32> to vector<1x8x8xf32>
    %702 = vector.shape_cast %701 : vector<1x8x8xf32> to vector<8x8xf32>
    %703 = vector.extract_strided_slice %658 {offsets = [0, 0], sizes = [8, 8], strides = [1, 1]} : vector<8x32xf32> to vector<8x8xf32>
    %704 = arith.truncf %702 : vector<8x8xf32> to vector<8x8xbf16>
    %705 = arith.truncf %703 : vector<8x8xf32> to vector<8x8xbf16>
    %cst_206 = arith.constant dense<0.000000e+00> : vector<8x8xf32>
    %706 = tpu.matmul %704, %705, %cst_206 {dimension_numbers = #tpu.dot_dimension_numbers<[1], [0], [0], [1], [0, 0, 1, 1], [], []>} : vector<8x8xbf16>, vector<8x8xbf16>, vector<8x8xf32> -> vector<8x8xf32>
    %707 = vector.extract_strided_slice %645 {offsets = [0, 0], sizes = [8, 32], strides = [1, 1]} : vector<32x32xbf16> to vector<8x32xbf16>
    %708 = arith.truncf %706 : vector<8x8xf32> to vector<8x8xbf16>
    %cst_207 = arith.constant dense<0.000000e+00> : vector<8x32xf32>
    %709 = tpu.matmul %708, %707, %cst_207 {dimension_numbers = #tpu.dot_dimension_numbers<[1], [0], [0], [1], [0, 0, 1, 1], [], []>} : vector<8x8xbf16>, vector<8x32xbf16>, vector<8x32xf32> -> vector<8x32xf32>
    %710 = arith.addf %700, %709 : vector<8x32xf32>
    %711 = vector.extract_strided_slice %699 {offsets = [1, 0, 0], sizes = [1, 8, 8], strides = [1, 1, 1]} : vector<4x8x8xf32> to vector<1x8x8xf32>
    %712 = vector.shape_cast %711 : vector<1x8x8xf32> to vector<8x8xf32>
    %713 = vector.extract_strided_slice %658 {offsets = [0, 8], sizes = [8, 8], strides = [1, 1]} : vector<8x32xf32> to vector<8x8xf32>
    %714 = arith.truncf %712 : vector<8x8xf32> to vector<8x8xbf16>
    %715 = arith.truncf %713 : vector<8x8xf32> to vector<8x8xbf16>
    %cst_208 = arith.constant dense<0.000000e+00> : vector<8x8xf32>
    %716 = tpu.matmul %714, %715, %cst_208 {dimension_numbers = #tpu.dot_dimension_numbers<[1], [0], [0], [1], [0, 0, 1, 1], [], []>} : vector<8x8xbf16>, vector<8x8xbf16>, vector<8x8xf32> -> vector<8x8xf32>
    %717 = vector.extract_strided_slice %645 {offsets = [8, 0], sizes = [8, 32], strides = [1, 1]} : vector<32x32xbf16> to vector<8x32xbf16>
    %718 = arith.truncf %716 : vector<8x8xf32> to vector<8x8xbf16>
    %cst_209 = arith.constant dense<0.000000e+00> : vector<8x32xf32>
    %719 = tpu.matmul %718, %717, %cst_209 {dimension_numbers = #tpu.dot_dimension_numbers<[1], [0], [0], [1], [0, 0, 1, 1], [], []>} : vector<8x8xbf16>, vector<8x32xbf16>, vector<8x32xf32> -> vector<8x32xf32>
    %720 = arith.addf %710, %719 : vector<8x32xf32>
    %721 = vector.extract_strided_slice %699 {offsets = [2, 0, 0], sizes = [1, 8, 8], strides = [1, 1, 1]} : vector<4x8x8xf32> to vector<1x8x8xf32>
    %722 = vector.shape_cast %721 : vector<1x8x8xf32> to vector<8x8xf32>
    %723 = vector.extract_strided_slice %658 {offsets = [0, 16], sizes = [8, 8], strides = [1, 1]} : vector<8x32xf32> to vector<8x8xf32>
    %724 = arith.truncf %722 : vector<8x8xf32> to vector<8x8xbf16>
    %725 = arith.truncf %723 : vector<8x8xf32> to vector<8x8xbf16>
    %cst_210 = arith.constant dense<0.000000e+00> : vector<8x8xf32>
    %726 = tpu.matmul %724, %725, %cst_210 {dimension_numbers = #tpu.dot_dimension_numbers<[1], [0], [0], [1], [0, 0, 1, 1], [], []>} : vector<8x8xbf16>, vector<8x8xbf16>, vector<8x8xf32> -> vector<8x8xf32>
    %727 = vector.extract_strided_slice %645 {offsets = [16, 0], sizes = [8, 32], strides = [1, 1]} : vector<32x32xbf16> to vector<8x32xbf16>
    %728 = arith.truncf %726 : vector<8x8xf32> to vector<8x8xbf16>
    %cst_211 = arith.constant dense<0.000000e+00> : vector<8x32xf32>
    %729 = tpu.matmul %728, %727, %cst_211 {dimension_numbers = #tpu.dot_dimension_numbers<[1], [0], [0], [1], [0, 0, 1, 1], [], []>} : vector<8x8xbf16>, vector<8x32xbf16>, vector<8x32xf32> -> vector<8x32xf32>
    %730 = arith.addf %720, %729 : vector<8x32xf32>
    %731 = vector.extract_strided_slice %699 {offsets = [3, 0, 0], sizes = [1, 8, 8], strides = [1, 1, 1]} : vector<4x8x8xf32> to vector<1x8x8xf32>
    %732 = vector.shape_cast %731 : vector<1x8x8xf32> to vector<8x8xf32>
    %733 = vector.extract_strided_slice %658 {offsets = [0, 24], sizes = [8, 8], strides = [1, 1]} : vector<8x32xf32> to vector<8x8xf32>
    %734 = arith.truncf %732 : vector<8x8xf32> to vector<8x8xbf16>
    %735 = arith.truncf %733 : vector<8x8xf32> to vector<8x8xbf16>
    %cst_212 = arith.constant dense<0.000000e+00> : vector<8x8xf32>
    %736 = tpu.matmul %734, %735, %cst_212 {dimension_numbers = #tpu.dot_dimension_numbers<[1], [0], [0], [1], [0, 0, 1, 1], [], []>} : vector<8x8xbf16>, vector<8x8xbf16>, vector<8x8xf32> -> vector<8x8xf32>
    %737 = vector.extract_strided_slice %645 {offsets = [24, 0], sizes = [8, 32], strides = [1, 1]} : vector<32x32xbf16> to vector<8x32xbf16>
    %738 = arith.truncf %736 : vector<8x8xf32> to vector<8x8xbf16>
    %cst_213 = arith.constant dense<0.000000e+00> : vector<8x32xf32>
    %739 = tpu.matmul %738, %737, %cst_213 {dimension_numbers = #tpu.dot_dimension_numbers<[1], [0], [0], [1], [0, 0, 1, 1], [], []>} : vector<8x8xbf16>, vector<8x32xbf16>, vector<8x32xf32> -> vector<8x32xf32>
    %740 = arith.addf %730, %739 : vector<8x32xf32>
    %741 = vector.broadcast %646 : vector<1x32xf32> to vector<8x32xf32>
    %742 = arith.addf %740, %741 : vector<8x32xf32>
    %743 = arith.addf %635, %742 : vector<8x32xf32>
    %cst_214 = arith.constant dense<0.000000e+00> : vector<8xf32>
    %744 = vector.multi_reduction <add>, %743, %cst_214 [1] : vector<8x32xf32> to vector<8xf32>
    %745 = vector.shape_cast %744 : vector<8xf32> to vector<8x1xf32>
    %cst_215 = arith.constant 3.200000e+01 : f32
    %746 = vector.broadcast %cst_215 : f32 to vector<8x1xf32>
    %747 = arith.divf %745, %746 : vector<8x1xf32>
    %748 = vector.broadcast %747 : vector<8x1xf32> to vector<8x32xf32>
    %749 = arith.subf %743, %748 : vector<8x32xf32>
    %750 = arith.mulf %749, %749 : vector<8x32xf32>
    %cst_216 = arith.constant dense<0.000000e+00> : vector<8xf32>
    %751 = vector.multi_reduction <add>, %750, %cst_216 [1] : vector<8x32xf32> to vector<8xf32>
    %752 = vector.shape_cast %751 : vector<8xf32> to vector<8x1xf32>
    %cst_217 = arith.constant 3.200000e+01 : f32
    %753 = vector.broadcast %cst_217 : f32 to vector<8x1xf32>
    %754 = arith.divf %752, %753 : vector<8x1xf32>
    %755 = vector.broadcast %747 : vector<8x1xf32> to vector<8x32xf32>
    %756 = arith.subf %743, %755 : vector<8x32xf32>
    %cst_218 = arith.constant 9.99999974E-6 : f32
    %757 = vector.broadcast %cst_218 : f32 to vector<8x1xf32>
    %758 = arith.addf %754, %757 : vector<8x1xf32>
    %759 = math.rsqrt %758 : vector<8x1xf32>
    %760 = vector.broadcast %759 : vector<8x1xf32> to vector<8x32xf32>
    %761 = arith.mulf %756, %760 : vector<8x32xf32>
    %762 = vector.broadcast %647 : vector<1x32xf32> to vector<8x32xf32>
    %763 = arith.mulf %761, %762 : vector<8x32xf32>
    %764 = vector.broadcast %648 : vector<1x32xf32> to vector<8x32xf32>
    %765 = arith.addf %763, %764 : vector<8x32xf32>
    %c1_219 = arith.constant 1 : index
    %c0_220 = arith.constant 0 : index
    %c0_221 = arith.constant 0 : index
    %766 = vector.load %arg12[%c1_219, %c0_220, %c0_221] : memref<2x32x32xbf16, #tpu.memory_space<vmem>>, vector<1x32x32xbf16>
    %767 = vector.shape_cast %766 : vector<1x32x32xbf16> to vector<32x32xbf16>
    %768 = vector.extract_strided_slice %637 {offsets = [5, 0], sizes = [1, 32], strides = [1, 1]} : vector<14x128xf32> to vector<1x32xf32>
    %c1_222 = arith.constant 1 : index
    %c0_223 = arith.constant 0 : index
    %c0_224 = arith.constant 0 : index
    %769 = vector.load %arg13[%c1_222, %c0_223, %c0_224] : memref<2x32x64xbf16, #tpu.memory_space<vmem>>, vector<1x32x64xbf16>
    %770 = vector.shape_cast %769 : vector<1x32x64xbf16> to vector<32x64xbf16>
    %771 = vector.extract_strided_slice %637 {offsets = [6, 0], sizes = [1, 64], strides = [1, 1]} : vector<14x128xf32> to vector<1x64xf32>
    %c1_225 = arith.constant 1 : index
    %c0_226 = arith.constant 0 : index
    %c0_227 = arith.constant 0 : index
    %772 = vector.load %arg14[%c1_225, %c0_226, %c0_227] : memref<2x32x32xbf16, #tpu.memory_space<vmem>>, vector<1x32x32xbf16>
    %773 = vector.shape_cast %772 : vector<1x32x32xbf16> to vector<32x32xbf16>
    %774 = vector.extract_strided_slice %637 {offsets = [7, 0], sizes = [1, 32], strides = [1, 1]} : vector<14x128xf32> to vector<1x32xf32>
    %775 = vector.extract_strided_slice %637 {offsets = [8, 0], sizes = [1, 32], strides = [1, 1]} : vector<14x128xf32> to vector<1x32xf32>
    %776 = vector.extract_strided_slice %637 {offsets = [9, 0], sizes = [1, 32], strides = [1, 1]} : vector<14x128xf32> to vector<1x32xf32>
    %777 = arith.truncf %765 : vector<8x32xf32> to vector<8x32xbf16>
    %cst_228 = arith.constant dense<0.000000e+00> : vector<8x32xf32>
    %778 = tpu.matmul %777, %767, %cst_228 {dimension_numbers = #tpu.dot_dimension_numbers<[1], [0], [0], [1], [0, 0, 1, 1], [], []>} : vector<8x32xbf16>, vector<32x32xbf16>, vector<8x32xf32> -> vector<8x32xf32>
    %779 = vector.broadcast %768 : vector<1x32xf32> to vector<8x32xf32>
    %780 = arith.addf %778, %779 : vector<8x32xf32>
    %781 = arith.truncf %335 : vector<8x32xf32> to vector<8x32xbf16>
    %cst_229 = arith.constant dense<0.000000e+00> : vector<8x64xf32>
    %782 = tpu.matmul %781, %770, %cst_229 {dimension_numbers = #tpu.dot_dimension_numbers<[1], [0], [0], [1], [0, 0, 1, 1], [], []>} : vector<8x32xbf16>, vector<32x64xbf16>, vector<8x64xf32> -> vector<8x64xf32>
    %783 = vector.broadcast %771 : vector<1x64xf32> to vector<8x64xf32>
    %784 = arith.addf %782, %783 : vector<8x64xf32>
    %785 = vector.extract_strided_slice %784 {offsets = [0, 0], sizes = [8, 32], strides = [1, 1]} : vector<8x64xf32> to vector<8x32xf32>
    %786 = vector.extract_strided_slice %784 {offsets = [0, 32], sizes = [8, 32], strides = [1, 1]} : vector<8x64xf32> to vector<8x32xf32>
    %787 = vector.extract_strided_slice %780 {offsets = [0, 0], sizes = [8, 8], strides = [1, 1]} : vector<8x32xf32> to vector<8x8xf32>
    %788 = vector.extract_strided_slice %785 {offsets = [0, 0], sizes = [8, 8], strides = [1, 1]} : vector<8x32xf32> to vector<8x8xf32>
    %789 = arith.truncf %787 : vector<8x8xf32> to vector<8x8xbf16>
    %790 = arith.truncf %788 : vector<8x8xf32> to vector<8x8xbf16>
    %cst_230 = arith.constant dense<0.000000e+00> : vector<8x8xf32>
    %791 = tpu.matmul %789, %790, %cst_230 {dimension_numbers = #tpu.dot_dimension_numbers<[1], [1], [0], [0], [0, 0, 1, 0], [], []>} : vector<8x8xbf16>, vector<8x8xbf16>, vector<8x8xf32> -> vector<8x8xf32>
    %792 = vector.extract_strided_slice %780 {offsets = [0, 8], sizes = [8, 8], strides = [1, 1]} : vector<8x32xf32> to vector<8x8xf32>
    %793 = vector.extract_strided_slice %785 {offsets = [0, 8], sizes = [8, 8], strides = [1, 1]} : vector<8x32xf32> to vector<8x8xf32>
    %794 = arith.truncf %792 : vector<8x8xf32> to vector<8x8xbf16>
    %795 = arith.truncf %793 : vector<8x8xf32> to vector<8x8xbf16>
    %cst_231 = arith.constant dense<0.000000e+00> : vector<8x8xf32>
    %796 = tpu.matmul %794, %795, %cst_231 {dimension_numbers = #tpu.dot_dimension_numbers<[1], [1], [0], [0], [0, 0, 1, 0], [], []>} : vector<8x8xbf16>, vector<8x8xbf16>, vector<8x8xf32> -> vector<8x8xf32>
    %797 = vector.extract_strided_slice %780 {offsets = [0, 16], sizes = [8, 8], strides = [1, 1]} : vector<8x32xf32> to vector<8x8xf32>
    %798 = vector.extract_strided_slice %785 {offsets = [0, 16], sizes = [8, 8], strides = [1, 1]} : vector<8x32xf32> to vector<8x8xf32>
    %799 = arith.truncf %797 : vector<8x8xf32> to vector<8x8xbf16>
    %800 = arith.truncf %798 : vector<8x8xf32> to vector<8x8xbf16>
    %cst_232 = arith.constant dense<0.000000e+00> : vector<8x8xf32>
    %801 = tpu.matmul %799, %800, %cst_232 {dimension_numbers = #tpu.dot_dimension_numbers<[1], [1], [0], [0], [0, 0, 1, 0], [], []>} : vector<8x8xbf16>, vector<8x8xbf16>, vector<8x8xf32> -> vector<8x8xf32>
    %802 = vector.extract_strided_slice %780 {offsets = [0, 24], sizes = [8, 8], strides = [1, 1]} : vector<8x32xf32> to vector<8x8xf32>
    %803 = vector.extract_strided_slice %785 {offsets = [0, 24], sizes = [8, 8], strides = [1, 1]} : vector<8x32xf32> to vector<8x8xf32>
    %804 = arith.truncf %802 : vector<8x8xf32> to vector<8x8xbf16>
    %805 = arith.truncf %803 : vector<8x8xf32> to vector<8x8xbf16>
    %cst_233 = arith.constant dense<0.000000e+00> : vector<8x8xf32>
    %806 = tpu.matmul %804, %805, %cst_233 {dimension_numbers = #tpu.dot_dimension_numbers<[1], [1], [0], [0], [0, 0, 1, 0], [], []>} : vector<8x8xbf16>, vector<8x8xbf16>, vector<8x8xf32> -> vector<8x8xf32>
    %807 = vector.shape_cast %791 : vector<8x8xf32> to vector<1x8x8xf32>
    %808 = vector.shape_cast %796 : vector<8x8xf32> to vector<1x8x8xf32>
    %809 = vector.shape_cast %801 : vector<8x8xf32> to vector<1x8x8xf32>
    %810 = vector.shape_cast %806 : vector<8x8xf32> to vector<1x8x8xf32>
    %811 = tpu.concatenate %807, %808, %809, %810 in 0 : vector<1x8x8xf32>, vector<1x8x8xf32>, vector<1x8x8xf32>, vector<1x8x8xf32> -> vector<4x8x8xf32>
    %cst_234 = arith.constant 0.353553385 : f32
    %812 = vector.broadcast %cst_234 : f32 to vector<4x8x8xf32>
    %813 = arith.mulf %811, %812 : vector<4x8x8xf32>
    %cst_235 = arith.constant dense<0xFF800000> : vector<4x8xf32>
    %814 = vector.multi_reduction <maximumf>, %813, %cst_235 [2] : vector<4x8x8xf32> to vector<4x8xf32>
    %815 = vector.shape_cast %814 : vector<4x8xf32> to vector<4x8x1xf32>
    %816 = vector.broadcast %815 : vector<4x8x1xf32> to vector<4x8x8xf32>
    %817 = arith.subf %813, %816 : vector<4x8x8xf32>
    %818 = math.exp %817 : vector<4x8x8xf32>
    %cst_236 = arith.constant dense<0.000000e+00> : vector<4x8xf32>
    %819 = vector.multi_reduction <add>, %818, %cst_236 [2] : vector<4x8x8xf32> to vector<4x8xf32>
    %820 = vector.shape_cast %819 : vector<4x8xf32> to vector<4x8x1xf32>
    %821 = tpu.reciprocal %820 {approx = true} : vector<4x8x1xf32> -> vector<4x8x1xf32>
    %822 = vector.broadcast %821 : vector<4x8x1xf32> to vector<4x8x8xf32>
    %823 = arith.mulf %818, %822 : vector<4x8x8xf32>
    %cst_237 = arith.constant 0.000000e+00 : f32
    %824 = vector.broadcast %cst_237 : f32 to vector<8x32xf32>
    %825 = vector.extract_strided_slice %823 {offsets = [0, 0, 0], sizes = [1, 8, 8], strides = [1, 1, 1]} : vector<4x8x8xf32> to vector<1x8x8xf32>
    %826 = vector.shape_cast %825 : vector<1x8x8xf32> to vector<8x8xf32>
    %827 = vector.extract_strided_slice %786 {offsets = [0, 0], sizes = [8, 8], strides = [1, 1]} : vector<8x32xf32> to vector<8x8xf32>
    %828 = arith.truncf %826 : vector<8x8xf32> to vector<8x8xbf16>
    %829 = arith.truncf %827 : vector<8x8xf32> to vector<8x8xbf16>
    %cst_238 = arith.constant dense<0.000000e+00> : vector<8x8xf32>
    %830 = tpu.matmul %828, %829, %cst_238 {dimension_numbers = #tpu.dot_dimension_numbers<[1], [0], [0], [1], [0, 0, 1, 1], [], []>} : vector<8x8xbf16>, vector<8x8xbf16>, vector<8x8xf32> -> vector<8x8xf32>
    %831 = vector.extract_strided_slice %773 {offsets = [0, 0], sizes = [8, 32], strides = [1, 1]} : vector<32x32xbf16> to vector<8x32xbf16>
    %832 = arith.truncf %830 : vector<8x8xf32> to vector<8x8xbf16>
    %cst_239 = arith.constant dense<0.000000e+00> : vector<8x32xf32>
    %833 = tpu.matmul %832, %831, %cst_239 {dimension_numbers = #tpu.dot_dimension_numbers<[1], [0], [0], [1], [0, 0, 1, 1], [], []>} : vector<8x8xbf16>, vector<8x32xbf16>, vector<8x32xf32> -> vector<8x32xf32>
    %834 = arith.addf %824, %833 : vector<8x32xf32>
    %835 = vector.extract_strided_slice %823 {offsets = [1, 0, 0], sizes = [1, 8, 8], strides = [1, 1, 1]} : vector<4x8x8xf32> to vector<1x8x8xf32>
    %836 = vector.shape_cast %835 : vector<1x8x8xf32> to vector<8x8xf32>
    %837 = vector.extract_strided_slice %786 {offsets = [0, 8], sizes = [8, 8], strides = [1, 1]} : vector<8x32xf32> to vector<8x8xf32>
    %838 = arith.truncf %836 : vector<8x8xf32> to vector<8x8xbf16>
    %839 = arith.truncf %837 : vector<8x8xf32> to vector<8x8xbf16>
    %cst_240 = arith.constant dense<0.000000e+00> : vector<8x8xf32>
    %840 = tpu.matmul %838, %839, %cst_240 {dimension_numbers = #tpu.dot_dimension_numbers<[1], [0], [0], [1], [0, 0, 1, 1], [], []>} : vector<8x8xbf16>, vector<8x8xbf16>, vector<8x8xf32> -> vector<8x8xf32>
    %841 = vector.extract_strided_slice %773 {offsets = [8, 0], sizes = [8, 32], strides = [1, 1]} : vector<32x32xbf16> to vector<8x32xbf16>
    %842 = arith.truncf %840 : vector<8x8xf32> to vector<8x8xbf16>
    %cst_241 = arith.constant dense<0.000000e+00> : vector<8x32xf32>
    %843 = tpu.matmul %842, %841, %cst_241 {dimension_numbers = #tpu.dot_dimension_numbers<[1], [0], [0], [1], [0, 0, 1, 1], [], []>} : vector<8x8xbf16>, vector<8x32xbf16>, vector<8x32xf32> -> vector<8x32xf32>
    %844 = arith.addf %834, %843 : vector<8x32xf32>
    %845 = vector.extract_strided_slice %823 {offsets = [2, 0, 0], sizes = [1, 8, 8], strides = [1, 1, 1]} : vector<4x8x8xf32> to vector<1x8x8xf32>
    %846 = vector.shape_cast %845 : vector<1x8x8xf32> to vector<8x8xf32>
    %847 = vector.extract_strided_slice %786 {offsets = [0, 16], sizes = [8, 8], strides = [1, 1]} : vector<8x32xf32> to vector<8x8xf32>
    %848 = arith.truncf %846 : vector<8x8xf32> to vector<8x8xbf16>
    %849 = arith.truncf %847 : vector<8x8xf32> to vector<8x8xbf16>
    %cst_242 = arith.constant dense<0.000000e+00> : vector<8x8xf32>
    %850 = tpu.matmul %848, %849, %cst_242 {dimension_numbers = #tpu.dot_dimension_numbers<[1], [0], [0], [1], [0, 0, 1, 1], [], []>} : vector<8x8xbf16>, vector<8x8xbf16>, vector<8x8xf32> -> vector<8x8xf32>
    %851 = vector.extract_strided_slice %773 {offsets = [16, 0], sizes = [8, 32], strides = [1, 1]} : vector<32x32xbf16> to vector<8x32xbf16>
    %852 = arith.truncf %850 : vector<8x8xf32> to vector<8x8xbf16>
    %cst_243 = arith.constant dense<0.000000e+00> : vector<8x32xf32>
    %853 = tpu.matmul %852, %851, %cst_243 {dimension_numbers = #tpu.dot_dimension_numbers<[1], [0], [0], [1], [0, 0, 1, 1], [], []>} : vector<8x8xbf16>, vector<8x32xbf16>, vector<8x32xf32> -> vector<8x32xf32>
    %854 = arith.addf %844, %853 : vector<8x32xf32>
    %855 = vector.extract_strided_slice %823 {offsets = [3, 0, 0], sizes = [1, 8, 8], strides = [1, 1, 1]} : vector<4x8x8xf32> to vector<1x8x8xf32>
    %856 = vector.shape_cast %855 : vector<1x8x8xf32> to vector<8x8xf32>
    %857 = vector.extract_strided_slice %786 {offsets = [0, 24], sizes = [8, 8], strides = [1, 1]} : vector<8x32xf32> to vector<8x8xf32>
    %858 = arith.truncf %856 : vector<8x8xf32> to vector<8x8xbf16>
    %859 = arith.truncf %857 : vector<8x8xf32> to vector<8x8xbf16>
    %cst_244 = arith.constant dense<0.000000e+00> : vector<8x8xf32>
    %860 = tpu.matmul %858, %859, %cst_244 {dimension_numbers = #tpu.dot_dimension_numbers<[1], [0], [0], [1], [0, 0, 1, 1], [], []>} : vector<8x8xbf16>, vector<8x8xbf16>, vector<8x8xf32> -> vector<8x8xf32>
    %861 = vector.extract_strided_slice %773 {offsets = [24, 0], sizes = [8, 32], strides = [1, 1]} : vector<32x32xbf16> to vector<8x32xbf16>
    %862 = arith.truncf %860 : vector<8x8xf32> to vector<8x8xbf16>
    %cst_245 = arith.constant dense<0.000000e+00> : vector<8x32xf32>
    %863 = tpu.matmul %862, %861, %cst_245 {dimension_numbers = #tpu.dot_dimension_numbers<[1], [0], [0], [1], [0, 0, 1, 1], [], []>} : vector<8x8xbf16>, vector<8x32xbf16>, vector<8x32xf32> -> vector<8x32xf32>
    %864 = arith.addf %854, %863 : vector<8x32xf32>
    %865 = vector.broadcast %774 : vector<1x32xf32> to vector<8x32xf32>
    %866 = arith.addf %864, %865 : vector<8x32xf32>
    %867 = arith.addf %765, %866 : vector<8x32xf32>
    %cst_246 = arith.constant dense<0.000000e+00> : vector<8xf32>
    %868 = vector.multi_reduction <add>, %867, %cst_246 [1] : vector<8x32xf32> to vector<8xf32>
    %869 = vector.shape_cast %868 : vector<8xf32> to vector<8x1xf32>
    %cst_247 = arith.constant 3.200000e+01 : f32
    %870 = vector.broadcast %cst_247 : f32 to vector<8x1xf32>
    %871 = arith.divf %869, %870 : vector<8x1xf32>
    %872 = vector.broadcast %871 : vector<8x1xf32> to vector<8x32xf32>
    %873 = arith.subf %867, %872 : vector<8x32xf32>
    %874 = arith.mulf %873, %873 : vector<8x32xf32>
    %cst_248 = arith.constant dense<0.000000e+00> : vector<8xf32>
    %875 = vector.multi_reduction <add>, %874, %cst_248 [1] : vector<8x32xf32> to vector<8xf32>
    %876 = vector.shape_cast %875 : vector<8xf32> to vector<8x1xf32>
    %cst_249 = arith.constant 3.200000e+01 : f32
    %877 = vector.broadcast %cst_249 : f32 to vector<8x1xf32>
    %878 = arith.divf %876, %877 : vector<8x1xf32>
    %879 = vector.broadcast %871 : vector<8x1xf32> to vector<8x32xf32>
    %880 = arith.subf %867, %879 : vector<8x32xf32>
    %cst_250 = arith.constant 9.99999974E-6 : f32
    %881 = vector.broadcast %cst_250 : f32 to vector<8x1xf32>
    %882 = arith.addf %878, %881 : vector<8x1xf32>
    %883 = math.rsqrt %882 : vector<8x1xf32>
    %884 = vector.broadcast %883 : vector<8x1xf32> to vector<8x32xf32>
    %885 = arith.mulf %880, %884 : vector<8x32xf32>
    %886 = vector.broadcast %775 : vector<1x32xf32> to vector<8x32xf32>
    %887 = arith.mulf %885, %886 : vector<8x32xf32>
    %888 = vector.broadcast %776 : vector<1x32xf32> to vector<8x32xf32>
    %889 = arith.addf %887, %888 : vector<8x32xf32>
    %c1_251 = arith.constant 1 : index
    %c0_252 = arith.constant 0 : index
    %c0_253 = arith.constant 0 : index
    %890 = vector.load %arg15[%c1_251, %c0_252, %c0_253] : memref<2x32x64xbf16, #tpu.memory_space<vmem>>, vector<1x32x64xbf16>
    %891 = vector.shape_cast %890 : vector<1x32x64xbf16> to vector<32x64xbf16>
    %892 = vector.extract_strided_slice %637 {offsets = [10, 0], sizes = [1, 64], strides = [1, 1]} : vector<14x128xf32> to vector<1x64xf32>
    %c1_254 = arith.constant 1 : index
    %c0_255 = arith.constant 0 : index
    %c0_256 = arith.constant 0 : index
    %893 = vector.load %arg16[%c1_254, %c0_255, %c0_256] : memref<2x64x32xbf16, #tpu.memory_space<vmem>>, vector<1x64x32xbf16>
    %894 = vector.shape_cast %893 : vector<1x64x32xbf16> to vector<64x32xbf16>
    %895 = vector.extract_strided_slice %637 {offsets = [11, 0], sizes = [1, 32], strides = [1, 1]} : vector<14x128xf32> to vector<1x32xf32>
    %896 = vector.extract_strided_slice %637 {offsets = [12, 0], sizes = [1, 32], strides = [1, 1]} : vector<14x128xf32> to vector<1x32xf32>
    %897 = vector.extract_strided_slice %637 {offsets = [13, 0], sizes = [1, 32], strides = [1, 1]} : vector<14x128xf32> to vector<1x32xf32>
    %898 = arith.truncf %889 : vector<8x32xf32> to vector<8x32xbf16>
    %cst_257 = arith.constant dense<0.000000e+00> : vector<8x64xf32>
    %899 = tpu.matmul %898, %891, %cst_257 {dimension_numbers = #tpu.dot_dimension_numbers<[1], [0], [0], [1], [0, 0, 1, 1], [], []>} : vector<8x32xbf16>, vector<32x64xbf16>, vector<8x64xf32> -> vector<8x64xf32>
    %900 = vector.broadcast %892 : vector<1x64xf32> to vector<8x64xf32>
    %901 = arith.addf %899, %900 : vector<8x64xf32>
    %cst_258 = arith.constant 0.000000e+00 : f32
    %902 = vector.broadcast %cst_258 : f32 to vector<8x64xf32>
    %903 = arith.maximumf %901, %902 : vector<8x64xf32>
    %904 = arith.truncf %903 : vector<8x64xf32> to vector<8x64xbf16>
    %cst_259 = arith.constant dense<0.000000e+00> : vector<8x32xf32>
    %905 = tpu.matmul %904, %894, %cst_259 {dimension_numbers = #tpu.dot_dimension_numbers<[1], [0], [0], [1], [0, 0, 1, 1], [], []>} : vector<8x64xbf16>, vector<64x32xbf16>, vector<8x32xf32> -> vector<8x32xf32>
    %906 = vector.broadcast %895 : vector<1x32xf32> to vector<8x32xf32>
    %907 = arith.addf %905, %906 : vector<8x32xf32>
    %908 = arith.addf %889, %907 : vector<8x32xf32>
    %cst_260 = arith.constant dense<0.000000e+00> : vector<8xf32>
    %909 = vector.multi_reduction <add>, %908, %cst_260 [1] : vector<8x32xf32> to vector<8xf32>
    %910 = vector.shape_cast %909 : vector<8xf32> to vector<8x1xf32>
    %cst_261 = arith.constant 3.200000e+01 : f32
    %911 = vector.broadcast %cst_261 : f32 to vector<8x1xf32>
    %912 = arith.divf %910, %911 : vector<8x1xf32>
    %913 = vector.broadcast %912 : vector<8x1xf32> to vector<8x32xf32>
    %914 = arith.subf %908, %913 : vector<8x32xf32>
    %915 = arith.mulf %914, %914 : vector<8x32xf32>
    %cst_262 = arith.constant dense<0.000000e+00> : vector<8xf32>
    %916 = vector.multi_reduction <add>, %915, %cst_262 [1] : vector<8x32xf32> to vector<8xf32>
    %917 = vector.shape_cast %916 : vector<8xf32> to vector<8x1xf32>
    %cst_263 = arith.constant 3.200000e+01 : f32
    %918 = vector.broadcast %cst_263 : f32 to vector<8x1xf32>
    %919 = arith.divf %917, %918 : vector<8x1xf32>
    %920 = vector.broadcast %912 : vector<8x1xf32> to vector<8x32xf32>
    %921 = arith.subf %908, %920 : vector<8x32xf32>
    %cst_264 = arith.constant 9.99999974E-6 : f32
    %922 = vector.broadcast %cst_264 : f32 to vector<8x1xf32>
    %923 = arith.addf %919, %922 : vector<8x1xf32>
    %924 = math.rsqrt %923 : vector<8x1xf32>
    %925 = vector.broadcast %924 : vector<8x1xf32> to vector<8x32xf32>
    %926 = arith.mulf %921, %925 : vector<8x32xf32>
    %927 = vector.broadcast %896 : vector<1x32xf32> to vector<8x32xf32>
    %928 = arith.mulf %926, %927 : vector<8x32xf32>
    %929 = vector.broadcast %897 : vector<1x32xf32> to vector<8x32xf32>
    %930 = arith.addf %928, %929 : vector<8x32xf32>
    %c0_265 = arith.constant 0 : index
    %c0_266 = arith.constant 0 : index
    %931 = vector.load %arg18[%c0_265, %c0_266] : memref<32x128xbf16, #tpu.memory_space<vmem>>, vector<32x128xbf16>
    %932 = arith.truncf %930 : vector<8x32xf32> to vector<8x32xbf16>
    %cst_267 = arith.constant dense<0.000000e+00> : vector<8x128xf32>
    %933 = tpu.matmul %932, %931, %cst_267 {dimension_numbers = #tpu.dot_dimension_numbers<[1], [0], [0], [1], [0, 0, 1, 1], [], []>} : vector<8x32xbf16>, vector<32x128xbf16>, vector<8x128xf32> -> vector<8x128xf32>
    %c0_268 = arith.constant 0 : index
    %c0_269 = arith.constant 0 : index
    %934 = vector.load %arg19[%c0_268, %c0_269] : memref<1x128xf32, #tpu.memory_space<vmem>>, vector<1x128xf32>
    %935 = vector.broadcast %934 : vector<1x128xf32> to vector<8x128xf32>
    %936 = arith.addf %933, %935 : vector<8x128xf32>
    %c0_270 = arith.constant 0 : index
    %c0_271 = arith.constant 0 : index
    %c0_272 = arith.constant 0 : index
    %937 = vector.load %arg20[%c0_270, %c0_271, %c0_272] : memref<1x8x128xf32, #tpu.memory_space<vmem>>, vector<1x8x128xf32>
    %938 = vector.shape_cast %937 : vector<1x8x128xf32> to vector<8x128xf32>
    %939 = vector.shape_cast %936 : vector<8x128xf32> to vector<1x8x128xf32>
    tpu.vector_store %arg20[%c0_270, %c0_271, %c0_272], %939 {strides = array<i32>} : memref<1x8x128xf32, #tpu.memory_space<vmem>>, vector<1x8x128xf32>,
    return
  }
  func.func @transform_0(%arg0: i32) -> (i32, i32, i32) {
    %c0_i32 = arith.constant 0 : i32
    %c0_i32_0 = arith.constant 0 : i32
    %c0_i32_1 = arith.constant 0 : i32
    return %arg0, %c0_i32, %c0_i32_0 : i32, i32, i32
  }
  func.func @transform_1(%arg0: i32) -> (i32, i32, i32) {
    %c0_i32 = arith.constant 0 : i32
    %c0_i32_0 = arith.constant 0 : i32
    %c0_i32_1 = arith.constant 0 : i32
    return %arg0, %c0_i32, %c0_i32_0 : i32, i32, i32
  }
  func.func @transform_2(%arg0: i32) -> (i32, i32, i32) {
    %c0_i32 = arith.constant 0 : i32
    %c0_i32_0 = arith.constant 0 : i32
    %c0_i32_1 = arith.constant 0 : i32
    %c0_i32_2 = arith.constant 0 : i32
    return %c0_i32, %c0_i32_0, %c0_i32_1 : i32, i32, i32
  }
  func.func @transform_3(%arg0: i32) -> (i32, i32, i32) {
    %c0_i32 = arith.constant 0 : i32
    %c0_i32_0 = arith.constant 0 : i32
    %c0_i32_1 = arith.constant 0 : i32
    %c0_i32_2 = arith.constant 0 : i32
    return %c0_i32, %c0_i32_0, %c0_i32_1 : i32, i32, i32
  }
  func.func @transform_4(%arg0: i32) -> (i32, i32, i32) {
    %c0_i32 = arith.constant 0 : i32
    %c0_i32_0 = arith.constant 0 : i32
    %c0_i32_1 = arith.constant 0 : i32
    %c0_i32_2 = arith.constant 0 : i32
    return %c0_i32, %c0_i32_0, %c0_i32_1 : i32, i32, i32
  }
  func.func @transform_5(%arg0: i32) -> (i32, i32, i32) {
    %c0_i32 = arith.constant 0 : i32
    %c0_i32_0 = arith.constant 0 : i32
    %c0_i32_1 = arith.constant 0 : i32
    %c0_i32_2 = arith.constant 0 : i32
    return %c0_i32, %c0_i32_0, %c0_i32_1 : i32, i32, i32
  }
  func.func @transform_6(%arg0: i32) -> (i32, i32, i32) {
    %c0_i32 = arith.constant 0 : i32
    %c0_i32_0 = arith.constant 0 : i32
    %c0_i32_1 = arith.constant 0 : i32
    %c0_i32_2 = arith.constant 0 : i32
    return %c0_i32, %c0_i32_0, %c0_i32_1 : i32, i32, i32
  }
  func.func @transform_7(%arg0: i32) -> (i32, i32, i32) {
    %c0_i32 = arith.constant 0 : i32
    %c0_i32_0 = arith.constant 0 : i32
    %c0_i32_1 = arith.constant 0 : i32
    %c0_i32_2 = arith.constant 0 : i32
    return %c0_i32, %c0_i32_0, %c0_i32_1 : i32, i32, i32
  }
  func.func @transform_8(%arg0: i32) -> (i32, i32, i32) {
    %c0_i32 = arith.constant 0 : i32
    %c0_i32_0 = arith.constant 0 : i32
    %c0_i32_1 = arith.constant 0 : i32
    %c0_i32_2 = arith.constant 0 : i32
    return %c0_i32, %c0_i32_0, %c0_i32_1 : i32, i32, i32
  }
  func.func @transform_9(%arg0: i32) -> (i32, i32, i32) {
    %c0_i32 = arith.constant 0 : i32
    %c0_i32_0 = arith.constant 0 : i32
    %c0_i32_1 = arith.constant 0 : i32
    %c0_i32_2 = arith.constant 0 : i32
    return %c0_i32, %c0_i32_0, %c0_i32_1 : i32, i32, i32
  }
  func.func @transform_10(%arg0: i32) -> (i32, i32, i32) {
    %c0_i32 = arith.constant 0 : i32
    %c0_i32_0 = arith.constant 0 : i32
    %c0_i32_1 = arith.constant 0 : i32
    %c0_i32_2 = arith.constant 0 : i32
    return %c0_i32, %c0_i32_0, %c0_i32_1 : i32, i32, i32
  }
  func.func @transform_11(%arg0: i32) -> (i32, i32, i32) {
    %c0_i32 = arith.constant 0 : i32
    %c0_i32_0 = arith.constant 0 : i32
    %c0_i32_1 = arith.constant 0 : i32
    %c0_i32_2 = arith.constant 0 : i32
    return %c0_i32, %c0_i32_0, %c0_i32_1 : i32, i32, i32
  }
  func.func @transform_12(%arg0: i32) -> (i32, i32, i32) {
    %c0_i32 = arith.constant 0 : i32
    %c0_i32_0 = arith.constant 0 : i32
    %c0_i32_1 = arith.constant 0 : i32
    %c0_i32_2 = arith.constant 0 : i32
    return %c0_i32, %c0_i32_0, %c0_i32_1 : i32, i32, i32
  }
  func.func @transform_13(%arg0: i32) -> (i32, i32, i32) {
    %c0_i32 = arith.constant 0 : i32
    %c0_i32_0 = arith.constant 0 : i32
    %c0_i32_1 = arith.constant 0 : i32
    %c0_i32_2 = arith.constant 0 : i32
    return %c0_i32, %c0_i32_0, %c0_i32_1 : i32, i32, i32
  }
  func.func @transform_14(%arg0: i32) -> (i32, i32, i32) {
    %c0_i32 = arith.constant 0 : i32
    %c0_i32_0 = arith.constant 0 : i32
    %c0_i32_1 = arith.constant 0 : i32
    %c0_i32_2 = arith.constant 0 : i32
    return %c0_i32, %c0_i32_0, %c0_i32_1 : i32, i32, i32
  }
  func.func @transform_15(%arg0: i32) -> (i32, i32, i32) {
    %c0_i32 = arith.constant 0 : i32
    %c0_i32_0 = arith.constant 0 : i32
    %c0_i32_1 = arith.constant 0 : i32
    %c0_i32_2 = arith.constant 0 : i32
    return %c0_i32, %c0_i32_0, %c0_i32_1 : i32, i32, i32
  }
  func.func @transform_16(%arg0: i32) -> (i32, i32, i32) {
    %c0_i32 = arith.constant 0 : i32
    %c0_i32_0 = arith.constant 0 : i32
    %c0_i32_1 = arith.constant 0 : i32
    %c0_i32_2 = arith.constant 0 : i32
    return %c0_i32, %c0_i32_0, %c0_i32_1 : i32, i32, i32
  }
  func.func @transform_17(%arg0: i32) -> (i32, i32) {
    %c0_i32 = arith.constant 0 : i32
    %c0_i32_0 = arith.constant 0 : i32
    %c0_i32_1 = arith.constant 0 : i32
    return %c0_i32, %c0_i32_0 : i32, i32
  }
  func.func @transform_18(%arg0: i32) -> (i32, i32) {
    %c0_i32 = arith.constant 0 : i32
    %c0_i32_0 = arith.constant 0 : i32
    %c0_i32_1 = arith.constant 0 : i32
    return %c0_i32, %c0_i32_0 : i32, i32
  }
  func.func @transform_19(%arg0: i32) -> (i32, i32, i32) {
    %c0_i32 = arith.constant 0 : i32
    %c0_i32_0 = arith.constant 0 : i32
    %c0_i32_1 = arith.constant 0 : i32
    return %arg0, %c0_i32, %c0_i32_0 : i32, i32, i32
  }
}

</mosaic_0001>

<bundles_post_ra>
// kernel: transformer_forward.1
= control target key start
LH: loop header
LB: loop body
LE: loop exit
PB: predicated region body
PF: predicated region fallthrough
CT: control target
= control target key end

     0   :  { %s8880_s0 = inlined_call_operand.vmem [shape: f32[2,8,32], index: 0, kind: input, shape index: {}]   ;;  %s8881_s1 = inlined_call_operand.vmem [shape: f32[2,8,32], index: 1, kind: input, shape index: {}]   ;;  %s8882_s2 = inlined_call_operand.vmem [shape: bf16[2,32,32], index: 2, kind: input, shape index: {}]   ;;  %s8883_s3 = inlined_call_operand.vmem [shape: bf16[2,32,64], index: 3, kind: input, shape index: {}]   ;;  %s8884_s4 = inlined_call_operand.vmem [shape: bf16[2,32,32], index: 4, kind: input, shape index: {}]   ;;  %s8885_s5 = inlined_call_operand.vmem [shape: bf16[2,32,64], index: 5, kind: input, shape index: {}]   ;;  %s8886_s6 = inlined_call_operand.vmem [shape: bf16[2,64,32], index: 6, kind: input, shape index: {}]   ;;  %s8887_s7 = inlined_call_operand.vmem [shape: f32[2,9,128], index: 7, kind: input, shape index: {}]   ;;  %s8888_s8 = inlined_call_operand.vmem [shape: bf16[2,32,32], index: 8, kind: input, shape index: {}]   ;;  %s8889_s9 = inlined_call_operand.vmem [shape: bf16[2,32,64], index: 9, kind: input, shape index: {}]   ;;  %s8890_s10 = inlined_call_operand.vmem [shape: bf16[2,32,32], index: 10, kind: input, shape index: {}]   ;;  %s8891_s11 = inlined_call_operand.vmem [shape: bf16[2,32,32], index: 11, kind: input, shape index: {}]   ;;  %s8892_s12 = inlined_call_operand.vmem [shape: bf16[2,32,64], index: 12, kind: input, shape index: {}]   ;;  %s8893_s13 = inlined_call_operand.vmem [shape: bf16[2,32,32], index: 13, kind: input, shape index: {}]   ;;  %s8894_s14 = inlined_call_operand.vmem [shape: bf16[2,32,64], index: 14, kind: input, shape index: {}]   ;;  %s8895_s15 = inlined_call_operand.vmem [shape: bf16[2,64,32], index: 15, kind: input, shape index: {}]   ;;  %s8896_s16 = inlined_call_operand.vmem [shape: f32[2,14,128], index: 16, kind: input, shape index: {}]   ;;  %s8897_s17 = inlined_call_operand.vmem [shape: bf16[32,128], index: 17, kind: input, shape index: {}]   ;;  %s8898_s18 = inlined_call_operand.vmem [shape: f32[1,128], index: 18, kind: input, shape index: {}]   ;;  %s8899_s19 = inlined_call_operand.hbm [shape: f32[2,8,128], index: 19, kind: output, shape index: {}]  }
   0x1   :  { %8928 = sst [smem:[#allocation12_spill]] %s8880_s0 }
   0x2   :  { %8929 = sst [smem:[#allocation13_spill]] %s8881_s1 }
   0x3   :  { %8930 = sst [smem:[#allocation14_spill]] %s8882_s2 }
   0x4   :  { %8931 = sst [smem:[#allocation15_spill]] %s8883_s3 }
   0x5   :  { %8932 = sst [smem:[#allocation16_spill]] %s8884_s4 }
   0x6   :  { %8933 = sst [smem:[#allocation17_spill]] %s8885_s5 }
   0x7   :  { %8934 = sst [smem:[#allocation18_spill]] %s8898_s18 }
   0x8   :  { %8935 = sst [smem:[#allocation19_spill]] %s8899_s19 }
   0x9   :  { %24 = vsyncpa [#allocation3], 0 }
   0xa   :  { %26 = vsyncpa [#allocation3 + $0x1], 0  ;;  %s7680_s0 = smov 0   ;;  %s7682_s30 = smov 0  }
   0xb   :  { %s7684_s20 = smov 0   ;;  %s7686_s21 = smov 0  }
   0xc LB: > { %8936 = sst [smem:[#allocation5_spill]] %s7556_s0  ;;  %s7701_s1 = sadd.s32 4294967295, %s7568_s21   ;;  %s7568_s21 = sphi %s7686_s21, %s8967_s21   ;;  %s7564_s20 = sphi %s7684_s20, %s8969_s20   ;;  %s7560_s30 = sphi %s7682_s30, %s8971_s30   ;;  %s7556_s0 = sphi %s7680_s0, %s8970_s0  }
   0xd   : > { %8937 = sst [smem:[#allocation6_spill]] %s7564_s20  ;;  %s6240_s22 = sadd.s32 4294967294, %s7568_s21  }
   0xe   : > { %8938 = sst [smem:[#allocation7_spill]] %s7568_s21  ;;  %s7705_s2 = sadd.s32 1, %s7568_s21  }
   0xf   : > { %8939 = sst [smem:[#allocation8_spill]] %s7705_s2  ;;  %s448_s23 = sadd.s32 1, %s7564_s20 }
  0x10   : > { %s445_s24 = ssub.s32 %s7568_s21, %s7705_s2  ;;  %p458_p0 = scmp.ne.s32.totalorder %s7564_s20, %s7560_s30 }
  0x11   : > { %p446_p1 = scmp.eq.s32.totalorder %s445_s24, 0  ;;  %p459_p2 = scmp.eq.s32.totalorder %s7701_s1, 1 }
  0x12   : > { %p464_p3 = scmp.ne.s32.totalorder %s7560_s30, %s7556_s0  ;;  %p465_p4 = scmp.eq.s32.totalorder %s6240_s22, 1 }
  0x13   : > { %s7716_s25 = scalar_select %p446_p1, %s7564_s20, %s448_s23  }
  0x14   : > { %p7718_p5 = por %p459_p2, %p458_p0  ;;  %p7722_p6 = por %p465_p4, %p464_p3 }
  0x15   : > { %8940 = sst [smem:[#allocation9_spill]] %s7716_s25  ;;  %p6243_p7 = scmp.ge.s32.totalorder %s7568_s21, 1 }
  0x16   : > { %s8941_s3 = scalar_select %p7718_p5, 1, 0 }
  0x17   : > { %s8943_s26 = scalar_select %p7722_p6, 1, 0 }
  0x18   : > { %8942 = sst [smem:[#allocation10_spill]] %s8941_s3  ;;  %p548_p8 = scmp.lt.s32.totalorder %s7568_s21, 3 }
  0x19   : > { %8944 = sst [smem:[#allocation11_spill]] %s8943_s26 }
  0x1a   : > { %p549_p9 = pnand %p6243_p7, %p548_p8 }
  0x1b   : > { %s8945_s29 = sld [smem:[#allocation15_spill]] (!%p549_p9)  ;;  %v7570_v1 = vmov (!%p549_p9), 0.0   ;;  %s8946_s24 = sld [smem:[#allocation14_spill]] (!%p549_p9)  ;;  %vm7571_vm0 = vmmov (!%p549_p9), 0   ;;  %vm648_vm1 = vcmask (!%p549_p9), 261120   ;;  %v632_v7 = vlaneseq (!%p549_p9)  ;;  %v7782_v11 = vld [vmem:[%s8887_s7] sm:$0xff] (!%p549_p9) }
  0x1c   : > { %552 = sbr.rel (%p549_p9) target bundleno = 13611 (0x352b), region = 96  ;;  %6684 = vmatprep.subr.bf16.mxu1 (!%p549_p9), %v7570_v1  ;;  %6676 = vmatprep.subr.bf16.mxu0 (!%p549_p9), %v7570_v1  ;;  %p607_p10 = scmp.lt.s32.totalorder (!%p549_p9), %s7701_s1, 1  ;;  %vm750_vm2 = vcmask (!%p549_p9), 64512   ;;  %vm1003_vm3 = vcmask (!%p549_p9), 1043456   ;;  %vm1516_vm4 = vcmask (!%p549_p9), 523264  }
  0x1d   : > { %6688 = vmatprep.mubr.msk.bf16.mxu1 (!%p549_p9), %vm7571_vm0, %v7570_v1  ;;  %6680 = vmatprep.mubr.msk.bf16.mxu0 (!%p549_p9), %vm7571_vm0, %v7570_v1  ;;  %s8947_s2 = sld [smem:[#allocation12_spill]] (!%p549_p9)  ;;  %v7771_v8 = vshrl.u32 (!%p549_p9), %v632_v7, 7  ;;  %s8917_s27 = smov (!%p549_p9), 112  }
  0x1e   : > { %s8919_s28 = smov (!%p549_p9), 120   ;;  %s8915_s25 = smov (!%p549_p9), 104  }
  0x1f   : > { %v7774_v9 = vsub.s32 (!%p549_p9), 1, %v7771_v8  ;;  %v7777_v10 = vsub.s32 (!%p549_p9), 0, %v7771_v8  ;;  %s8907_s23 = smov (!%p549_p9), 88   ;;  %s8948_s4 = sld [smem:[#allocation16_spill]] (!%p549_p9) }
  0x20   : > { %s8949_s5 = sld [smem:[#allocation17_spill]] (!%p549_p9)  ;;  %s8950_s0 = smov (!%p549_p9), 120  }
  0x21   : > { %v7340_v0 = vld [vmem:[%s8945_s29] sm:$0xff] (!%p549_p9)   ;;  %v7342_v3 = vld [vmem:[%s8945_s29 + $0x8] sm:$0xff] (!%p549_p9)   ;;  %v695_v12 = vrot.slane (!%p549_p9), %v7782_v11, %v7774_v9  ;;  %v635_v13 = vrot.slane (!%p549_p9), %v7782_v11, %v7777_v10 }
  0x22   : > { %v7341_v2 = vld [vmem:[%s8946_s24] sm:$0xff] (!%p549_p9)   ;;  %6685 = vmatpush3.bf16.msra.mxu1 (!%p549_p9), %v7340_v0  ;;  %v7343_v4 = vld [vmem:[%s8946_s24 + $0x8] sm:$0xff] (!%p549_p9)  }
  0x23   : > { %6686 = vmatprep.subr.bf16.mxu1 %v7570_v1  ;;  %6677 = vmatpush3.bf16.msra.mxu0 %v7341_v2  ;;  %s7748_s22 = scalar_select %p607_p10, %s7701_s1, 1 }
  0x24   : > { %6678 = vmatprep.subr.bf16.mxu0 %v7570_v1 }
  0x25   : > { %s8906_s20 = sshll.u32 %s7748_s22, 3  ;;  %s8957_s19 = sshll.u32 %s7748_s22, 3 }
  0x26   : > { %6687 = vmatpush3.bf16.msra.mxu1 %v7342_v3  ;;  %s610_s26 = scalar_lea.vmem %s8947_s2, %s8906_s20  ;;  %s8909_s2 = smov 96  }
  0x27   : > { %6679 = vmatpush3.bf16.msra.mxu0 %v7343_v4  ;;  %6698 = vmatprep.subr.bf16.mxu1 %v7570_v1  ;;  %v7759_v5 = vld [vmem:[%s610_s26] sm:$0xff]  ;;  %s8913_s26 = smov 80   ;;  %s8911_s20 = smov 72  }
  0x28   : > { %6692 = vmatprep.subr.bf16.mxu0 %v7570_v1  ;;  %v631_v6 = vpack.c.bf16 %v7759_v5, %v7759_v5 }
  0x2a   : > { %6689 = vmatmul.mubr.msk.bf16.vlgmr.msra.gmra.mrb[0].mxu1 %vm648_vm1, %v631_v6  ;;  %6681 = vmatmul.mubr.msk.bf16.vlgmr.msra.gmra.mrb[0].mxu0 %vm648_vm1, %v631_v6 }
  0x2b   : > { %6694 = vmatprep.mubr.msk.bf16.mxu0 %vm7571_vm0, %v7570_v1  ;;  %6700 = vmatprep.mubr.msk.bf16.mxu1 %vm7571_vm0, %v7570_v1 }
  0xfd   : > { %v742_v14 = vpop.f32.mrb[0].mxu1  ;;  %v686_v15 = vpop.f32.mrb[0].mxu0 }
  0xfe   : > { %v743_v16 = vadd.f32 %v742_v14, %v695_v12  ;;  %v6690_v17 = vpop.f32.mrb[1].mxu1  ;;  %v687_v18 = vadd.f32 %v686_v15, %v635_v13  ;;  %v6682_v19 = vpop.f32.mrb[1].mxu0 }
  0xff   : > { %v745_v20 = vpop.f32.mrb[2].mxu1  ;;  %v689_v21 = vpop.f32.mrb[2].mxu0 }
 0x100   : > { %v7788_v22 = vpack.c.bf16 %v743_v16, %v743_v16  ;;  %v6691_v23 = vpop.f32.mrb[3].mxu1  ;;  %v6683_v24 = vpop.f32.mrb[3].mxu0  ;;  %v748_v25 = vpack.c.bf16 %v687_v18, %v687_v18 }
 0x102   : > { %851 = vrot.lane.b32.xlu1 %v7788_v22, %s8917_s27  ;;  %801 = vrot.lane.b32.xlu0 %v7788_v22, %s8919_s28  ;;  %v755_v26 = vsel %vm750_vm2, %v7788_v22, 0 }
 0x103   : > { %6693 = vmatpush3.bf16.xpose.msra.mxu0 %v755_v26 }
 0x104   : > { %6704 = vmatprep.subr.bf16.mxu0 %v7570_v1 }
 0x106   : > { %849 = vrot.lane.b32.xlu1 %v748_v25, %s8917_s27  ;;  %798 = vrot.lane.b32.xlu0 %v748_v25, %s8919_s28  ;;  %s8951_s27 = smov 112   ;;  %s8952_s28 = smov 104  }
 0x10a   : > { %899 = vrot.lane.b32.xlu1 %v748_v25, %s8915_s25  ;;  %901 = vrot.lane.b32.xlu0 %v7788_v22, %s8915_s25  ;;  %s8953_s25 = smov 88  }
 0x10b   : > { %6695 = vmatmul.mubr.msk.bf16.vlgmr.msra.gmra.mrb[4].mxu0 %vm750_vm2, %v748_v25 }
 0x10c   : > { %6706 = vmatprep.mubr.msk.bf16.mxu0 %vm7571_vm0, %v7570_v1 }
 0x174   : > { %v852_v27 = vpop.permute.xlu1 %851  ;;  %v802_v28 = vpop.permute.xlu0 %801 }
 0x175   : > { %v857_v29 = vsel %vm750_vm2, %v852_v27, 0  ;;  %v807_v30 = vsel %vm750_vm2, %v802_v28, 0 }
 0x176   : > { %6699 = vmatpush3.bf16.xpose.msra.mxu1 %v807_v30  ;;  %6705 = vmatpush3.bf16.xpose.msra.mxu0 %v857_v29 }
 0x177   : > { %6710 = vmatprep.subr.bf16.mxu1 %v7570_v1  ;;  %6716 = vmatprep.subr.bf16.mxu0 %v7570_v1 }
 0x178   : > { %v799_v31 = vpop.permute.xlu0 %798  ;;  %v850_v32 = vpop.permute.xlu1 %849 }
 0x17c   : > { %v902_v33 = vpop.permute.xlu0 %901  ;;  %v900_v35 = vpop.permute.xlu1 %899 }
 0x17d   : > { %v907_v34 = vsel %vm750_vm2, %v902_v33, 0  ;;  %6701 = vmatmul.mubr.msk.bf16.vlgmr.msra.gmra.mrb[4].mxu1 %vm750_vm2, %v799_v31  ;;  %6707 = vmatmul.mubr.msk.bf16.vlgmr.msra.gmra.mrb[8].mxu0 %vm750_vm2, %v850_v32 }
 0x17e   : > { %6711 = vmatpush3.bf16.xpose.msra.mxu1 %v907_v34  ;;  %6712 = vmatprep.mubr.msk.bf16.mxu1 %vm7571_vm0, %v7570_v1 }
 0x17f   : > { %6722 = vmatprep.subr.bf16.mxu1 %v7570_v1  ;;  %6718 = vmatprep.mubr.msk.bf16.mxu0 %vm7571_vm0, %v7570_v1 }
 0x185   : > { %6713 = vmatmul.mubr.msk.bf16.vlgmr.msra.gmra.mrb[8].mxu1 %vm750_vm2, %v900_v35  ;;  %v628_v35 = vld [vmem:[%s8948_s4 + $0x4] sm:$0xf] }
 0x186   : > { %6724 = vmatprep.mubr.msk.bf16.mxu1 %vm7571_vm0, %v7570_v1 }
 0x1de   : > { %v791_v36 = vpop.f32.mrb[4].mxu0 }
 0x1df   : > { %v6696_v37 = vpop.f32.mrb[5].mxu0  ;;  %v949_v60 = vmul.f32 0.35355338, %v791_v36 }
 0x1e0   : > { %v794_v38 = vpop.f32.mrb[6].mxu0 }
 0x1e1   : > { %v6697_v39 = vpop.f32.mrb[7].mxu0  ;;  %v953_v63 = vsel %vm750_vm2, %v949_v60, -inf  ;;  %v1102_v38 = vsel %vm1003_vm3, %v628_v35, 0 }
 0x250   : > { %v843_v40 = vpop.f32.mrb[4].mxu1  ;;  %v893_v41 = vpop.f32.mrb[8].mxu0 }
 0x251   : > { %v950_v42 = vmul.f32 0.35355338, %v843_v40  ;;  %v6702_v43 = vpop.f32.mrb[5].mxu1  ;;  %v6708_v44 = vpop.f32.mrb[9].mxu0  ;;  %v951_v62 = vmul.f32 0.35355338, %v893_v41 }
 0x252   : > { %v846_v45 = vpop.f32.mrb[6].mxu1  ;;  %v896_v46 = vpop.f32.mrb[10].mxu0 }
 0x253   : > { %v6703_v47 = vpop.f32.mrb[7].mxu1  ;;  %v6709_v48 = vpop.f32.mrb[11].mxu0  ;;  %v956_v49 = vsel %vm750_vm2, %v950_v42, -inf  ;;  %v959_v2 = vsel %vm750_vm2, %v951_v62, -inf }
 0x254   : > { %957 = vmax.xlane.f32.xlu0 %v956_v49 }
 0x258   : > { %v943_v50 = vpop.f32.mrb[8].mxu1 }
 0x259   : > { %v6714_v51 = vpop.f32.mrb[9].mxu1  ;;  %v952_v0 = vmul.f32 0.35355338, %v943_v50 }
 0x25a   : > { %v946_v52 = vpop.f32.mrb[10].mxu1 }
 0x25b   : > { %v6715_v53 = vpop.f32.mrb[11].mxu1  ;;  %v962_v3 = vsel %vm750_vm2, %v952_v0, -inf }
 0x26a   : > { %1049 = vrot.lane.b32.xlu0 %v7788_v22, %s8907_s23  ;;  %s8954_s23 = smov 96  }
 0x2e1   : > { %v958_v54 = vpop.xlane.xlu0 %957 }
 0x2e2   : > { %v966_v55 = vsub.f32 %v950_v42, %v958_v54  ;;  %v627_v54 = vld [vmem:[%s8948_s4] sm:$0xf] }
 0x2e4   : > { %v971_v56 = vmul.f32 1.442695, %v966_v55  ;;  %v1148_v55 = vsel %vm1003_vm3, %v627_v54, 0  ;;  %v7916_v54 = vsub.s32 4, %v7771_v8 }
 0x2e5   : > { %v1050_v57 = vpop.permute.xlu0 %1049 }
 0x2e6   : > { %7390 = vpow2.f32 %v971_v56  ;;  %v1055_v58 = vsel %vm1003_vm3, %v1050_v57, 0  ;;  %v629_v56 = vld [vmem:[%s8948_s4 + $0x8] sm:$0xf] }
 0x2e7   : > { %6723 = vmatpush3.bf16.msra.mxu1 %v1055_v58 }
 0x2e8   : > { %6734 = vmatprep.subr.bf16.mxu1 %v7570_v1 }
 0x2f0   : > { %v7391_v59 = vpop.eup %7390 }
 0x2f1   : > { %v980_v61 = vsel %vm750_vm2, %v7391_v59, 0.0 }
 0x2f2   : > { %981 = vadd.xlane.f32.xlu1 %v980_v61 }
 0x2f6   : > { %954 = vmax.xlane.f32.xlu1 %v953_v63 }
 0x2fa   : > { %960 = vmax.xlane.f32.xlu1 %v959_v2 }
 0x2fe   : > { %963 = vmax.xlane.f32.xlu1 %v962_v3 }
 0x37f   : > { %v982_v4 = vpop.xlane.xlu1 %981 }
 0x380   : > { %7392 = vrcp.f32 %v982_v4  ;;  %v630_v4 = vld [vmem:[%s8948_s4 + $0xc] sm:$0xf] }
 0x383   : > { %v955_v6 = vpop.xlane.xlu1 %954 }
 0x384   : > { %v965_v12 = vsub.f32 %v949_v60, %v955_v6  ;;  %v1244_v60 = vsel %vm1003_vm3, %v629_v56, 0 }
 0x386   : > { %v969_v13 = vmul.f32 1.442695, %v965_v12 }
 0x387   : > { %v961_v14 = vpop.xlane.xlu1 %960 }
 0x388   : > { %7394 = vpow2.f32 %v969_v13  ;;  %v967_v15 = vsub.f32 %v951_v62, %v961_v14  ;;  %v1341_v14 = vsel %vm1003_vm3, %v630_v4, 0 }
 0x38a   : > { %v7393_v16 = vpop.eup %7392  ;;  %v973_v17 = vmul.f32 1.442695, %v967_v15 }
 0x38b   : > { %v964_v18 = vpop.xlane.xlu1 %963  ;;  %v994_v19 = vmul.f32 %v7393_v16, %v7391_v59 }
 0x38c   : > { %7396 = vpow2.f32 %v973_v17  ;;  %v968_v20 = vsub.f32 %v952_v0, %v964_v18 }
 0x38d   : > { %v1048_v21 = vpack.c.bf16 %v994_v19, %v994_v19 }
 0x38e   : > { %v975_v23 = vmul.f32 1.442695, %v968_v20 }
 0x38f   : > { %6725 = vmatmul.mubr.msk.bf16.vlgmr.msra.gmra.mrb[12].mxu1 %vm750_vm2, %v1048_v21 }
 0x390   : > { %7398 = vpow2.f32 %v975_v23  ;;  %6736 = vmatprep.mubr.msk.bf16.mxu1 %vm7571_vm0, %v7570_v1  ;;  %6735 = vmatpush3.bf16.msra.mxu1 %v1148_v55 }
 0x391   : > { %6746 = vmatprep.subr.bf16.mxu1 %v7570_v1 }
 0x392   : > { %v7395_v24 = vpop.eup %7394 }
 0x393   : > { %v977_v25 = vsel %vm750_vm2, %v7395_v24, 0.0 }
 0x394   : > { %978 = vadd.xlane.f32.xlu1 %v977_v25 }
 0x396   : > { %v7397_v26 = vpop.eup %7396 }
 0x397   : > { %v983_v27 = vsel %vm750_vm2, %v7397_v26, 0.0 }
 0x398   : > { %984 = vadd.xlane.f32.xlu1 %v983_v27 }
 0x39a   : > { %v7399_v28 = vpop.eup %7398 }
 0x39b   : > { %v986_v29 = vsel %vm750_vm2, %v7399_v28, 0.0 }
 0x39c   : > { %987 = vadd.xlane.f32.xlu0 %v986_v29 }
 0x3a9   : > { %998 = vrot.lane.b32.xlu1 %v7788_v22, %s8909_s2  ;;  %s8955_s2 = smov 80  }
 0x3ad   : > { %1191 = vrot.lane.b32.xlu1 %v7788_v22, %s8913_s26  ;;  %s8958_s26 = sld [smem:[#allocation13_spill]] }
 0x3b1   : > { %1288 = vrot.lane.b32.xlu1 %v7788_v22, %s8911_s20  ;;  %s8956_s20 = smov 72  }
 0x3b3   : > { %s614_s21 = scalar_lea.vmem %s8958_s26, %s8957_s19  ;;  %s6458_s19 = sshll.u32 %s7701_s1, 7 }
 0x421   : > { %v979_v30 = vpop.xlane.xlu1 %978 }
 0x422   : > { %7400 = vrcp.f32 %v979_v30 }
 0x425   : > { %v985_v31 = vpop.xlane.xlu1 %984 }
 0x426   : > { %7402 = vrcp.f32 %v985_v31 }
 0x429   : > { %v999_v32 = vpop.permute.xlu1 %998  ;;  %v988_v22 = vpop.xlane.xlu0 %987 }
 0x42a   : > { %v1005_v33 = vsel %vm1003_vm3, %v999_v32, 0  ;;  %7404 = vrcp.f32 %v988_v22 }
 0x42b   : > { %6717 = vmatpush3.bf16.msra.mxu0 %v1005_v33  ;;  %v7889_v33 = vsub.s32 2, %v7771_v8 }
 0x42c   : > { %v7401_v34 = vpop.eup %7400  ;;  %6728 = vmatprep.subr.bf16.mxu0 %v7570_v1 }
 0x42d   : > { %v993_v36 = vmul.f32 %v7401_v34, %v7395_v24  ;;  %v1192_v39 = vpop.permute.xlu1 %1191  ;;  %v1387_v34 = vrot.slane %v7782_v11, %v7889_v33 }
 0x42e   : > { %v1197_v45 = vsel %vm1003_vm3, %v1192_v39, 0 }
 0x42f   : > { %v997_v37 = vpack.c.bf16 %v993_v36, %v993_v36 }
 0x430   : > { %v7403_v43 = vpop.eup %7402 }
 0x431   : > { %6719 = vmatmul.mubr.msk.bf16.vlgmr.msra.gmra.mrb[12].mxu0 %vm750_vm2, %v997_v37  ;;  %v995_v47 = vmul.f32 %v7403_v43, %v7397_v26  ;;  %v1289_v48 = vpop.permute.xlu1 %1288 }
 0x432   : > { %6729 = vmatpush3.bf16.msra.mxu0 %v1102_v38  ;;  %6730 = vmatprep.mubr.msk.bf16.mxu0 %vm7571_vm0, %v7570_v1  ;;  %v1294_v51 = vsel %vm1003_vm3, %v1289_v48, 0  ;;  %v7345_v48 = vld [vmem:[%s8949_s5 + $0x8] sm:$0xff]  }
 0x433   : > { %6740 = vmatprep.subr.bf16.mxu0 %v7570_v1  ;;  %v1190_v49 = vpack.c.bf16 %v995_v47, %v995_v47  ;;  %v7344_v47 = vld [vmem:[%s8949_s5] sm:$0xff]  }
 0x434   : > { %v7405_v50 = vpop.eup %7404 }
 0x435   : > { %v996_v52 = vmul.f32 %v7405_v50, %v7399_v28 }
 0x437   : > { %v1287_v53 = vpack.c.bf16 %v996_v52, %v996_v52 }
 0x462   : > { %v1091_v40 = vpop.f32.mrb[12].mxu1 }
 0x463   : > { %v1097_v41 = vpack.c.bf16 %v1091_v40, %v1091_v40  ;;  %v6726_v42 = vpop.f32.mrb[13].mxu1 }
 0x464   : > { %v1094_v44 = vpop.f32.mrb[14].mxu1 }
 0x465   : > { %v6727_v46 = vpop.f32.mrb[15].mxu1  ;;  %6731 = vmatmul.mubr.msk.bf16.vlgmr.msra.gmra.mrb[16].mxu0 %vm750_vm2, %v1097_v41 }
 0x466   : > { %6741 = vmatpush3.bf16.msra.mxu0 %v1197_v45  ;;  %6742 = vmatprep.mubr.msk.bf16.mxu0 %vm7571_vm0, %v7570_v1 }
 0x467   : > { %6752 = vmatprep.subr.bf16.mxu0 %v7570_v1 }
 0x46d   : > { %6743 = vmatmul.mubr.msk.bf16.vlgmr.msra.gmra.mrb[20].mxu0 %vm750_vm2, %v1190_v49  ;;  %v7347_v49 = vld [vmem:[%s8886_s6 + $0x8] sm:$0xff]  }
 0x46e   : > { %6753 = vmatpush3.bf16.msra.mxu0 %v1294_v51  ;;  %6754 = vmatprep.mubr.msk.bf16.mxu0 %vm7571_vm0, %v7570_v1 }
 0x46f   : > { %6764 = vmatprep.subr.bf16.mxu0 %v7570_v1 }
 0x475   : > { %6755 = vmatmul.mubr.msk.bf16.vlgmr.msra.gmra.mrb[24].mxu0 %vm750_vm2, %v1287_v53  ;;  %v7913_v53 = vsub.s32 3, %v7771_v8 }
 0x476   : > { %6768 = vmatprep.mubr.msk.bf16.mxu0 %vm7571_vm0, %v7570_v1  ;;  %6765 = vmatpush3.bf16.msra.mxu0 %v7344_v47 }
 0x477   : > { %6766 = vmatprep.subr.bf16.mxu0 %v7570_v1  ;;  %v1407_v55 = vrot.slane %v7782_v11, %v7913_v53 }
 0x47a   : > { %6767 = vmatpush3.bf16.msra.mxu0 %v7345_v48 }
 0x47b   : > { %6784 = vmatprep.subr.bf16.mxu0 %v7570_v1 }
 0x504   : > { %v1041_v57 = vpop.f32.mrb[12].mxu0 }
 0x505   : > { %v1047_v58 = vpack.c.bf16 %v1041_v57, %v1041_v57  ;;  %v6720_v59 = vpop.f32.mrb[13].mxu0 }
 0x506   : > { %v1044_v61 = vpop.f32.mrb[14].mxu0 }
 0x507   : > { %v6721_v62 = vpop.f32.mrb[15].mxu0  ;;  %6737 = vmatmul.mubr.msk.bf16.vlgmr.msra.gmra.mrb[16].mxu1 %vm750_vm2, %v1047_v58  ;;  %v1412_v58 = vrot.slane %v7782_v11, %v7916_v54 }
 0x508   : > { %6747 = vmatpush3.bf16.msra.mxu1 %v1244_v60  ;;  %6748 = vmatprep.mubr.msk.bf16.mxu1 %vm7571_vm0, %v7570_v1  ;;  %v7348_v62 = vld [vmem:[%s8886_s6 + $0x10] sm:$0xff]  }
 0x509   : > { %6758 = vmatprep.subr.bf16.mxu1 %v7570_v1 }
 0x538   : > { %v1138_v63 = vpop.f32.mrb[16].mxu0 }
 0x539   : > { %v6732_v0 = vpop.f32.mrb[17].mxu0 }
 0x53a   : > { %v1141_v2 = vpop.f32.mrb[18].mxu0  ;;  %v7934_v0 = vsub.s32 5, %v7771_v8 }
 0x53b   : > { %v6733_v3 = vpop.f32.mrb[19].mxu0 }
 0x53c   : > { %v1430_v2 = vrot.slane %v7782_v11, %v7934_v0 }
 0x540   : > { %v1233_v6 = vpop.f32.mrb[20].mxu0 }
 0x541   : > { %v1239_v12 = vpack.c.bf16 %v1233_v6, %v1233_v6  ;;  %v6744_v13 = vpop.f32.mrb[21].mxu0 }
 0x542   : > { %v1236_v15 = vpop.f32.mrb[22].mxu0 }
 0x543   : > { %v6745_v16 = vpop.f32.mrb[23].mxu0  ;;  %6749 = vmatmul.mubr.msk.bf16.vlgmr.msra.gmra.mrb[20].mxu1 %vm750_vm2, %v1239_v12 }
 0x544   : > { %6759 = vmatpush3.bf16.msra.mxu1 %v1341_v14  ;;  %6760 = vmatprep.mubr.msk.bf16.mxu1 %vm7571_vm0, %v7570_v1  ;;  %v7942_v16 = vsub.s32 6, %v7771_v8 }
 0x545   : > { %6772 = vmatprep.subr.bf16.mxu1 %v7570_v1 }
 0x548   : > { %v1330_v17 = vpop.f32.mrb[24].mxu0 }
 0x549   : > { %v1336_v18 = vpack.c.bf16 %v1330_v17, %v1330_v17  ;;  %v6756_v19 = vpop.f32.mrb[25].mxu0  ;;  %v1491_v17 = vrot.slane %v7782_v11, %v7942_v16 }
 0x54a   : > { %v1333_v20 = vpop.f32.mrb[26].mxu0 }
 0x54b   : > { %v6757_v21 = vpop.f32.mrb[27].mxu0  ;;  %6761 = vmatmul.mubr.msk.bf16.vlgmr.msra.gmra.mrb[24].mxu1 %vm750_vm2, %v1336_v18 }
 0x54c   : > { %6780 = vmatprep.mubr.msk.bf16.mxu1 %vm7571_vm0, %v7570_v1 }
 0x5da   : > { %v1184_v23 = vpop.f32.mrb[16].mxu1 }
 0x5db   : > { %v1185_v24 = vadd.f32 %v1184_v23, %v1138_v63  ;;  %v6738_v25 = vpop.f32.mrb[17].mxu1  ;;  %v7349_v63 = vld [vmem:[%s8886_s6 + $0x18] sm:$0xff]  }
 0x5dc   : > { %v1187_v26 = vpop.f32.mrb[18].mxu1 }
 0x5dd   : > { %v6739_v27 = vpop.f32.mrb[19].mxu1 }
 0x616   : > { %v1280_v28 = vpop.f32.mrb[20].mxu1 }
 0x617   : > { %v1286_v29 = vadd.f32 %v1280_v28, %v1185_v24  ;;  %v6750_v30 = vpop.f32.mrb[21].mxu1 }
 0x618   : > { %v1283_v31 = vpop.f32.mrb[22].mxu1 }
 0x619   : > { %v6751_v32 = vpop.f32.mrb[23].mxu1  ;;  %v7350_v31 = vld [vmem:[%s8946_s24 + $0x10] sm:$0xff]  }
 0x61a   : > { %v7351_v32 = vld [vmem:[%s8946_s24 + $0x18] sm:$0xff]  }
 0x61e   : > { %v1377_v35 = vpop.f32.mrb[24].mxu1 }
 0x61f   : > { %v1383_v36 = vadd.f32 %v1377_v35, %v1286_v29  ;;  %v6762_v37 = vpop.f32.mrb[25].mxu1 }
 0x620   : > { %v1380_v38 = vpop.f32.mrb[26].mxu1  ;;  %v7957_v37 = vsub.s32 7, %v7771_v8 }
 0x621   : > { %v1388_v22 = vadd.f32 %v1387_v34, %v1383_v36  ;;  %v6763_v39 = vpop.f32.mrb[27].mxu1 }
 0x622   : > { %v1577_v38 = vrot.slane %v7782_v11, %v7957_v37  ;;  %v7353_v11 = vld [vmem:[%s8945_s29 + $0x18] sm:$0xff]  }
 0x623   : > { %v1389_v40 = vadd.f32 %v1388_v22, %v7759_v5  ;;  %v7346_v5 = vld [vmem:[%s8886_s6] sm:$0xff]  }
 0x624   : > { %6773 = vmatpush3.bf16.msra.mxu1 %v7346_v5 }
 0x625   : > { %v1390_v41 = vsel %vm648_vm1, %v1389_v40, 0.0  ;;  %6774 = vmatprep.subr.bf16.mxu1 %v7570_v1 }
 0x626   : > { %1391 = vadd.xlane.f32.xlu1 %v1390_v41 }
 0x628   : > { %6775 = vmatpush3.bf16.msra.mxu1 %v7347_v49 }
 0x629   : > { %6776 = vmatprep.subr.bf16.mxu1 %v7570_v1 }
 0x62c   : > { %6777 = vmatpush3.bf16.msra.mxu1 %v7348_v62 }
 0x62d   : > { %6778 = vmatprep.subr.bf16.mxu1 %v7570_v1 }
 0x630   : > { %6779 = vmatpush3.bf16.msra.mxu1 %v7349_v63 }
 0x631   : > { %6800 = vmatprep.subr.bf16.mxu1 %v7570_v1 }
 0x6b3   : > { %v1392_v42 = vpop.xlane.xlu1 %1391 }
 0x6b4   : > { %v1394_v43 = vmul.f32 0.03125, %v1392_v42 }
 0x6b6   : > { %v1395_v44 = vsub.f32 %v1389_v40, %v1394_v43  ;;  %v6273_v40 = vld [vmem:[%s8887_s7 + $0x8] ss:$0 sm:$0xff]  ;;  %v7352_v43 = vld [vmem:[%s8945_s29 + $0x10] sm:$0xff]  }
 0x6b8   : > { %v1396_v45 = vmul.f32 %v1395_v44, %v1395_v44 }
 0x6ba   : > { %v1397_v46 = vsel %vm648_vm1, %v1396_v45, 0.0  ;;  %v7985_v45 = vld [vmem:[%s8887_s7 + $0x10] sm:$0xff] }
 0x6bb   : > { %1398 = vadd.xlane.f32.xlu0 %v1397_v46  ;;  %v1606_v46 = vrot.slane %v7985_v45, %v7777_v10 }
 0x748   : > { %v1399_v50 = vpop.xlane.xlu0 %1398 }
 0x749   : > { %v1400_v51 = vmul.f32 0.03125, %v1399_v50 }
 0x74b   : > { %v1401_v52 = vadd.f32 1e-05, %v1400_v51 }
 0x74d   : > { %7406 = vrsqrt.f32 %v1401_v52  ;;  %v1665_v52 = vrot.slane %v7985_v45, %v7774_v9 }
 0x757   : > { %v7407_v56 = vpop.eup %7406 }
 0x758   : > { %v1403_v57 = vmul.f32 %v7407_v56, %v1395_v44 }
 0x75a   : > { %v1408_v59 = vmul.f32 %v1407_v55, %v1403_v57 }
 0x75c   : > { %v1413_v60 = vadd.f32 %v1412_v58, %v1408_v59 }
 0x75e   : > { %v1426_v61 = vpack.c.bf16 %v1413_v60, %v1413_v60 }
 0x760   : > { %6769 = vmatmul.mubr.msk.bf16.vlgmr.msra.gmra.mrb[28].mxu0 %vm648_vm1, %v1426_v61 }
 0x761   : > { %6788 = vmatprep.mubr.msk.bf16.mxu0 %vm7571_vm0, %v7570_v1  ;;  %6785 = vmatpush3.bf16.msra.mxu0 %v7350_v31 }
 0x762   : > { %6786 = vmatprep.subr.bf16.mxu0 %v7570_v1 }
 0x765   : > { %6787 = vmatpush3.bf16.msra.mxu0 %v7351_v32 }
 0x766   : > { %6792 = vmatprep.subr.bf16.mxu0 %v7570_v1 }
 0x833   : > { %v1480_v3 = vpop.f32.mrb[28].mxu0 }
 0x834   : > { %v1481_v4 = vadd.f32 %v1480_v3, %v1430_v2  ;;  %v6770_v6 = vpop.f32.mrb[29].mxu0 }
 0x835   : > { %v1483_v12 = vpop.f32.mrb[30].mxu0 }
 0x836   : > { %v1486_v13 = vmax.f32 %v1481_v4, 0.0  ;;  %v6771_v14 = vpop.f32.mrb[31].mxu0 }
 0x838   : > { %v1487_v15 = vpack.c.bf16 %v1486_v13, %v1486_v13 }
 0x83a   : > { %6781 = vmatmul.mubr.msk.bf16.vlgmr.msra.gmra.mrb[28].mxu1 %vm1516_vm4, %v1487_v15 }
 0x83b   : > { %6802 = vmatprep.mubr.msk.bf16.mxu1 %vm7571_vm0, %v7570_v1 }
 0x90d   : > { %v1554_v18 = vpop.f32.mrb[28].mxu1 }
 0x90e   : > { %v1555_v19 = vadd.f32 %v1554_v18, %v1491_v17  ;;  %v6782_v20 = vpop.f32.mrb[29].mxu1 }
 0x90f   : > { %v1557_v21 = vpop.f32.mrb[30].mxu1 }
 0x910   : > { %v6783_v23 = vpop.f32.mrb[31].mxu1  ;;  %v1560_v24 = vadd.f32 %v1555_v19, %v1413_v60 }
 0x912   : > { %v1561_v25 = vsel %vm648_vm1, %v1560_v24, 0.0 }
 0x913   : > { %1562 = vadd.xlane.f32.xlu0 %v1561_v25 }
 0x9a0   : > { %v1563_v26 = vpop.xlane.xlu0 %1562 }
 0x9a1   : > { %v1564_v27 = vmul.f32 0.03125, %v1563_v26 }
 0x9a3   : > { %v1565_v28 = vsub.f32 %v1560_v24, %v1564_v27 }
 0x9a5   : > { %v1566_v29 = vmul.f32 %v1565_v28, %v1565_v28 }
 0x9a7   : > { %v1567_v30 = vsel %vm648_vm1, %v1566_v29, 0.0 }
 0x9a8   : > { %1568 = vadd.xlane.f32.xlu0 %v1567_v30 }
 0xa35   : > { %v1569_v34 = vpop.xlane.xlu0 %1568 }
 0xa36   : > { %v1570_v35 = vmul.f32 0.03125, %v1569_v34 }
 0xa38   : > { %v1571_v36 = vadd.f32 1e-05, %v1570_v35 }
 0xa3a   : > { %7408 = vrsqrt.f32 %v1571_v36 }
 0xa44   : > { %v7409_v22 = vpop.eup %7408 }
 0xa45   : > { %v1573_v39 = vmul.f32 %v7409_v22, %v1565_v28 }
 0xa47   : > { %v1578_v41 = vmul.f32 %v1577_v38, %v1573_v39 }
 0xa49   : > { %v7964_v42 = vadd.f32 %v6273_v40, %v1578_v41 }
 0xa4b   : > { %v1602_v44 = vpack.c.bf16 %v7964_v42, %v7964_v42 }
 0xa4d   : > { %6789 = vmatmul.mubr.msk.bf16.vlgmr.msra.gmra.mrb[32].mxu0 %vm648_vm1, %v1602_v44 }
 0xa4e   : > { %6793 = vmatpush3.bf16.msra.mxu0 %v7352_v43  ;;  %6796 = vmatprep.mubr.msk.bf16.mxu0 %vm7571_vm0, %v7570_v1 }
 0xa4f   : > { %6794 = vmatprep.subr.bf16.mxu0 %v7570_v1 }
 0xa52   : > { %6795 = vmatpush3.bf16.msra.mxu0 %v7353_v11 }
 0xa53   : > { %6806 = vmatprep.subr.bf16.mxu0 %v7570_v1 }
 0xa55   : > { %6797 = vmatmul.mubr.msk.bf16.vlgmr.msra.gmra.mrb[36].mxu0 %vm648_vm1, %v1602_v44 }
 0xa56   : > { %6808 = vmatprep.mubr.msk.bf16.mxu0 %vm7571_vm0, %v7570_v1 }
 0xb20   : > { %v1656_v47 = vpop.f32.mrb[32].mxu0 }
 0xb21   : > { %v1657_v48 = vadd.f32 %v1656_v47, %v1606_v46  ;;  %v6790_v5 = vpop.f32.mrb[33].mxu0 }
 0xb22   : > { %v1659_v49 = vpop.f32.mrb[34].mxu0 }
 0xb23   : > { %v1718_v50 = vpack.c.bf16 %v1657_v48, %v1657_v48  ;;  %v6791_v51 = vpop.f32.mrb[35].mxu0 }
 0xb25   : > { %1767 = vrot.lane.b32.xlu1 %v1718_v50, %s8950_s0 }
 0xb28   : > { %v1712_v55 = vpop.f32.mrb[36].mxu0 }
 0xb29   : > { %v1713_v56 = vadd.f32 %v1712_v55, %v1665_v52  ;;  %v6798_v57 = vpop.f32.mrb[37].mxu0 }
 0xb2a   : > { %v1715_v58 = vpop.f32.mrb[38].mxu0 }
 0xb2b   : > { %v7992_v59 = vpack.c.bf16 %v1713_v56, %v1713_v56  ;;  %v6799_v60 = vpop.f32.mrb[39].mxu0 }
 0xb2d   : > { %1770 = vrot.lane.b32.xlu0 %v7992_v59, %s8950_s0  ;;  %v1724_v61 = vsel %vm750_vm2, %v7992_v59, 0 }
 0xb2e   : > { %6801 = vmatpush3.bf16.xpose.msra.mxu1 %v1724_v61 }
 0xb2f   : > { %6812 = vmatprep.subr.bf16.mxu1 %v7570_v1 }
 0xb31   : > { %1820 = vrot.lane.b32.xlu0 %v7992_v59, %s8951_s27 }
 0xb35   : > { %1818 = vrot.lane.b32.xlu0 %v1718_v50, %s8951_s27  ;;  %6803 = vmatmul.mubr.msk.bf16.vlgmr.msra.gmra.mrb[32].mxu1 %vm750_vm2, %v1718_v50 }
 0xb36   : > { %6814 = vmatprep.mubr.msk.bf16.mxu1 %vm7571_vm0, %v7570_v1 }
 0xb39   : > { %1870 = vrot.lane.b32.xlu0 %v7992_v59, %s8952_s28 }
 0xb3d   : > { %1868 = vrot.lane.b32.xlu0 %v1718_v50, %s8952_s28 }
 0xb97   : > { %v1768_v4 = vpop.permute.xlu1 %1767 }
 0xb9f   : > { %v1771_v62 = vpop.permute.xlu0 %1770 }
 0xba0   : > { %v1776_v63 = vsel %vm750_vm2, %v1771_v62, 0 }
 0xba1   : > { %6807 = vmatpush3.bf16.xpose.msra.mxu0 %v1776_v63 }
 0xba2   : > { %6818 = vmatprep.subr.bf16.mxu0 %v7570_v1 }
 0xba3   : > { %v1821_v2 = vpop.permute.xlu0 %1820 }
 0xba4   : > { %v1826_v3 = vsel %vm750_vm2, %v1821_v2, 0 }
 0xba5   : > { %6813 = vmatpush3.bf16.xpose.msra.mxu1 %v1826_v3 }
 0xba6   : > { %6824 = vmatprep.subr.bf16.mxu1 %v7570_v1 }
 0xba7   : > { %v1819_v6 = vpop.permute.xlu0 %1818 }
 0xba8   : > { %6809 = vmatmul.mubr.msk.bf16.vlgmr.msra.gmra.mrb[40].mxu0 %vm750_vm2, %v1768_v4 }
 0xba9   : > { %6820 = vmatprep.mubr.msk.bf16.mxu0 %vm7571_vm0, %v7570_v1 }
 0xbab   : > { %v1871_v12 = vpop.permute.xlu0 %1870 }
 0xbac   : > { %v1876_v13 = vsel %vm750_vm2, %v1871_v12, 0  ;;  %6815 = vmatmul.mubr.msk.bf16.vlgmr.msra.gmra.mrb[36].mxu1 %vm750_vm2, %v1819_v6 }
 0xbad   : > { %6819 = vmatpush3.bf16.xpose.msra.mxu0 %v1876_v13  ;;  %6826 = vmatprep.mubr.msk.bf16.mxu1 %vm7571_vm0, %v7570_v1 }
 0xbae   : > { %6830 = vmatprep.subr.bf16.mxu0 %v7570_v1 }
 0xbaf   : > { %v1869_v14 = vpop.permute.xlu0 %1868 }
 0xbb4   : > { %6821 = vmatmul.mubr.msk.bf16.vlgmr.msra.gmra.mrb[44].mxu0 %vm750_vm2, %v1869_v14 }
 0xbb5   : > { %6832 = vmatprep.mubr.msk.bf16.mxu0 %vm7571_vm0, %v7570_v1 }
 0xc08   : > { %v1760_v15 = vpop.f32.mrb[32].mxu1 }
 0xc09   : > { %v6804_v17 = vpop.f32.mrb[33].mxu1  ;;  %v1918_v43 = vmul.f32 0.35355338, %v1760_v15 }
 0xc0a   : > { %v1763_v18 = vpop.f32.mrb[34].mxu1 }
 0xc0b   : > { %v6805_v19 = vpop.f32.mrb[35].mxu1  ;;  %v1922_v46 = vsel %vm750_vm2, %v1918_v43, -inf }
 0xc7b   : > { %v1812_v20 = vpop.f32.mrb[40].mxu0 }
 0xc7c   : > { %v1919_v21 = vmul.f32 0.35355338, %v1812_v20  ;;  %v6810_v23 = vpop.f32.mrb[41].mxu0 }
 0xc7d   : > { %v1815_v24 = vpop.f32.mrb[42].mxu0 }
 0xc7e   : > { %v6811_v25 = vpop.f32.mrb[43].mxu0  ;;  %v1925_v26 = vsel %vm750_vm2, %v1919_v21, -inf }
 0xc7f   : > { %v1862_v27 = vpop.f32.mrb[36].mxu1  ;;  %1926 = vmax.xlane.f32.xlu0 %v1925_v26 }
 0xc80   : > { %v6816_v28 = vpop.f32.mrb[37].mxu1  ;;  %v1920_v11 = vmul.f32 0.35355338, %v1862_v27 }
 0xc81   : > { %v1865_v29 = vpop.f32.mrb[38].mxu1 }
 0xc82   : > { %v6817_v30 = vpop.f32.mrb[39].mxu1  ;;  %v1928_v48 = vsel %vm750_vm2, %v1920_v11, -inf }
 0xc87   : > { %v1912_v31 = vpop.f32.mrb[44].mxu0 }
 0xc88   : > { %v6822_v32 = vpop.f32.mrb[45].mxu0  ;;  %v1921_v47 = vmul.f32 0.35355338, %v1912_v31 }
 0xc89   : > { %v1915_v34 = vpop.f32.mrb[46].mxu0 }
 0xc8a   : > { %v6823_v35 = vpop.f32.mrb[47].mxu0  ;;  %v1931_v5 = vsel %vm750_vm2, %v1921_v47, -inf }
 0xc95   : > { %2017 = vrot.lane.b32.xlu0 %v7992_v59, %s8953_s25 }
 0xd0c   : > { %v1927_v36 = vpop.xlane.xlu0 %1926 }
 0xd0d   : > { %v1935_v38 = vsub.f32 %v1919_v21, %v1927_v36  ;;  %v6285_v21 = vld [vmem:[%s8948_s4 + $0x14] sm:$0xf] }
 0xd0e   : > { %v2070_v25 = vsel %vm1003_vm3, %v6285_v21, 0 }
 0xd0f   : > { %v1940_v22 = vmul.f32 1.442695, %v1935_v38 }
 0xd10   : > { %v2018_v39 = vpop.permute.xlu0 %2017 }
 0xd11   : > { %7410 = vpow2.f32 %v1940_v22  ;;  %v2023_v40 = vsel %vm1003_vm3, %v2018_v39, 0 }
 0xd12   : > { %6831 = vmatpush3.bf16.msra.mxu0 %v2023_v40 }
 0xd13   : > { %6842 = vmatprep.subr.bf16.mxu0 %v7570_v1 }
 0xd1b   : > { %v7411_v41 = vpop.eup %7410 }
 0xd1c   : > { %v1949_v44 = vsel %vm750_vm2, %v7411_v41, 0.0 }
 0xd1d   : > { %1950 = vadd.xlane.f32.xlu1 %v1949_v44 }
 0xd21   : > { %1923 = vmax.xlane.f32.xlu1 %v1922_v46 }
 0xd25   : > { %1929 = vmax.xlane.f32.xlu1 %v1928_v48 }
 0xd29   : > { %1932 = vmax.xlane.f32.xlu1 %v1931_v5 }
 0xdaa   : > { %v1951_v49 = vpop.xlane.xlu1 %1950 }
 0xdab   : > { %7412 = vrcp.f32 %v1951_v49 }
 0xdae   : > { %v1924_v50 = vpop.xlane.xlu1 %1923 }
 0xdaf   : > { %v1934_v51 = vsub.f32 %v1918_v43, %v1924_v50  ;;  %v6284_v43 = vld [vmem:[%s8948_s4 + $0x10] sm:$0xf] }
 0xdb0   : > { %v2116_v44 = vsel %vm1003_vm3, %v6284_v43, 0  ;;  %v7361_v43 = vld [vmem:[%s8886_s6 + $0x28] sm:$0xff]  }
 0xdb1   : > { %v1938_v52 = vmul.f32 1.442695, %v1934_v51 }
 0xdb2   : > { %v1930_v55 = vpop.xlane.xlu1 %1929 }
 0xdb3   : > { %7414 = vpow2.f32 %v1938_v52  ;;  %v1936_v56 = vsub.f32 %v1920_v11, %v1930_v55  ;;  %v6286_v11 = vld [vmem:[%s8948_s4 + $0x18] sm:$0xf] }
 0xdb4   : > { %v2212_v5 = vsel %vm1003_vm3, %v6286_v11, 0 }
 0xdb5   : > { %v7413_v57 = vpop.eup %7412  ;;  %v1942_v58 = vmul.f32 1.442695, %v1936_v56 }
 0xdb6   : > { %v1933_v60 = vpop.xlane.xlu1 %1932  ;;  %v1963_v61 = vmul.f32 %v7413_v57, %v7411_v41  ;;  %v6287_v57 = vld [vmem:[%s8948_s4 + $0x1c] sm:$0xf] }
 0xdb7   : > { %7416 = vpow2.f32 %v1942_v58  ;;  %v1937_v62 = vsub.f32 %v1921_v47, %v1933_v60 }
 0xdb8   : > { %v2016_v63 = vpack.c.bf16 %v1963_v61, %v1963_v61 }
 0xdb9   : > { %v1944_v2 = vmul.f32 1.442695, %v1937_v62  ;;  %v2309_v62 = vsel %vm1003_vm3, %v6287_v57, 0  ;;  %v7357_v57 = vld [vmem:[%s8888_s8 + $0x8] sm:$0xff]  }
 0xdba   : > { %6833 = vmatmul.mubr.msk.bf16.vlgmr.msra.gmra.mrb[48].mxu0 %vm750_vm2, %v2016_v63 }
 0xdbb   : > { %7418 = vpow2.f32 %v1944_v2  ;;  %6844 = vmatprep.mubr.msk.bf16.mxu0 %vm7571_vm0, %v7570_v1  ;;  %6843 = vmatpush3.bf16.msra.mxu0 %v2116_v44 }
 0xdbc   : > { %6854 = vmatprep.subr.bf16.mxu0 %v7570_v1 }
 0xdbd   : > { %v7415_v3 = vpop.eup %7414 }
 0xdbe   : > { %v1946_v4 = vsel %vm750_vm2, %v7415_v3, 0.0 }
 0xdbf   : > { %1947 = vadd.xlane.f32.xlu1 %v1946_v4 }
 0xdc1   : > { %v7417_v6 = vpop.eup %7416 }
 0xdc2   : > { %v1952_v12 = vsel %vm750_vm2, %v7417_v6, 0.0 }
 0xdc3   : > { %1953 = vadd.xlane.f32.xlu1 %v1952_v12 }
 0xdc5   : > { %v7419_v13 = vpop.eup %7418 }
 0xdc6   : > { %v1955_v14 = vsel %vm750_vm2, %v7419_v13, 0.0 }
 0xdc7   : > { %1956 = vadd.xlane.f32.xlu0 %v1955_v14 }
 0xdd4   : > { %1967 = vrot.lane.b32.xlu1 %v7992_v59, %s8954_s23 }
 0xdd8   : > { %2159 = vrot.lane.b32.xlu1 %v7992_v59, %s8955_s2 }
 0xddc   : > { %2256 = vrot.lane.b32.xlu1 %v7992_v59, %s8956_s20 }
 0xe4c   : > { %v1948_v15 = vpop.xlane.xlu1 %1947 }
 0xe4d   : > { %7420 = vrcp.f32 %v1948_v15 }
 0xe50   : > { %v1954_v17 = vpop.xlane.xlu1 %1953 }
 0xe51   : > { %7422 = vrcp.f32 %v1954_v17 }
 0xe54   : > { %v1968_v18 = vpop.permute.xlu1 %1967  ;;  %v1957_v59 = vpop.xlane.xlu0 %1956 }
 0xe55   : > { %v1973_v19 = vsel %vm1003_vm3, %v1968_v18, 0  ;;  %7424 = vrcp.f32 %v1957_v59  ;;  %v2355_v59 = vrot.slane %v7985_v45, %v7889_v33 }
 0xe56   : > { %6825 = vmatpush3.bf16.msra.mxu1 %v1973_v19 }
 0xe57   : > { %v7421_v20 = vpop.eup %7420  ;;  %6836 = vmatprep.subr.bf16.mxu1 %v7570_v1 }
 0xe58   : > { %v1962_v23 = vmul.f32 %v7421_v20, %v7415_v3  ;;  %v2160_v26 = vpop.permute.xlu1 %2159 }
 0xe59   : > { %v2165_v32 = vsel %vm1003_vm3, %v2160_v26, 0 }
 0xe5a   : > { %v1966_v24 = vpack.c.bf16 %v1962_v23, %v1962_v23 }
 0xe5b   : > { %v7423_v30 = vpop.eup %7422 }
 0xe5c   : > { %6827 = vmatmul.mubr.msk.bf16.vlgmr.msra.gmra.mrb[40].mxu1 %vm750_vm2, %v1966_v24  ;;  %v1964_v35 = vmul.f32 %v7423_v30, %v7417_v6  ;;  %v2257_v36 = vpop.permute.xlu1 %2256 }
 0xe5d   : > { %6837 = vmatpush3.bf16.msra.mxu1 %v2070_v25  ;;  %6838 = vmatprep.mubr.msk.bf16.mxu1 %vm7571_vm0, %v7570_v1  ;;  %v2262_v39 = vsel %vm1003_vm3, %v2257_v36, 0 }
 0xe5e   : > { %6848 = vmatprep.subr.bf16.mxu1 %v7570_v1  ;;  %v2158_v38 = vpack.c.bf16 %v1964_v35, %v1964_v35 }
 0xe5f   : > { %v7425_v22 = vpop.eup %7424 }
 0xe60   : > { %v1965_v40 = vmul.f32 %v7425_v22, %v7419_v13 }
 0xe62   : > { %v2255_v41 = vpack.c.bf16 %v1965_v40, %v1965_v40  ;;  %v7354_v40 = vld [vmem:[%s8949_s5 + $0x10] sm:$0xff]  }
 0xe8d   : > { %v2059_v27 = vpop.f32.mrb[48].mxu0 }
 0xe8e   : > { %v2065_v28 = vpack.c.bf16 %v2059_v27, %v2059_v27  ;;  %v6834_v29 = vpop.f32.mrb[49].mxu0 }
 0xe8f   : > { %v2062_v31 = vpop.f32.mrb[50].mxu0 }
 0xe90   : > { %v6835_v34 = vpop.f32.mrb[51].mxu0  ;;  %6839 = vmatmul.mubr.msk.bf16.vlgmr.msra.gmra.mrb[44].mxu1 %vm750_vm2, %v2065_v28 }
 0xe91   : > { %6849 = vmatpush3.bf16.msra.mxu1 %v2165_v32  ;;  %6850 = vmatprep.mubr.msk.bf16.mxu1 %vm7571_vm0, %v7570_v1 }
 0xe92   : > { %6860 = vmatprep.subr.bf16.mxu1 %v7570_v1 }
 0xe98   : > { %6851 = vmatmul.mubr.msk.bf16.vlgmr.msra.gmra.mrb[48].mxu1 %vm750_vm2, %v2158_v38 }
 0xe99   : > { %6861 = vmatpush3.bf16.msra.mxu1 %v2262_v39  ;;  %6862 = vmatprep.mubr.msk.bf16.mxu1 %vm7571_vm0, %v7570_v1 }
 0xe9a   : > { %6872 = vmatprep.subr.bf16.mxu1 %v7570_v1 }
 0xea0   : > { %6863 = vmatmul.mubr.msk.bf16.vlgmr.msra.gmra.mrb[52].mxu1 %vm750_vm2, %v2255_v41  ;;  %v7355_v41 = vld [vmem:[%s8949_s5 + $0x18] sm:$0xff]   ;;  %s8961_s5 = sld [smem:[#allocation18_spill]] }
 0xea1   : > { %6876 = vmatprep.mubr.msk.bf16.mxu1 %vm7571_vm0, %v7570_v1  ;;  %6873 = vmatpush3.bf16.msra.mxu1 %v7354_v40 }
 0xea2   : > { %6874 = vmatprep.subr.bf16.mxu1 %v7570_v1 }
 0xea5   : > { %6875 = vmatpush3.bf16.msra.mxu1 %v7355_v41 }
 0xea6   : > { %6892 = vmatprep.subr.bf16.mxu1 %v7570_v1 }
 0xf2f   : > { %v2009_v46 = vpop.f32.mrb[40].mxu1 }
 0xf30   : > { %v2015_v47 = vpack.c.bf16 %v2009_v46, %v2009_v46  ;;  %v6828_v48 = vpop.f32.mrb[41].mxu1 }
 0xf31   : > { %v2012_v49 = vpop.f32.mrb[42].mxu1 }
 0xf32   : > { %v6829_v50 = vpop.f32.mrb[43].mxu1  ;;  %6845 = vmatmul.mubr.msk.bf16.vlgmr.msra.gmra.mrb[52].mxu0 %vm750_vm2, %v2015_v47  ;;  %v2374_v47 = vrot.slane %v7985_v45, %v7913_v53  ;;  %v2379_v49 = vrot.slane %v7985_v45, %v7916_v54 }
 0xf33   : > { %6855 = vmatpush3.bf16.msra.mxu0 %v2212_v5  ;;  %6856 = vmatprep.mubr.msk.bf16.mxu0 %vm7571_vm0, %v7570_v1 }
 0xf34   : > { %6866 = vmatprep.subr.bf16.mxu0 %v7570_v1 }
 0xf63   : > { %v2106_v51 = vpop.f32.mrb[44].mxu1 }
 0xf64   : > { %v6840_v52 = vpop.f32.mrb[45].mxu1 }
 0xf65   : > { %v2109_v55 = vpop.f32.mrb[46].mxu1  ;;  %v7356_v52 = vld [vmem:[%s8888_s8] sm:$0xff]  }
 0xf66   : > { %v6841_v56 = vpop.f32.mrb[47].mxu1 }
 0xf67   : > { %v8129_v56 = vld [vmem:[%s614_s21] sm:$0xff]  ;;  %s604_s21 = sand.u32 1, %s7560_s30  }
 0xf68   : > { %s6244_s29 = sshll.u32 %s604_s21, 3 }
 0xf69   : > { %s606_s3 = scalar_lea.vmem [#allocation2], %s6244_s29 }
 0xf6b   : > { %v2201_v58 = vpop.f32.mrb[48].mxu1 }
 0xf6c   : > { %v2207_v60 = vpack.c.bf16 %v2201_v58, %v2201_v58  ;;  %v6852_v61 = vpop.f32.mrb[49].mxu1  ;;  %v2572_v58 = vpack.c.bf16 %v8129_v56, %v8129_v56 }
 0xf6d   : > { %v2204_v63 = vpop.f32.mrb[50].mxu1  ;;  %v7359_v61 = vld [vmem:[%s8889_s9 + $0x8] sm:$0xff]  }
 0xf6e   : > { %v6853_v2 = vpop.f32.mrb[51].mxu1  ;;  %6857 = vmatmul.mubr.msk.bf16.vlgmr.msra.gmra.mrb[56].mxu0 %vm750_vm2, %v2207_v60  ;;  %v7358_v60 = vld [vmem:[%s8889_s9] sm:$0xff]   ;;  %v7363_v63 = vld [vmem:[%s8886_s6 + $0x38] sm:$0xff]  }
 0xf6f   : > { %6867 = vmatpush3.bf16.msra.mxu0 %v2309_v62  ;;  %6868 = vmatprep.mubr.msk.bf16.mxu0 %vm7571_vm0, %v7570_v1  ;;  %v7362_v62 = vld [vmem:[%s8886_s6 + $0x30] sm:$0xff]   ;;  %v2399_v2 = vrot.slane %v7985_v45, %v7934_v0 }
 0xf70   : > { %6880 = vmatprep.subr.bf16.mxu0 %v7570_v1 }
 0xf73   : > { %v2298_v3 = vpop.f32.mrb[52].mxu1 }
 0xf74   : > { %v2304_v4 = vpack.c.bf16 %v2298_v3, %v2298_v3  ;;  %v6864_v6 = vpop.f32.mrb[53].mxu1 }
 0xf75   : > { %v2301_v12 = vpop.f32.mrb[54].mxu1 }
 0xf76   : > { %v6865_v13 = vpop.f32.mrb[55].mxu1  ;;  %6869 = vmatmul.mubr.msk.bf16.vlgmr.msra.gmra.mrb[60].mxu0 %vm750_vm2, %v2304_v4 }
 0xf77   : > { %6888 = vmatprep.mubr.msk.bf16.mxu0 %vm7571_vm0, %v7570_v1  ;;  %v8167_v13 = vld [vmem:[%s8896_s16] sm:$0xff] }
0x1005   : > { %v2152_v14 = vpop.f32.mrb[52].mxu0 }
0x1006   : > { %v2153_v15 = vadd.f32 %v2152_v14, %v2106_v51  ;;  %v6846_v17 = vpop.f32.mrb[53].mxu0 }
0x1007   : > { %v2155_v18 = vpop.f32.mrb[54].mxu0 }
0x1008   : > { %v6847_v19 = vpop.f32.mrb[55].mxu0  ;;  %v2576_v18 = vrot.slane %v8167_v13, %v7777_v10 }
0x1041   : > { %v2248_v20 = vpop.f32.mrb[56].mxu0 }
0x1042   : > { %v2254_v21 = vadd.f32 %v2248_v20, %v2153_v15  ;;  %v6858_v23 = vpop.f32.mrb[57].mxu0 }
0x1043   : > { %v2251_v24 = vpop.f32.mrb[58].mxu0 }
0x1044   : > { %v6859_v25 = vpop.f32.mrb[59].mxu0 }
0x1049   : > { %v2345_v26 = vpop.f32.mrb[60].mxu0 }
0x104a   : > { %v2351_v27 = vadd.f32 %v2345_v26, %v2254_v21  ;;  %v6870_v28 = vpop.f32.mrb[61].mxu0 }
0x104b   : > { %v2348_v29 = vpop.f32.mrb[62].mxu0 }
0x104c   : > { %v2356_v30 = vadd.f32 %v2355_v59, %v2351_v27  ;;  %v6871_v31 = vpop.f32.mrb[63].mxu0  ;;  %v2635_v59 = vrot.slane %v8167_v13, %v7774_v9 }
0x104e   : > { %v2357_v32 = vadd.f32 %v2356_v30, %v7964_v42  ;;  %v7360_v42 = vld [vmem:[%s8886_s6 + $0x20] sm:$0xff]  }
0x104f   : > { %6881 = vmatpush3.bf16.msra.mxu0 %v7360_v42 }
0x1050   : > { %v2358_v34 = vsel %vm648_vm1, %v2357_v32, 0.0  ;;  %6882 = vmatprep.subr.bf16.mxu0 %v7570_v1 }
0x1051   : > { %2359 = vadd.xlane.f32.xlu1 %v2358_v34 }
0x1053   : > { %6883 = vmatpush3.bf16.msra.mxu0 %v7361_v43 }
0x1054   : > { %6884 = vmatprep.subr.bf16.mxu0 %v7570_v1 }
0x1057   : > { %6885 = vmatpush3.bf16.msra.mxu0 %v7362_v62 }
0x1058   : > { %6886 = vmatprep.subr.bf16.mxu0 %v7570_v1 }
0x105b   : > { %6887 = vmatpush3.bf16.msra.mxu0 %v7363_v63 }
0x105c   : > { %6908 = vmatprep.subr.bf16.mxu0 %v7570_v1 }
0x10de   : > { %v2360_v35 = vpop.xlane.xlu1 %2359 }
0x10df   : > { %v2361_v36 = vmul.f32 0.03125, %v2360_v35 }
0x10e1   : > { %v2362_v38 = vsub.f32 %v2357_v32, %v2361_v36 }
0x10e3   : > { %v2363_v22 = vmul.f32 %v2362_v38, %v2362_v38 }
0x10e5   : > { %v2364_v39 = vsel %vm648_vm1, %v2363_v22, 0.0 }
0x10e6   : > { %2365 = vadd.xlane.f32.xlu0 %v2364_v39 }
0x1173   : > { %v2366_v44 = vpop.xlane.xlu0 %2365 }
0x1174   : > { %v2367_v11 = vmul.f32 0.03125, %v2366_v44 }
0x1176   : > { %v2368_v46 = vadd.f32 1e-05, %v2367_v11 }
0x1178   : > { %7426 = vrsqrt.f32 %v2368_v46 }
0x1182   : > { %v7427_v48 = vpop.eup %7426 }
0x1183   : > { %v2370_v5 = vmul.f32 %v7427_v48, %v2362_v38 }
0x1185   : > { %v2375_v50 = vmul.f32 %v2374_v47, %v2370_v5 }
0x1187   : > { %v8116_v51 = vadd.f32 %v2379_v49, %v2375_v50  ;;  %v2556_v50 = vand.u32 127, %v632_v7 }
0x1189   : > { %v2395_v55 = vpack.c.bf16 %v8116_v51, %v8116_v51  ;;  %vm8212_vm5 = vcmp.le.s32.totalorder %v2556_v50, %v7771_v8 }
0x118b   : > { %6877 = vmatmul.mubr.msk.bf16.vlgmr.msra.gmra.mrb[56].mxu1 %vm648_vm1, %v2395_v55 }
0x118c   : > { %6893 = vmatpush3.bf16.msra.mxu1 %v7356_v52  ;;  %6896 = vmatprep.mubr.msk.bf16.mxu1 %vm7571_vm0, %v7570_v1 }
0x118d   : > { %6894 = vmatprep.subr.bf16.mxu1 %v7570_v1 }
0x1190   : > { %6895 = vmatpush3.bf16.msra.mxu1 %v7357_v57 }
0x1191   : > { %6900 = vmatprep.subr.bf16.mxu1 %v7570_v1 }
0x1193   : > { %6897 = vmatmul.mubr.msk.bf16.vlgmr.msra.gmra.mrb[60].mxu1 %vm648_vm1, %v2572_v58 }
0x1194   : > { %6901 = vmatpush3.bf16.msra.mxu1 %v7358_v60  ;;  %6904 = vmatprep.mubr.msk.bf16.mxu1 %vm7571_vm0, %v7570_v1 }
0x1195   : > { %6902 = vmatprep.subr.bf16.mxu1 %v7570_v1 }
0x1198   : > { %6903 = vmatpush3.bf16.msra.mxu1 %v7359_v61 }
0x1199   : > { %6914 = vmatprep.subr.bf16.mxu1 %v7570_v1 }
0x119b   : > { %6905 = vmatmul.mubr.msk.bf16.vlgmr.msra.gmra.mrb[64].mxu1 %vm648_vm1, %v2572_v58 }
0x119c   : > { %6916 = vmatprep.mubr.msk.bf16.mxu1 %vm7571_vm0, %v7570_v1 }
0x125e   : > { %v2449_v3 = vpop.f32.mrb[56].mxu1 }
0x125f   : > { %v2450_v4 = vadd.f32 %v2449_v3, %v2399_v2  ;;  %v6878_v6 = vpop.f32.mrb[57].mxu1 }
0x1260   : > { %v2452_v12 = vpop.f32.mrb[58].mxu1 }
0x1261   : > { %v2455_v14 = vmax.f32 %v2450_v4, 0.0  ;;  %v6879_v15 = vpop.f32.mrb[59].mxu1 }
0x1263   : > { %v2456_v17 = vpack.c.bf16 %v2455_v14, %v2455_v14 }
0x1265   : > { %6889 = vmatmul.mubr.msk.bf16.vlgmr.msra.gmra.mrb[64].mxu0 %vm1516_vm4, %v2456_v17 }
0x1266   : > { %v2626_v19 = vpop.f32.mrb[60].mxu1  ;;  %6910 = vmatprep.mubr.msk.bf16.mxu0 %vm7571_vm0, %v7570_v1 }
0x1267   : > { %v2627_v20 = vadd.f32 %v2626_v19, %v2576_v18  ;;  %v6898_v21 = vpop.f32.mrb[61].mxu1 }
0x1268   : > { %v2629_v23 = vpop.f32.mrb[62].mxu1 }
0x1269   : > { %v2688_v24 = vpack.c.bf16 %v2627_v20, %v2627_v20  ;;  %v6899_v25 = vpop.f32.mrb[63].mxu1 }
0x126b   : > { %2788 = vrot.lane.b32.xlu1 %v2688_v24, %s8951_s27 }
0x126e   : > { %v2682_v26 = vpop.f32.mrb[64].mxu1 }
0x126f   : > { %v2683_v27 = vadd.f32 %v2682_v26, %v2635_v59  ;;  %v6906_v28 = vpop.f32.mrb[65].mxu1 }
0x1270   : > { %v2685_v29 = vpop.f32.mrb[66].mxu1 }
0x1271   : > { %v8177_v30 = vpack.c.bf16 %v2683_v27, %v2683_v27  ;;  %v6907_v31 = vpop.f32.mrb[67].mxu1 }
0x1273   : > { %2740 = vrot.lane.b32.xlu0 %v8177_v30, %s8950_s0  ;;  %v2694_v32 = vsel %vm750_vm2, %v8177_v30, 0 }
0x1274   : > { %6909 = vmatpush3.bf16.xpose.msra.mxu0 %v2694_v32 }
0x1275   : > { %6920 = vmatprep.subr.bf16.mxu0 %v7570_v1 }
0x1277   : > { %2737 = vrot.lane.b32.xlu0 %v2688_v24, %s8950_s0 }
0x127b   : > { %2790 = vrot.lane.b32.xlu0 %v8177_v30, %s8951_s27  ;;  %6911 = vmatmul.mubr.msk.bf16.vlgmr.msra.gmra.mrb[68].mxu0 %vm750_vm2, %v2688_v24 }
0x127c   : > { %6922 = vmatprep.mubr.msk.bf16.mxu0 %vm7571_vm0, %v7570_v1 }
0x127f   : > { %2840 = vrot.lane.b32.xlu0 %v8177_v30, %s8952_s28 }
0x1283   : > { %2838 = vrot.lane.b32.xlu0 %v2688_v24, %s8952_s28 }
0x12dd   : > { %v2789_v41 = vpop.permute.xlu1 %2788 }
0x12e5   : > { %v2741_v34 = vpop.permute.xlu0 %2740 }
0x12e6   : > { %v2746_v35 = vsel %vm750_vm2, %v2741_v34, 0 }
0x12e7   : > { %6915 = vmatpush3.bf16.xpose.msra.mxu1 %v2746_v35 }
0x12e8   : > { %6926 = vmatprep.subr.bf16.mxu1 %v7570_v1 }
0x12e9   : > { %v2738_v36 = vpop.permute.xlu0 %2737 }
0x12ed   : > { %v2791_v38 = vpop.permute.xlu0 %2790 }
0x12ee   : > { %v2796_v22 = vsel %vm750_vm2, %v2791_v38, 0  ;;  %6917 = vmatmul.mubr.msk.bf16.vlgmr.msra.gmra.mrb[68].mxu1 %vm750_vm2, %v2738_v36 }
0x12ef   : > { %6921 = vmatpush3.bf16.xpose.msra.mxu0 %v2796_v22  ;;  %6928 = vmatprep.mubr.msk.bf16.mxu1 %vm7571_vm0, %v7570_v1 }
0x12f0   : > { %6932 = vmatprep.subr.bf16.mxu0 %v7570_v1 }
0x12f1   : > { %v2841_v39 = vpop.permute.xlu0 %2840 }
0x12f2   : > { %v2846_v40 = vsel %vm750_vm2, %v2841_v39, 0 }
0x12f3   : > { %6927 = vmatpush3.bf16.xpose.msra.mxu1 %v2846_v40 }
0x12f4   : > { %6938 = vmatprep.subr.bf16.mxu1 %v7570_v1 }
0x12f5   : > { %v2839_v42 = vpop.permute.xlu0 %2838 }
0x12f6   : > { %6923 = vmatmul.mubr.msk.bf16.vlgmr.msra.gmra.mrb[72].mxu0 %vm750_vm2, %v2789_v41 }
0x12f7   : > { %6934 = vmatprep.mubr.msk.bf16.mxu0 %vm7571_vm0, %v7570_v1 }
0x12fa   : > { %6929 = vmatmul.mubr.msk.bf16.vlgmr.msra.gmra.mrb[72].mxu1 %vm750_vm2, %v2839_v42 }
0x12fb   : > { %6940 = vmatprep.mubr.msk.bf16.mxu1 %vm7571_vm0, %v7570_v1 }
0x1338   : > { %v8208_v43 = vpop.f32.mrb[64].mxu0 }
0x1339   : > { %v6890_v44 = vpop.f32.mrb[65].mxu0 }
0x133a   : > { %v2525_v11 = vpop.f32.mrb[66].mxu0 }
0x133b   : > { %v6891_v46 = vpop.f32.mrb[67].mxu0 }
0x134e   : > { %v2730_v47 = vpop.f32.mrb[68].mxu0 }
0x134f   : > { %v6912_v48 = vpop.f32.mrb[69].mxu0  ;;  %v2888_v21 = vmul.f32 0.35355338, %v2730_v47 }
0x1350   : > { %v2733_v5 = vpop.f32.mrb[70].mxu0 }
0x1351   : > { %v6913_v49 = vpop.f32.mrb[71].mxu0  ;;  %v2894_v59 = vsel %vm8212_vm5, %v2888_v21, -1e+30 }
0x1352   : > { %v2898_v26 = vsel %vm750_vm2, %v2894_v59, -inf }
0x13c1   : > { %v2782_v52 = vpop.f32.mrb[68].mxu1 }
0x13c2   : > { %v2889_v55 = vmul.f32 0.35355338, %v2782_v52  ;;  %v6918_v57 = vpop.f32.mrb[69].mxu1 }
0x13c3   : > { %v2785_v58 = vpop.f32.mrb[70].mxu1 }
0x13c4   : > { %v6919_v61 = vpop.f32.mrb[71].mxu1  ;;  %v2895_v62 = vsel %vm8212_vm5, %v2889_v55, -1e+30 }
0x13c5   : > { %v2901_v63 = vsel %vm750_vm2, %v2895_v62, -inf  ;;  %v2460_v61 = vrot.slane %v7985_v45, %v7942_v16 }
0x13c6   : > { %2902 = vmax.xlane.f32.xlu0 %v2901_v63 }
0x13c9   : > { %v2832_v2 = vpop.f32.mrb[72].mxu0 }
0x13ca   : > { %v6924_v3 = vpop.f32.mrb[73].mxu0  ;;  %v2890_v25 = vmul.f32 0.35355338, %v2832_v2 }
0x13cb   : > { %v2835_v4 = vpop.f32.mrb[74].mxu0 }
0x13cc   : > { %v6925_v7 = vpop.f32.mrb[75].mxu0  ;;  %v2896_v28 = vsel %vm8212_vm5, %v2890_v25, -1e+30 }
0x13cd   : > { %v2882_v6 = vpop.f32.mrb[72].mxu1  ;;  %v2904_v29 = vsel %vm750_vm2, %v2896_v28, -inf  ;;  %v2569_v7 = vld [vmem:[%s8890_s10 + $0x4] sm:$0xf] }
0x13ce   : > { %v6930_v12 = vpop.f32.mrb[73].mxu1  ;;  %v2891_v27 = vmul.f32 0.35355338, %v2882_v6 }
0x13cf   : > { %v2885_v14 = vpop.f32.mrb[74].mxu1 }
0x13d0   : > { %v6931_v15 = vpop.f32.mrb[75].mxu1  ;;  %v2897_v31 = vsel %vm8212_vm5, %v2891_v27, -1e+30 }
0x13d1   : > { %v2907_v32 = vsel %vm750_vm2, %v2897_v31, -inf }
0x13dc   : > { %2993 = vrot.lane.b32.xlu0 %v8177_v30, %s8953_s25 }
0x1453   : > { %v2903_v8 = vpop.xlane.xlu0 %2902 }
0x1454   : > { %v2911_v17 = vsub.f32 %v2895_v62, %v2903_v8  ;;  %v2523_v62 = vadd.f32 %v8208_v43, %v2460_v61 }
0x1456   : > { %v2916_v18 = vmul.f32 1.442695, %v2911_v17  ;;  %v2528_v63 = vadd.f32 %v2523_v62, %v8116_v51 }
0x1457   : > { %v2994_v19 = vpop.permute.xlu0 %2993 }
0x1458   : > { %7428 = vpow2.f32 %v2916_v18  ;;  %v2999_v20 = vsel %vm1003_vm3, %v2994_v19, 0  ;;  %v2529_v2 = vsel %vm648_vm1, %v2528_v63, 0.0 }
0x1459   : > { %6939 = vmatpush3.bf16.msra.mxu1 %v2999_v20 }
0x145a   : > { %6950 = vmatprep.subr.bf16.mxu1 %v7570_v1 }
0x1462   : > { %v7429_v23 = vpop.eup %7428 }
0x1463   : > { %v2925_v24 = vsel %vm750_vm2, %v7429_v23, 0.0 }
0x1464   : > { %2926 = vadd.xlane.f32.xlu1 %v2925_v24 }
0x1468   : > { %2899 = vmax.xlane.f32.xlu1 %v2898_v26 }
0x146c   : > { %2905 = vmax.xlane.f32.xlu1 %v2904_v29 }
0x1470   : > { %2908 = vmax.xlane.f32.xlu1 %v2907_v32 }
0x1481   : > { %2943 = vrot.lane.b32.xlu1 %v8177_v30, %s8954_s23 }
0x14f1   : > { %v2927_v34 = vpop.xlane.xlu1 %2926 }
0x14f2   : > { %7430 = vrcp.f32 %v2927_v34 }
0x14f5   : > { %v2900_v35 = vpop.xlane.xlu1 %2899 }
0x14f6   : > { %v2910_v36 = vsub.f32 %v2894_v59, %v2900_v35 }
0x14f8   : > { %v2914_v38 = vmul.f32 1.442695, %v2910_v36  ;;  %v2568_v36 = vld [vmem:[%s8890_s10] sm:$0xf] }
0x14f9   : > { %v2906_v22 = vpop.xlane.xlu1 %2905 }
0x14fa   : > { %7432 = vpow2.f32 %v2914_v38  ;;  %v2912_v39 = vsub.f32 %v2896_v28, %v2906_v22  ;;  %v3092_v38 = vsel %vm1003_vm3, %v2568_v36, 0  ;;  %v2570_v22 = vld [vmem:[%s8890_s10 + $0x8] sm:$0xf] }
0x14fc   : > { %v7431_v40 = vpop.eup %7430  ;;  %v2918_v41 = vmul.f32 1.442695, %v2912_v39 }
0x14fd   : > { %v2939_v42 = vmul.f32 %v7431_v40, %v7429_v23  ;;  %v2909_v44 = vpop.xlane.xlu1 %2908 }
0x14fe   : > { %7434 = vpow2.f32 %v2918_v41  ;;  %v2913_v11 = vsub.f32 %v2897_v31, %v2909_v44 }
0x14ff   : > { %v2992_v46 = vpack.c.bf16 %v2939_v42, %v2939_v42  ;;  %v3188_v42 = vsel %vm1003_vm3, %v2570_v22, 0 }
0x1500   : > { %v2920_v47 = vmul.f32 1.442695, %v2913_v11 }
0x1501   : > { %6941 = vmatmul.mubr.msk.bf16.vlgmr.msra.gmra.mrb[76].mxu1 %vm750_vm2, %v2992_v46  ;;  %v2944_v48 = vpop.permute.xlu1 %2943 }
0x1502   : > { %7436 = vpow2.f32 %v2920_v47  ;;  %v2949_v5 = vsel %vm1003_vm3, %v2944_v48, 0  ;;  %6952 = vmatprep.mubr.msk.bf16.mxu1 %vm7571_vm0, %v7570_v1  ;;  %6951 = vmatpush3.bf16.msra.mxu1 %v3092_v38 }
0x1503   : > { %6933 = vmatpush3.bf16.msra.mxu0 %v2949_v5  ;;  %6962 = vmatprep.subr.bf16.mxu1 %v7570_v1 }
0x1504   : > { %v7433_v49 = vpop.eup %7432  ;;  %6944 = vmatprep.subr.bf16.mxu0 %v7570_v1 }
0x1505   : > { %v2922_v50 = vsel %vm750_vm2, %v7433_v49, 0.0 }
0x1506   : > { %2923 = vadd.xlane.f32.xlu0 %v2922_v50 }
0x1508   : > { %v7435_v52 = vpop.eup %7434 }
0x1509   : > { %v2928_v55 = vsel %vm750_vm2, %v7435_v52, 0.0 }
0x150a   : > { %2929 = vadd.xlane.f32.xlu1 %v2928_v55  ;;  %v2571_v55 = vld [vmem:[%s8890_s10 + $0xc] sm:$0xf] }
0x150b   : > { %v3285_v62 = vsel %vm1003_vm3, %v2571_v55, 0  ;;  %v7367_v55 = vld [vmem:[%s8891_s11 + $0x8] sm:$0xff]  }
0x150c   : > { %v7437_v57 = vpop.eup %7436 }
0x150d   : > { %v2931_v58 = vsel %vm750_vm2, %v7437_v57, 0.0 }
0x150e   : > { %2932 = vadd.xlane.f32.xlu1 %v2931_v58 }
0x151c   : > { %3232 = vrot.lane.b32.xlu0 %v8177_v30, %s8956_s20 }
0x151f   : > { %3135 = vrot.lane.b32.xlu1 %v8177_v30, %s8955_s2  ;;  %v3046_v30 = vsel %vm1003_vm3, %v2569_v7, 0  ;;  %v2545_v7 = vrot.slane %v7985_v45, %v7957_v37  ;;  %v7365_v45 = vld [vmem:[%s8892_s12 + $0x8] sm:$0xff]  }
0x1543   : > { %2530 = vadd.xlane.f32.xlu1 %v2529_v2 }
0x1593   : > { %v2924_v3 = vpop.xlane.xlu0 %2923 }
0x1594   : > { %7438 = vrcp.f32 %v2924_v3 }
0x1597   : > { %v2930_v51 = vpop.xlane.xlu1 %2929  ;;  %v3233_v28 = vpop.permute.xlu0 %3232 }
0x1598   : > { %7440 = vrcp.f32 %v2930_v51  ;;  %v3238_v32 = vsel %vm1003_vm3, %v3233_v28, 0 }
0x159b   : > { %v2933_v43 = vpop.xlane.xlu1 %2932 }
0x159c   : > { %7442 = vrcp.f32 %v2933_v43 }
0x159e   : > { %v7439_v4 = vpop.eup %7438 }
0x159f   : > { %v2938_v6 = vmul.f32 %v7439_v4, %v7433_v49  ;;  %v3136_v14 = vpop.permute.xlu1 %3135 }
0x15a0   : > { %v3141_v25 = vsel %vm1003_vm3, %v3136_v14, 0 }
0x15a1   : > { %v2942_v12 = vpack.c.bf16 %v2938_v6, %v2938_v6 }
0x15a2   : > { %v7441_v23 = vpop.eup %7440 }
0x15a3   : > { %6935 = vmatmul.mubr.msk.bf16.vlgmr.msra.gmra.mrb[76].mxu0 %vm750_vm2, %v2942_v12  ;;  %v2940_v27 = vmul.f32 %v7441_v23, %v7435_v52  ;;  %v7364_v12 = vld [vmem:[%s8892_s12] sm:$0xff]  }
0x15a4   : > { %6945 = vmatpush3.bf16.msra.mxu0 %v3046_v30  ;;  %6946 = vmatprep.mubr.msk.bf16.mxu0 %vm7571_vm0, %v7570_v1 }
0x15a5   : > { %6956 = vmatprep.subr.bf16.mxu0 %v7570_v1  ;;  %v3134_v29 = vpack.c.bf16 %v2940_v27, %v2940_v27 }
0x15a6   : > { %v7443_v31 = vpop.eup %7442 }
0x15a7   : > { %v2941_v34 = vmul.f32 %v7443_v31, %v7437_v57 }
0x15a9   : > { %v3231_v35 = vpack.c.bf16 %v2941_v34, %v2941_v34 }
0x15d0   : > { %v2531_v15 = vpop.xlane.xlu1 %2530 }
0x15d1   : > { %v2532_v8 = vmul.f32 0.03125, %v2531_v15  ;;  %v6326_v15 = vld [vmem:[%s8887_s7 + $0x18] ss:$0 sm:$0xff] }
0x15d3   : > { %v8260_v17 = vsub.f32 %v2528_v63, %v2532_v8 }
0x15d4   : > { %v3035_v18 = vpop.f32.mrb[76].mxu1 }
0x15d5   : > { %v3041_v19 = vpack.c.bf16 %v3035_v18, %v3035_v18  ;;  %v6942_v20 = vpop.f32.mrb[77].mxu1  ;;  %v2534_v21 = vmul.f32 %v8260_v17, %v8260_v17 }
0x15d6   : > { %v3038_v24 = vpop.f32.mrb[78].mxu1 }
0x15d7   : > { %v6943_v59 = vpop.f32.mrb[79].mxu1  ;;  %6947 = vmatmul.mubr.msk.bf16.vlgmr.msra.gmra.mrb[80].mxu0 %vm750_vm2, %v3041_v19  ;;  %v2535_v26 = vsel %vm648_vm1, %v2534_v21, 0.0 }
0x15d8   : > { %6957 = vmatpush3.bf16.msra.mxu0 %v3141_v25  ;;  %2536 = vadd.xlane.f32.xlu1 %v2535_v26 }
0x15d9   : > { %6958 = vmatprep.mubr.msk.bf16.mxu0 %vm7571_vm0, %v7570_v1  ;;  %6968 = vmatprep.subr.bf16.mxu0 %v7570_v1 }
0x15df   : > { %6959 = vmatmul.mubr.msk.bf16.vlgmr.msra.gmra.mrb[84].mxu0 %vm750_vm2, %v3134_v29  ;;  %v3331_v29 = vrot.slane %v8167_v13, %v7889_v33 }
0x15e0   : > { %6969 = vmatpush3.bf16.msra.mxu0 %v3238_v32  ;;  %6970 = vmatprep.mubr.msk.bf16.mxu0 %vm7571_vm0, %v7570_v1 }
0x15e1   : > { %6980 = vmatprep.subr.bf16.mxu0 %v7570_v1 }
0x15e7   : > { %6971 = vmatmul.mubr.msk.bf16.vlgmr.msra.gmra.mrb[88].mxu0 %vm750_vm2, %v3231_v35 }
0x15e8   : > { %6984 = vmatprep.mubr.msk.bf16.mxu0 %vm7571_vm0, %v7570_v1 }
0x1665   : > { %v2537_v46 = vpop.xlane.xlu1 %2536 }
0x1666   : > { %v2538_v47 = vmul.f32 0.03125, %v2537_v46 }
0x1668   : > { %v2539_v48 = vadd.f32 1e-05, %v2538_v47 }
0x166a   : > { %7444 = vrsqrt.f32 %v2539_v48 }
0x1674   : > { %v7445_v63 = vpop.eup %7444 }
0x1675   : > { %v2541_v4 = vmul.f32 %v7445_v63, %v8260_v17 }
0x1676   : > { %v2985_v39 = vpop.f32.mrb[76].mxu0 }
0x1677   : > { %v2991_v40 = vpack.c.bf16 %v2985_v39, %v2985_v39  ;;  %v6936_v41 = vpop.f32.mrb[77].mxu0  ;;  %v2546_v43 = vmul.f32 %v2545_v7, %v2541_v4  ;;  %v3355_v7 = vrot.slane %v8167_v13, %v7916_v54 }
0x1678   : > { %v2988_v44 = vpop.f32.mrb[78].mxu0 }
0x1679   : > { %v6937_v11 = vpop.f32.mrb[79].mxu0  ;;  %6953 = vmatmul.mubr.msk.bf16.vlgmr.msra.gmra.mrb[80].mxu1 %vm750_vm2, %v2991_v40  ;;  %v2551_v17 = vadd.f32 %v6326_v15, %v2546_v43  ;;  %v3373_v43 = vrot.slane %v8167_v13, %v7934_v0 }
0x167a   : > { %6963 = vmatpush3.bf16.msra.mxu1 %v3188_v42  ;;  %6964 = vmatprep.mubr.msk.bf16.mxu1 %vm7571_vm0, %v7570_v1 }
0x167b   : > { %6974 = vmatprep.subr.bf16.mxu1 %v7570_v1  ;;  %v8315_v18 = vpack.c.bf16 %v2551_v17, %v2551_v17 }
0x16aa   : > { %v3082_v5 = vpop.f32.mrb[80].mxu0 }
0x16ab   : > { %v6948_v49 = vpop.f32.mrb[81].mxu0 }
0x16ac   : > { %v3085_v50 = vpop.f32.mrb[82].mxu0  ;;  %v3433_v49 = vrot.slane %v8167_v13, %v7942_v16 }
0x16ad   : > { %v6949_v52 = vpop.f32.mrb[83].mxu0 }
0x16b2   : > { %v3177_v57 = vpop.f32.mrb[84].mxu0 }
0x16b3   : > { %v3183_v58 = vpack.c.bf16 %v3177_v57, %v3177_v57  ;;  %v6960_v61 = vpop.f32.mrb[85].mxu0 }
0x16b4   : > { %v3180_v2 = vpop.f32.mrb[86].mxu0 }
0x16b5   : > { %v6961_v3 = vpop.f32.mrb[87].mxu0  ;;  %6965 = vmatmul.mubr.msk.bf16.vlgmr.msra.gmra.mrb[84].mxu1 %vm750_vm2, %v3183_v58  ;;  %v3350_v2 = vrot.slane %v8167_v13, %v7913_v53 }
0x16b6   : > { %6975 = vmatpush3.bf16.msra.mxu1 %v3285_v62  ;;  %6976 = vmatprep.mubr.msk.bf16.mxu1 %vm7571_vm0, %v7570_v1 }
0x16b7   : > { %6988 = vmatprep.subr.bf16.mxu1 %v7570_v1 }
0x16ba   : > { %v3274_v6 = vpop.f32.mrb[88].mxu0 }
0x16bb   : > { %v3280_v30 = vpack.c.bf16 %v3274_v6, %v3274_v6  ;;  %v6972_v51 = vpop.f32.mrb[89].mxu0 }
0x16bc   : > { %v3277_v14 = vpop.f32.mrb[90].mxu0 }
0x16bd   : > { %v6973_v8 = vpop.f32.mrb[91].mxu0  ;;  %6977 = vmatmul.mubr.msk.bf16.vlgmr.msra.gmra.mrb[88].mxu1 %vm750_vm2, %v3280_v30 }
0x16be   : > { %6989 = vmatpush3.bf16.msra.mxu1 %v7364_v12  ;;  %6992 = vmatprep.mubr.msk.bf16.mxu1 %vm7571_vm0, %v7570_v1 }
0x16bf   : > { %6990 = vmatprep.subr.bf16.mxu1 %v7570_v1 }
0x16c2   : > { %6991 = vmatpush3.bf16.msra.mxu1 %v7365_v45 }
0x16c3   : > { %7002 = vmatprep.subr.bf16.mxu1 %v7570_v1 }
0x16c5   : > { %6993 = vmatmul.mubr.msk.bf16.vlgmr.msra.gmra.mrb[92].mxu1 %vm648_vm1, %v8315_v18 }
0x16c6   : > { %7004 = vmatprep.mubr.msk.bf16.mxu1 %vm7571_vm0, %v7570_v1 }
0x174c   : > { %v3128_v19 = vpop.f32.mrb[80].mxu1 }
0x174d   : > { %v3129_v20 = vadd.f32 %v3128_v19, %v3082_v5  ;;  %v6954_v21 = vpop.f32.mrb[81].mxu1 }
0x174e   : > { %v3131_v23 = vpop.f32.mrb[82].mxu1 }
0x174f   : > { %v6955_v24 = vpop.f32.mrb[83].mxu1 }
0x1788   : > { %v3224_v25 = vpop.f32.mrb[84].mxu1 }
0x1789   : > { %v3230_v59 = vadd.f32 %v3224_v25, %v3129_v20  ;;  %v6966_v26 = vpop.f32.mrb[85].mxu1 }
0x178a   : > { %v3227_v27 = vpop.f32.mrb[86].mxu1 }
0x178b   : > { %v6967_v28 = vpop.f32.mrb[87].mxu1 }
0x1790   : > { %v3321_v31 = vpop.f32.mrb[88].mxu1 }
0x1791   : > { %v3327_v32 = vadd.f32 %v3321_v31, %v3230_v59  ;;  %v6978_v34 = vpop.f32.mrb[89].mxu1 }
0x1792   : > { %v3324_v35 = vpop.f32.mrb[90].mxu1 }
0x1793   : > { %v3332_v36 = vadd.f32 %v3331_v29, %v3327_v32  ;;  %v6979_v38 = vpop.f32.mrb[91].mxu1 }
0x1795   : > { %v3333_v22 = vadd.f32 %v3332_v36, %v8129_v56  ;;  %v7366_v56 = vld [vmem:[%s8891_s11] sm:$0xff]  }
0x1796   : > { %6981 = vmatpush3.bf16.msra.mxu0 %v7366_v56 }
0x1797   : > { %v3334_v39 = vsel %vm648_vm1, %v3333_v22, 0.0  ;;  %6982 = vmatprep.subr.bf16.mxu0 %v7570_v1 }
0x1798   : > { %3335 = vadd.xlane.f32.xlu0 %v3334_v39  ;;  %v3483_v40 = vpop.f32.mrb[92].mxu1 }
0x1799   : > { %v6994_v41 = vpop.f32.mrb[93].mxu1  ;;  %v3484_v50 = vadd.f32 %v3483_v40, %v3433_v49 }
0x179a   : > { %v3486_v42 = vpop.f32.mrb[94].mxu1  ;;  %6983 = vmatpush3.bf16.msra.mxu0 %v7367_v55 }
0x179b   : > { %v6995_v44 = vpop.f32.mrb[95].mxu1  ;;  %v8329_v52 = vpack.c.bf16 %v3484_v50, %v3484_v50  ;;  %6996 = vmatprep.subr.bf16.mxu0 %v7570_v1 }
0x179d   : > { %v3495_v51 = vsel %vm750_vm2, %v8329_v52, 0 }
0x1825   : > { %v3336_v11 = vpop.xlane.xlu0 %3335 }
0x1826   : > { %v3337_v46 = vmul.f32 0.03125, %v3336_v11 }
0x1828   : > { %v3338_v47 = vsub.f32 %v3333_v22, %v3337_v46 }
0x182a   : > { %v3339_v48 = vmul.f32 %v3338_v47, %v3338_v47 }
0x182c   : > { %v3340_v5 = vsel %vm648_vm1, %v3339_v48, 0.0 }
0x182d   : > { %3341 = vadd.xlane.f32.xlu1 %v3340_v5 }
0x183e   : > { %3541 = vrot.lane.b32.xlu1 %v8329_v52, %s8950_s0 }
0x1842   : > { %3591 = vrot.lane.b32.xlu1 %v8329_v52, %s8951_s27 }
0x18ba   : > { %v3342_v57 = vpop.xlane.xlu1 %3341 }
0x18bb   : > { %v3343_v58 = vmul.f32 0.03125, %v3342_v57 }
0x18bd   : > { %v3344_v61 = vadd.f32 1e-05, %v3343_v58 }
0x18be   : > { %v3542_v62 = vpop.permute.xlu1 %3541 }
0x18bf   : > { %7446 = vrsqrt.f32 %v3344_v61  ;;  %v3547_v63 = vsel %vm750_vm2, %v3542_v62, 0 }
0x18c0   : > { %7003 = vmatpush3.bf16.xpose.msra.mxu1 %v3547_v63 }
0x18c1   : > { %7014 = vmatprep.subr.bf16.mxu1 %v7570_v1 }
0x18c2   : > { %v3592_v17 = vpop.permute.xlu1 %3591 }
0x18c3   : > { %v3597_v21 = vsel %vm750_vm2, %v3592_v17, 0 }
0x18c9   : > { %v7447_v3 = vpop.eup %7446 }
0x18ca   : > { %v3346_v4 = vmul.f32 %v7447_v3, %v3338_v47 }
0x18cc   : > { %v3351_v6 = vmul.f32 %v3350_v2, %v3346_v4 }
0x18ce   : > { %v8349_v12 = vadd.f32 %v3355_v7, %v3351_v6 }
0x18d0   : > { %v3369_v30 = vpack.c.bf16 %v8349_v12, %v8349_v12 }
0x18d2   : > { %6985 = vmatmul.mubr.msk.bf16.vlgmr.msra.gmra.mrb[92].mxu0 %vm648_vm1, %v3369_v30 }
0x18d3   : > { %6997 = vmatpush3.bf16.xpose.msra.mxu0 %v3495_v51  ;;  %6998 = vmatprep.mubr.msk.bf16.mxu0 %vm7571_vm0, %v7570_v1 }
0x18d4   : > { %7008 = vmatprep.subr.bf16.mxu0 %v7570_v1 }
0x19a5   : > { %v3423_v14 = vpop.f32.mrb[92].mxu0 }
0x19a6   : > { %v3424_v15 = vadd.f32 %v3423_v14, %v3373_v43  ;;  %v6986_v8 = vpop.f32.mrb[93].mxu0 }
0x19a7   : > { %v3426_v45 = vpop.f32.mrb[94].mxu0 }
0x19a8   : > { %v3489_v19 = vpack.c.bf16 %v3424_v15, %v3424_v15  ;;  %v6987_v20 = vpop.f32.mrb[95].mxu0 }
0x19aa   : > { %3589 = vrot.lane.b32.xlu1 %v3489_v19, %s8951_s27  ;;  %3538 = vrot.lane.b32.xlu0 %v3489_v19, %s8950_s0 }
0x19ab   : > { %6999 = vmatmul.mubr.msk.bf16.vlgmr.msra.gmra.mrb[96].mxu0 %vm750_vm2, %v3489_v19 }
0x19ac   : > { %7009 = vmatpush3.bf16.xpose.msra.mxu0 %v3597_v21  ;;  %7010 = vmatprep.mubr.msk.bf16.mxu0 %vm7571_vm0, %v7570_v1 }
0x19ad   : > { %7020 = vmatprep.subr.bf16.mxu0 %v7570_v1 }
0x19ae   : > { %3641 = vrot.lane.b32.xlu1 %v8329_v52, %s8952_s28 }
0x19b2   : > { %3639 = vrot.lane.b32.xlu1 %v3489_v19, %s8952_s28 }
0x1a1c   : > { %v3590_v23 = vpop.permute.xlu1 %3589  ;;  %v3539_v24 = vpop.permute.xlu0 %3538 }
0x1a1d   : > { %7005 = vmatmul.mubr.msk.bf16.vlgmr.msra.gmra.mrb[96].mxu1 %vm750_vm2, %v3539_v24  ;;  %7011 = vmatmul.mubr.msk.bf16.vlgmr.msra.gmra.mrb[100].mxu0 %vm750_vm2, %v3590_v23 }
0x1a1e   : > { %7016 = vmatprep.mubr.msk.bf16.mxu1 %vm7571_vm0, %v7570_v1  ;;  %7022 = vmatprep.mubr.msk.bf16.mxu0 %vm7571_vm0, %v7570_v1 }
0x1a20   : > { %v3642_v25 = vpop.permute.xlu1 %3641 }
0x1a21   : > { %v3647_v59 = vsel %vm750_vm2, %v3642_v25, 0 }
0x1a22   : > { %7015 = vmatpush3.bf16.xpose.msra.mxu1 %v3647_v59 }
0x1a23   : > { %7026 = vmatprep.subr.bf16.mxu1 %v7570_v1 }
0x1a24   : > { %v3640_v26 = vpop.permute.xlu1 %3639 }
0x1a29   : > { %7017 = vmatmul.mubr.msk.bf16.vlgmr.msra.gmra.mrb[100].mxu1 %vm750_vm2, %v3640_v26 }
0x1a2a   : > { %7028 = vmatprep.mubr.msk.bf16.mxu1 %vm7571_vm0, %v7570_v1 }
0x1a7e   : > { %v3531_v27 = vpop.f32.mrb[96].mxu0 }
0x1a7f   : > { %v7000_v28 = vpop.f32.mrb[97].mxu0  ;;  %v3689_v57 = vmul.f32 0.35355338, %v3531_v27 }
0x1a80   : > { %v3534_v29 = vpop.f32.mrb[98].mxu0 }
0x1a81   : > { %v7001_v31 = vpop.f32.mrb[99].mxu0  ;;  %v3693_v62 = vsel %vm750_vm2, %v3689_v57, -inf }
0x1af0   : > { %v3583_v32 = vpop.f32.mrb[96].mxu1  ;;  %v3633_v34 = vpop.f32.mrb[100].mxu0 }
0x1af1   : > { %v3690_v35 = vmul.f32 0.35355338, %v3583_v32  ;;  %v7006_v36 = vpop.f32.mrb[97].mxu1  ;;  %v7012_v38 = vpop.f32.mrb[101].mxu0  ;;  %v3691_v61 = vmul.f32 0.35355338, %v3633_v34 }
0x1af2   : > { %v3586_v22 = vpop.f32.mrb[98].mxu1  ;;  %v3636_v39 = vpop.f32.mrb[102].mxu0  ;;  %v3366_v32 = vld [vmem:[%s8893_s13 + $0x4] sm:$0xf] }
0x1af3   : > { %v7007_v40 = vpop.f32.mrb[99].mxu1  ;;  %v7013_v41 = vpop.f32.mrb[103].mxu0  ;;  %v3696_v42 = vsel %vm750_vm2, %v3690_v35, -inf  ;;  %v3699_v2 = vsel %vm750_vm2, %v3691_v61, -inf  ;;  %v3841_v36 = vsel %vm1003_vm3, %v3366_v32, 0 }
0x1af4   : > { %3697 = vmax.xlane.f32.xlu0 %v3696_v42 }
0x1afc   : > { %v3683_v44 = vpop.f32.mrb[100].mxu1 }
0x1afd   : > { %v7018_v11 = vpop.f32.mrb[101].mxu1  ;;  %v3692_v63 = vmul.f32 0.35355338, %v3683_v44 }
0x1afe   : > { %v3686_v46 = vpop.f32.mrb[102].mxu1 }
0x1aff   : > { %v7019_v47 = vpop.f32.mrb[103].mxu1  ;;  %v3702_v3 = vsel %vm750_vm2, %v3692_v63, -inf }
0x1b0a   : > { %3788 = vrot.lane.b32.xlu0 %v8329_v52, %s8953_s25 }
0x1b81   : > { %v3698_v48 = vpop.xlane.xlu0 %3697 }
0x1b82   : > { %v3706_v5 = vsub.f32 %v3690_v35, %v3698_v48 }
0x1b84   : > { %v3711_v49 = vmul.f32 1.442695, %v3706_v5 }
0x1b85   : > { %v3789_v50 = vpop.permute.xlu0 %3788 }
0x1b86   : > { %7448 = vpow2.f32 %v3711_v49  ;;  %v3794_v56 = vsel %vm1003_vm3, %v3789_v50, 0 }
0x1b87   : > { %7027 = vmatpush3.bf16.msra.mxu1 %v3794_v56 }
0x1b88   : > { %7038 = vmatprep.subr.bf16.mxu1 %v7570_v1 }
0x1b90   : > { %v7449_v55 = vpop.eup %7448 }
0x1b91   : > { %v3720_v58 = vsel %vm750_vm2, %v7449_v55, 0.0 }
0x1b92   : > { %3721 = vadd.xlane.f32.xlu1 %v3720_v58 }
0x1b96   : > { %3694 = vmax.xlane.f32.xlu1 %v3693_v62 }
0x1b9a   : > { %3700 = vmax.xlane.f32.xlu1 %v3699_v2 }
0x1b9e   : > { %3703 = vmax.xlane.f32.xlu1 %v3702_v3 }
0x1c1f   : > { %v3722_v4 = vpop.xlane.xlu1 %3721 }
0x1c20   : > { %7450 = vrcp.f32 %v3722_v4 }
0x1c23   : > { %v3695_v7 = vpop.xlane.xlu1 %3694 }
0x1c24   : > { %v3705_v6 = vsub.f32 %v3689_v57, %v3695_v7  ;;  %v3365_v57 = vld [vmem:[%s8893_s13] sm:$0xf] }
0x1c25   : > { %v3887_v58 = vsel %vm1003_vm3, %v3365_v57, 0 }
0x1c26   : > { %v3709_v30 = vmul.f32 1.442695, %v3705_v6 }
0x1c27   : > { %v3701_v51 = vpop.xlane.xlu1 %3700 }
0x1c28   : > { %7452 = vpow2.f32 %v3709_v30  ;;  %v3707_v43 = vsub.f32 %v3691_v61, %v3701_v51  ;;  %v3367_v61 = vld [vmem:[%s8893_s13 + $0x8] sm:$0xf] }
0x1c29   : > { %v3983_v3 = vsel %vm1003_vm3, %v3367_v61, 0 }
0x1c2a   : > { %v7451_v14 = vpop.eup %7450  ;;  %v3713_v15 = vmul.f32 1.442695, %v3707_v43 }
0x1c2b   : > { %v3734_v8 = vmul.f32 %v7451_v14, %v7449_v55  ;;  %v3704_v23 = vpop.xlane.xlu1 %3703  ;;  %v3368_v14 = vld [vmem:[%s8893_s13 + $0xc] sm:$0xf] }
0x1c2c   : > { %7454 = vpow2.f32 %v3713_v15  ;;  %v3708_v24 = vsub.f32 %v3692_v63, %v3704_v23 }
0x1c2d   : > { %v3787_v45 = vpack.c.bf16 %v3734_v8, %v3734_v8 }
0x1c2e   : > { %v3715_v25 = vmul.f32 1.442695, %v3708_v24 }
0x1c2f   : > { %7029 = vmatmul.mubr.msk.bf16.vlgmr.msra.gmra.mrb[104].mxu1 %vm750_vm2, %v3787_v45 }
0x1c30   : > { %7040 = vmatprep.mubr.msk.bf16.mxu1 %vm7571_vm0, %v7570_v1  ;;  %7456 = vpow2.f32 %v3715_v25  ;;  %7039 = vmatpush3.bf16.msra.mxu1 %v3887_v58 }
0x1c31   : > { %7050 = vmatprep.subr.bf16.mxu1 %v7570_v1 }
0x1c32   : > { %v7453_v17 = vpop.eup %7452 }
0x1c33   : > { %v3717_v19 = vsel %vm750_vm2, %v7453_v17, 0.0 }
0x1c34   : > { %3718 = vadd.xlane.f32.xlu1 %v3717_v19 }
0x1c36   : > { %v7455_v20 = vpop.eup %7454 }
0x1c37   : > { %v3723_v21 = vsel %vm750_vm2, %v7455_v20, 0.0 }
0x1c38   : > { %3724 = vadd.xlane.f32.xlu0 %v3723_v21 }
0x1c3a   : > { %v7457_v59 = vpop.eup %7456 }
0x1c3b   : > { %v3726_v26 = vsel %vm750_vm2, %v7457_v59, 0.0 }
0x1c45   : > { %3738 = vrot.lane.b32.xlu1 %v8329_v52, %s8954_s23 }
0x1c49   : > { %3930 = vrot.lane.b32.xlu1 %v8329_v52, %s8955_s2 }
0x1c6d   : > { %3727 = vadd.xlane.f32.xlu1 %v3726_v26 }
0x1c7e   : > { %4027 = vrot.lane.b32.xlu1 %v8329_v52, %s8956_s20 }
0x1cc1   : > { %v3719_v27 = vpop.xlane.xlu1 %3718 }
0x1cc2   : > { %7458 = vrcp.f32 %v3719_v27 }
0x1cc5   : > { %v3739_v28 = vpop.permute.xlu1 %3738  ;;  %v3725_v52 = vpop.xlane.xlu0 %3724 }
0x1cc6   : > { %v3744_v29 = vsel %vm1003_vm3, %v3739_v28, 0  ;;  %7460 = vrcp.f32 %v3725_v52 }
0x1cc7   : > { %7021 = vmatpush3.bf16.msra.mxu0 %v3744_v29 }
0x1cc8   : > { %7032 = vmatprep.subr.bf16.mxu0 %v7570_v1 }
0x1cc9   : > { %v3931_v38 = vpop.permute.xlu1 %3930 }
0x1cca   : > { %v3936_v11 = vsel %vm1003_vm3, %v3931_v38, 0  ;;  %v4126_v38 = vrot.slane %v8167_v13, %v7957_v37  ;;  %v7368_v13 = vld [vmem:[%s8894_s14] sm:$0xff]  }
0x1ccc   : > { %v7459_v31 = vpop.eup %7458 }
0x1ccd   : > { %v3733_v34 = vmul.f32 %v7459_v31, %v7453_v17  ;;  %v4080_v17 = vsel %vm1003_vm3, %v3368_v14, 0 }
0x1ccf   : > { %v3737_v35 = vpack.c.bf16 %v3733_v34, %v3733_v34 }
0x1cd0   : > { %v7461_v42 = vpop.eup %7460 }
0x1cd1   : > { %7023 = vmatmul.mubr.msk.bf16.vlgmr.msra.gmra.mrb[104].mxu0 %vm750_vm2, %v3737_v35  ;;  %v3735_v47 = vmul.f32 %v7461_v42, %v7455_v20 }
0x1cd2   : > { %7033 = vmatpush3.bf16.msra.mxu0 %v3841_v36  ;;  %7034 = vmatprep.mubr.msk.bf16.mxu0 %vm7571_vm0, %v7570_v1 }
0x1cd3   : > { %7044 = vmatprep.subr.bf16.mxu0 %v7570_v1  ;;  %v3929_v5 = vpack.c.bf16 %v3735_v47, %v3735_v47 }
0x1cfa   : > { %v3728_v22 = vpop.xlane.xlu1 %3727 }
0x1cfb   : > { %7462 = vrcp.f32 %v3728_v22 }
0x1cfe   : > { %v4028_v48 = vpop.permute.xlu1 %4027 }
0x1cff   : > { %v4033_v50 = vsel %vm1003_vm3, %v4028_v48, 0 }
0x1d02   : > { %v3830_v39 = vpop.f32.mrb[104].mxu1 }
0x1d03   : > { %v3836_v40 = vpack.c.bf16 %v3830_v39, %v3830_v39  ;;  %v7030_v41 = vpop.f32.mrb[105].mxu1 }
0x1d04   : > { %v3833_v44 = vpop.f32.mrb[106].mxu1 }
0x1d05   : > { %v7031_v46 = vpop.f32.mrb[107].mxu1  ;;  %7035 = vmatmul.mubr.msk.bf16.vlgmr.msra.gmra.mrb[108].mxu0 %vm750_vm2, %v3836_v40  ;;  %v7463_v49 = vpop.eup %7462 }
0x1d06   : > { %7045 = vmatpush3.bf16.msra.mxu0 %v3936_v11  ;;  %7046 = vmatprep.mubr.msk.bf16.mxu0 %vm7571_vm0, %v7570_v1  ;;  %v3736_v56 = vmul.f32 %v7463_v49, %v7457_v59 }
0x1d07   : > { %7056 = vmatprep.subr.bf16.mxu0 %v7570_v1 }
0x1d08   : > { %v4026_v55 = vpack.c.bf16 %v3736_v56, %v3736_v56  ;;  %v7369_v56 = vld [vmem:[%s8894_s14 + $0x8] sm:$0xff]  }
0x1d0d   : > { %7047 = vmatmul.mubr.msk.bf16.vlgmr.msra.gmra.mrb[112].mxu0 %vm750_vm2, %v3929_v5 }
0x1d0e   : > { %7057 = vmatpush3.bf16.msra.mxu0 %v4033_v50  ;;  %7058 = vmatprep.mubr.msk.bf16.mxu0 %vm7571_vm0, %v7570_v1 }
0x1d0f   : > { %7068 = vmatprep.subr.bf16.mxu0 %v7570_v1 }
0x1d15   : > { %7059 = vmatmul.mubr.msk.bf16.vlgmr.msra.gmra.mrb[116].mxu0 %vm750_vm2, %v4026_v55  ;;  %v7371_v55 = vld [vmem:[%s8895_s15 + $0x8] sm:$0xff]  }
0x1d16   : > { %7072 = vmatprep.mubr.msk.bf16.mxu0 %vm7571_vm0, %v7570_v1  ;;  %7069 = vmatpush3.bf16.msra.mxu0 %v7368_v13 }
0x1d17   : > { %7070 = vmatprep.subr.bf16.mxu0 %v7570_v1 }
0x1d1a   : > { %7071 = vmatpush3.bf16.msra.mxu0 %v7369_v56 }
0x1d1b   : > { %7088 = vmatprep.subr.bf16.mxu0 %v7570_v1 }
0x1da4   : > { %v3780_v62 = vpop.f32.mrb[104].mxu0 }
0x1da5   : > { %v3786_v63 = vpack.c.bf16 %v3780_v62, %v3780_v62  ;;  %v7024_v2 = vpop.f32.mrb[105].mxu0  ;;  %v2559_v62 = vld [vmem:[%s8896_s16 + $0x8] sm:$0x3f] }
0x1da6   : > { %v3783_v4 = vpop.f32.mrb[106].mxu0  ;;  %v4168_v14 = vrot.slane %v2559_v62, %v7889_v33 }
0x1da7   : > { %v7025_v7 = vpop.f32.mrb[107].mxu0  ;;  %7041 = vmatmul.mubr.msk.bf16.vlgmr.msra.gmra.mrb[108].mxu1 %vm750_vm2, %v3786_v63  ;;  %v4145_v63 = vrot.slane %v2559_v62, %v7777_v10  ;;  %v4150_v4 = vrot.slane %v2559_v62, %v7774_v9 }
0x1da8   : > { %7051 = vmatpush3.bf16.msra.mxu1 %v3983_v3  ;;  %7052 = vmatprep.mubr.msk.bf16.mxu1 %vm7571_vm0, %v7570_v1 }
0x1da9   : > { %7062 = vmatprep.subr.bf16.mxu1 %v7570_v1 }
0x1dd8   : > { %v3877_v6 = vpop.f32.mrb[108].mxu0 }
0x1dd9   : > { %v7036_v30 = vpop.f32.mrb[109].mxu0 }
0x1dda   : > { %v3880_v51 = vpop.f32.mrb[110].mxu0 }
0x1ddb   : > { %v7037_v43 = vpop.f32.mrb[111].mxu0  ;;  %v7372_v51 = vld [vmem:[%s8895_s15 + $0x10] sm:$0xff]  }
0x1ddc   : > { %v7373_v43 = vld [vmem:[%s8895_s15 + $0x18] sm:$0xff]  }
0x1de0   : > { %v3972_v15 = vpop.f32.mrb[112].mxu0 }
0x1de1   : > { %v3978_v8 = vpack.c.bf16 %v3972_v15, %v3972_v15  ;;  %v7048_v45 = vpop.f32.mrb[113].mxu0 }
0x1de2   : > { %v3975_v19 = vpop.f32.mrb[114].mxu0 }
0x1de3   : > { %v7049_v20 = vpop.f32.mrb[115].mxu0  ;;  %7053 = vmatmul.mubr.msk.bf16.vlgmr.msra.gmra.mrb[112].mxu1 %vm750_vm2, %v3978_v8 }
0x1de4   : > { %7063 = vmatpush3.bf16.msra.mxu1 %v4080_v17  ;;  %7064 = vmatprep.mubr.msk.bf16.mxu1 %vm7571_vm0, %v7570_v1 }
0x1de5   : > { %7076 = vmatprep.subr.bf16.mxu1 %v7570_v1 }
0x1de8   : > { %v4069_v21 = vpop.f32.mrb[116].mxu0 }
0x1de9   : > { %v4075_v23 = vpack.c.bf16 %v4069_v21, %v4069_v21  ;;  %v7060_v24 = vpop.f32.mrb[117].mxu0 }
0x1dea   : > { %v4072_v25 = vpop.f32.mrb[118].mxu0 }
0x1deb   : > { %v7061_v59 = vpop.f32.mrb[119].mxu0  ;;  %7065 = vmatmul.mubr.msk.bf16.vlgmr.msra.gmra.mrb[116].mxu1 %vm750_vm2, %v4075_v23  ;;  %v4229_v23 = vrot.slane %v2559_v62, %v7913_v53 }
0x1dec   : > { %7084 = vmatprep.mubr.msk.bf16.mxu1 %vm7571_vm0, %v7570_v1 }
0x1e7a   : > { %v3923_v26 = vpop.f32.mrb[108].mxu1 }
0x1e7b   : > { %v3924_v27 = vadd.f32 %v3923_v26, %v3877_v6  ;;  %v7042_v28 = vpop.f32.mrb[109].mxu1 }
0x1e7c   : > { %v3926_v29 = vpop.f32.mrb[110].mxu1 }
0x1e7d   : > { %v7043_v31 = vpop.f32.mrb[111].mxu1 }
0x1eb6   : > { %v4019_v32 = vpop.f32.mrb[112].mxu1 }
0x1eb7   : > { %v4025_v34 = vadd.f32 %v4019_v32, %v3924_v27  ;;  %v7054_v35 = vpop.f32.mrb[113].mxu1 }
0x1eb8   : > { %v4022_v36 = vpop.f32.mrb[114].mxu1 }
0x1eb9   : > { %v7055_v52 = vpop.f32.mrb[115].mxu1 }
0x1eba   : > { %v7374_v52 = vld [vmem:[%s8888_s8 + $0x10] sm:$0xff]  }
0x1ebe   : > { %v4116_v22 = vpop.f32.mrb[116].mxu1 }
0x1ebf   : > { %v4122_v39 = vadd.f32 %v4116_v22, %v4025_v34  ;;  %v7066_v40 = vpop.f32.mrb[117].mxu1 }
0x1ec0   : > { %v4119_v41 = vpop.f32.mrb[118].mxu1 }
0x1ec1   : > { %v4127_v42 = vadd.f32 %v4126_v38, %v4122_v39  ;;  %v7067_v44 = vpop.f32.mrb[119].mxu1  ;;  %v7375_v38 = vld [vmem:[%s8888_s8 + $0x18] sm:$0xff]   ;;  %v4314_v41 = vrot.slane %v2559_v62, %v7916_v54 }
0x1ec3   : > { %v4128_v11 = vadd.f32 %v4127_v42, %v8349_v12  ;;  %v7370_v12 = vld [vmem:[%s8895_s15] sm:$0xff]  }
0x1ec4   : > { %7077 = vmatpush3.bf16.msra.mxu1 %v7370_v12 }
0x1ec5   : > { %v4129_v46 = vsel %vm648_vm1, %v4128_v11, 0.0  ;;  %7078 = vmatprep.subr.bf16.mxu1 %v7570_v1 }
0x1ec6   : > { %4130 = vadd.xlane.f32.xlu0 %v4129_v46 }
0x1ec8   : > { %7079 = vmatpush3.bf16.msra.mxu1 %v7371_v55  ;;  %v8525_v55 = vld [vmem:[%s8896_s16 + $0x10] sm:$0xff] }
0x1ec9   : > { %7080 = vmatprep.subr.bf16.mxu1 %v7570_v1 }
0x1ecc   : > { %7081 = vmatpush3.bf16.msra.mxu1 %v7372_v51 }
0x1ecd   : > { %7082 = vmatprep.subr.bf16.mxu1 %v7570_v1 }
0x1ed0   : > { %7083 = vmatpush3.bf16.msra.mxu1 %v7373_v43 }
0x1ed1   : > { %7104 = vmatprep.subr.bf16.mxu1 %v7570_v1 }
0x1f53   : > { %v4131_v47 = vpop.xlane.xlu0 %4130 }
0x1f54   : > { %v4132_v48 = vmul.f32 0.03125, %v4131_v47 }
0x1f56   : > { %v4133_v5 = vsub.f32 %v4128_v11, %v4132_v48  ;;  %v4319_v11 = vrot.slane %v2559_v62, %v7934_v0  ;;  %v7376_v48 = vld [vmem:[%s8889_s9 + $0x10] sm:$0xff]  }
0x1f58   : > { %v4134_v49 = vmul.f32 %v4133_v5, %v4133_v5 }
0x1f5a   : > { %v4135_v50 = vsel %vm648_vm1, %v4134_v49, 0.0  ;;  %v7377_v49 = vld [vmem:[%s8889_s9 + $0x18] sm:$0xff]  }
0x1f5b   : > { %4136 = vadd.xlane.f32.xlu1 %v4135_v50 }
0x1fe8   : > { %v4137_v57 = vpop.xlane.xlu1 %4136 }
0x1fe9   : > { %v4138_v58 = vmul.f32 0.03125, %v4137_v57  ;;  %v4402_v57 = vrot.slane %v8525_v55, %v7774_v9 }
0x1feb   : > { %v4139_v61 = vadd.f32 1e-05, %v4138_v58  ;;  %v4343_v58 = vrot.slane %v8525_v55, %v7777_v10 }
0x1fed   : > { %7464 = vrsqrt.f32 %v4139_v61 }
0x1ff7   : > { %v7465_v2 = vpop.eup %7464 }
0x1ff8   : > { %v4141_v3 = vmul.f32 %v7465_v2, %v4133_v5 }
0x1ffa   : > { %v4146_v7 = vmul.f32 %v4145_v63, %v4141_v3 }
0x1ffc   : > { %v4151_v6 = vadd.f32 %v4150_v4, %v4146_v7 }
0x1ffe   : > { %v4164_v30 = vpack.c.bf16 %v4151_v6, %v4151_v6 }
0x2000   : > { %7073 = vmatmul.mubr.msk.bf16.vlgmr.msra.gmra.mrb[120].mxu0 %vm648_vm1, %v4164_v30 }
0x2001   : > { %7092 = vmatprep.mubr.msk.bf16.mxu0 %vm7571_vm0, %v7570_v1  ;;  %7089 = vmatpush3.bf16.msra.mxu0 %v7374_v52 }
0x2002   : > { %7090 = vmatprep.subr.bf16.mxu0 %v7570_v1 }
0x2005   : > { %7091 = vmatpush3.bf16.msra.mxu0 %v7375_v38 }
0x2006   : > { %7096 = vmatprep.subr.bf16.mxu0 %v7570_v1 }
0x20d3   : > { %v4218_v15 = vpop.f32.mrb[120].mxu0 }
0x20d4   : > { %v4219_v8 = vadd.f32 %v4218_v15, %v4168_v14  ;;  %v7074_v45 = vpop.f32.mrb[121].mxu0 }
0x20d5   : > { %v4221_v17 = vpop.f32.mrb[122].mxu0 }
0x20d6   : > { %v4224_v19 = vmax.f32 %v4219_v8, 0.0  ;;  %v7075_v20 = vpop.f32.mrb[123].mxu0 }
0x20d8   : > { %v4225_v21 = vpack.c.bf16 %v4224_v19, %v4224_v19 }
0x20da   : > { %7085 = vmatmul.mubr.msk.bf16.vlgmr.msra.gmra.mrb[120].mxu1 %vm1516_vm4, %v4225_v21 }
0x20db   : > { %7106 = vmatprep.mubr.msk.bf16.mxu1 %vm7571_vm0, %v7570_v1 }
0x21ad   : > { %v4291_v24 = vpop.f32.mrb[120].mxu1 }
0x21ae   : > { %v4292_v25 = vadd.f32 %v4291_v24, %v4229_v23  ;;  %v7086_v59 = vpop.f32.mrb[121].mxu1 }
0x21af   : > { %v4294_v26 = vpop.f32.mrb[122].mxu1 }
0x21b0   : > { %v7087_v27 = vpop.f32.mrb[123].mxu1  ;;  %v4297_v28 = vadd.f32 %v4292_v25, %v4151_v6 }
0x21b2   : > { %v4298_v29 = vsel %vm648_vm1, %v4297_v28, 0.0 }
0x21b3   : > { %4299 = vadd.xlane.f32.xlu0 %v4298_v29 }
0x2240   : > { %v4300_v31 = vpop.xlane.xlu0 %4299 }
0x2241   : > { %v4301_v32 = vmul.f32 0.03125, %v4300_v31 }
0x2243   : > { %v4302_v34 = vsub.f32 %v4297_v28, %v4301_v32 }
0x2245   : > { %v4303_v35 = vmul.f32 %v4302_v34, %v4302_v34 }
0x2247   : > { %v4304_v36 = vsel %vm648_vm1, %v4303_v35, 0.0 }
0x2248   : > { %4305 = vadd.xlane.f32.xlu0 %v4304_v36 }
0x22d5   : > { %v4306_v22 = vpop.xlane.xlu0 %4305 }
0x22d6   : > { %v4307_v39 = vmul.f32 0.03125, %v4306_v22 }
0x22d8   : > { %v4308_v40 = vadd.f32 1e-05, %v4307_v39 }
0x22da   : > { %7466 = vrsqrt.f32 %v4308_v40 }
0x22e4   : > { %v7467_v42 = vpop.eup %7466 }
0x22e5   : > { %v4310_v44 = vmul.f32 %v7467_v42, %v4302_v34 }
0x22e7   : > { %v4315_v46 = vmul.f32 %v4314_v41, %v4310_v44 }
0x22e9   : > { %v8504_v47 = vadd.f32 %v4319_v11, %v4315_v46 }
0x22eb   : > { %v4339_v5 = vpack.c.bf16 %v8504_v47, %v8504_v47 }
0x22ed   : > { %7093 = vmatmul.mubr.msk.bf16.vlgmr.msra.gmra.mrb[124].mxu0 %vm648_vm1, %v4339_v5 }
0x22ee   : > { %7097 = vmatpush3.bf16.msra.mxu0 %v7376_v48  ;;  %7100 = vmatprep.mubr.msk.bf16.mxu0 %vm7571_vm0, %v7570_v1 }
0x22ef   : > { %7098 = vmatprep.subr.bf16.mxu0 %v7570_v1 }
0x22f2   : > { %7099 = vmatpush3.bf16.msra.mxu0 %v7377_v49 }
0x22f3   : > { %7110 = vmatprep.subr.bf16.mxu0 %v7570_v1 }
0x22f5   : > { %7101 = vmatmul.mubr.msk.bf16.vlgmr.msra.gmra.mrb[128].mxu0 %vm648_vm1, %v4339_v5 }
0x22f6   : > { %7112 = vmatprep.mubr.msk.bf16.mxu0 %vm7571_vm0, %v7570_v1 }
0x23c0   : > { %v4393_v50 = vpop.f32.mrb[124].mxu0 }
0x23c1   : > { %v7094_v13 = vpop.f32.mrb[125].mxu0  ;;  %v4394_v3 = vadd.f32 %v4393_v50, %v4343_v58 }
0x23c2   : > { %v4396_v56 = vpop.f32.mrb[126].mxu0 }
0x23c3   : > { %v7095_v12 = vpop.f32.mrb[127].mxu0  ;;  %v4455_v30 = vpack.c.bf16 %v4394_v3, %v4394_v3 }
0x23c8   : > { %v4449_v61 = vpop.f32.mrb[128].mxu0 }
0x23c9   : > { %v4450_v62 = vadd.f32 %v4449_v61, %v4402_v57  ;;  %v7102_v63 = vpop.f32.mrb[129].mxu0 }
0x23ca   : > { %v4452_v2 = vpop.f32.mrb[130].mxu0 }
0x23cb   : > { %v8531_v4 = vpack.c.bf16 %v4450_v62, %v4450_v62  ;;  %v7103_v7 = vpop.f32.mrb[131].mxu0 }
0x23cd   : > { %4557 = vrot.lane.b32.xlu1 %v8531_v4, %s8951_s27  ;;  %4507 = vrot.lane.b32.xlu0 %v8531_v4, %s8950_s0  ;;  %v4461_v6 = vsel %vm750_vm2, %v8531_v4, 0 }
0x23ce   : > { %7105 = vmatpush3.bf16.xpose.msra.mxu1 %v4461_v6 }
0x23cf   : > { %7116 = vmatprep.subr.bf16.mxu1 %v7570_v1 }
0x23d1   : > { %4504 = vrot.lane.b32.xlu0 %v4455_v30, %s8950_s0 }
0x23d5   : > { %4555 = vrot.lane.b32.xlu0 %v4455_v30, %s8951_s27  ;;  %7107 = vmatmul.mubr.msk.bf16.vlgmr.msra.gmra.mrb[124].mxu1 %vm750_vm2, %v4455_v30 }
0x23d6   : > { %7118 = vmatprep.mubr.msk.bf16.mxu1 %vm7571_vm0, %v7570_v1 }
0x23d9   : > { %4607 = vrot.lane.b32.xlu0 %v8531_v4, %s8952_s28 }
0x23dd   : > { %4605 = vrot.lane.b32.xlu0 %v4455_v30, %s8952_s28 }
0x243f   : > { %v4558_v51 = vpop.permute.xlu1 %4557  ;;  %v4508_v43 = vpop.permute.xlu0 %4507 }
0x2440   : > { %v4563_v14 = vsel %vm750_vm2, %v4558_v51, 0  ;;  %v4513_v15 = vsel %vm750_vm2, %v4508_v43, 0 }
0x2441   : > { %7111 = vmatpush3.bf16.xpose.msra.mxu0 %v4513_v15  ;;  %7117 = vmatpush3.bf16.xpose.msra.mxu1 %v4563_v14 }
0x2442   : > { %7122 = vmatprep.subr.bf16.mxu0 %v7570_v1  ;;  %7128 = vmatprep.subr.bf16.mxu1 %v7570_v1 }
0x2443   : > { %v4505_v8 = vpop.permute.xlu0 %4504 }
0x2447   : > { %v4556_v45 = vpop.permute.xlu0 %4555 }
0x2448   : > { %7113 = vmatmul.mubr.msk.bf16.vlgmr.msra.gmra.mrb[132].mxu0 %vm750_vm2, %v4505_v8  ;;  %7119 = vmatmul.mubr.msk.bf16.vlgmr.msra.gmra.mrb[128].mxu1 %vm750_vm2, %v4556_v45 }
0x2449   : > { %7124 = vmatprep.mubr.msk.bf16.mxu0 %vm7571_vm0, %v7570_v1  ;;  %7130 = vmatprep.mubr.msk.bf16.mxu1 %vm7571_vm0, %v7570_v1 }
0x244b   : > { %v4608_v17 = vpop.permute.xlu0 %4607 }
0x244c   : > { %v4613_v19 = vsel %vm750_vm2, %v4608_v17, 0 }
0x244d   : > { %7123 = vmatpush3.bf16.xpose.msra.mxu0 %v4613_v19 }
0x244e   : > { %7134 = vmatprep.subr.bf16.mxu0 %v7570_v1 }
0x244f   : > { %v4606_v20 = vpop.permute.xlu0 %4605 }
0x2454   : > { %7125 = vmatmul.mubr.msk.bf16.vlgmr.msra.gmra.mrb[136].mxu0 %vm750_vm2, %v4606_v20 }
0x2455   : > { %7136 = vmatprep.mubr.msk.bf16.mxu0 %vm7571_vm0, %v7570_v1 }
0x24a8   : > { %v4497_v21 = vpop.f32.mrb[124].mxu1 }
0x24a9   : > { %v7108_v23 = vpop.f32.mrb[125].mxu1  ;;  %v4655_v48 = vmul.f32 0.35355338, %v4497_v21 }
0x24aa   : > { %v4500_v24 = vpop.f32.mrb[126].mxu1 }
0x24ab   : > { %v7109_v25 = vpop.f32.mrb[127].mxu1  ;;  %v4659_v50 = vsel %vm8212_vm5, %v4655_v48, -1e+30 }
0x24ac   : > { %v4663_v56 = vsel %vm750_vm2, %v4659_v50, -inf }
0x251b   : > { %v4549_v59 = vpop.f32.mrb[132].mxu0  ;;  %v4599_v26 = vpop.f32.mrb[128].mxu1 }
0x251c   : > { %v4656_v27 = vmul.f32 0.35355338, %v4549_v59  ;;  %v7114_v28 = vpop.f32.mrb[133].mxu0  ;;  %v7120_v29 = vpop.f32.mrb[129].mxu1  ;;  %v4657_v13 = vmul.f32 0.35355338, %v4599_v26 }
0x251d   : > { %v4552_v31 = vpop.f32.mrb[134].mxu0  ;;  %v4602_v32 = vpop.f32.mrb[130].mxu1  ;;  %v6382_v28 = vld [vmem:[%s8890_s10 + $0x14] sm:$0xf] }
0x251e   : > { %v7115_v34 = vpop.f32.mrb[135].mxu0  ;;  %v7121_v35 = vpop.f32.mrb[131].mxu1  ;;  %v4660_v36 = vsel %vm8212_vm5, %v4656_v27, -1e+30  ;;  %v4661_v12 = vsel %vm8212_vm5, %v4657_v13, -1e+30 }
0x251f   : > { %v4666_v52 = vsel %vm750_vm2, %v4660_v36, -inf  ;;  %v4669_v58 = vsel %vm750_vm2, %v4661_v12, -inf  ;;  %v4811_v32 = vsel %vm1003_vm3, %v6382_v28, 0 }
0x2520   : > { %4667 = vmax.xlane.f32.xlu0 %v4666_v52 }
0x2527   : > { %v4649_v38 = vpop.f32.mrb[136].mxu0 }
0x2528   : > { %v7126_v22 = vpop.f32.mrb[137].mxu0  ;;  %v4658_v57 = vmul.f32 0.35355338, %v4649_v38 }
0x2529   : > { %v4652_v39 = vpop.f32.mrb[138].mxu0 }
0x252a   : > { %v7127_v40 = vpop.f32.mrb[139].mxu0  ;;  %v4662_v61 = vsel %vm8212_vm5, %v4658_v57, -1e+30 }
0x252b   : > { %v4672_v62 = vsel %vm750_vm2, %v4662_v61, -inf }
0x2536   : > { %4758 = vrot.lane.b32.xlu0 %v8531_v4, %s8953_s25 }
0x25ad   : > { %v4668_v41 = vpop.xlane.xlu0 %4667 }
0x25ae   : > { %v4676_v42 = vsub.f32 %v4660_v36, %v4668_v41 }
0x25b0   : > { %v4681_v44 = vmul.f32 1.442695, %v4676_v42 }
0x25b1   : > { %v4759_v11 = vpop.permute.xlu0 %4758 }
0x25b2   : > { %7468 = vpow2.f32 %v4681_v44  ;;  %v4764_v46 = vsel %vm1003_vm3, %v4759_v11, 0 }
0x25b3   : > { %7135 = vmatpush3.bf16.msra.mxu0 %v4764_v46 }
0x25b4   : > { %7146 = vmatprep.subr.bf16.mxu0 %v7570_v1 }
0x25bc   : > { %v7469_v5 = vpop.eup %7468 }
0x25bd   : > { %v4690_v49 = vsel %vm750_vm2, %v7469_v5, 0.0 }
0x25be   : > { %4691 = vadd.xlane.f32.xlu1 %v4690_v49 }
0x25c2   : > { %4664 = vmax.xlane.f32.xlu1 %v4663_v56  ;;  %v6383_v56 = vld [vmem:[%s8890_s10 + $0x18] sm:$0xf] }
0x25c6   : > { %4670 = vmax.xlane.f32.xlu1 %v4669_v58 }
0x25ca   : > { %4673 = vmax.xlane.f32.xlu1 %v4672_v62 }
0x264b   : > { %v4692_v63 = vpop.xlane.xlu1 %4691 }
0x264c   : > { %7470 = vrcp.f32 %v4692_v63 }
0x264f   : > { %v4665_v2 = vpop.xlane.xlu1 %4664 }
0x2650   : > { %v4675_v3 = vsub.f32 %v4659_v50, %v4665_v2  ;;  %v6381_v50 = vld [vmem:[%s8890_s10 + $0x10] sm:$0xf] }
0x2651   : > { %v4857_v13 = vsel %vm1003_vm3, %v6381_v50, 0 }
0x2652   : > { %v4679_v7 = vmul.f32 1.442695, %v4675_v3 }
0x2653   : > { %v4671_v6 = vpop.xlane.xlu1 %4670 }
0x2654   : > { %7472 = vpow2.f32 %v4679_v7  ;;  %v4677_v30 = vsub.f32 %v4661_v12, %v4671_v6 }
0x2656   : > { %v7471_v51 = vpop.eup %7470  ;;  %v4683_v43 = vmul.f32 1.442695, %v4677_v30  ;;  %v6384_v30 = vld [vmem:[%s8890_s10 + $0x1c] sm:$0xf] }
0x2657   : > { %v4704_v14 = vmul.f32 %v7471_v51, %v7469_v5  ;;  %v4674_v19 = vpop.xlane.xlu1 %4673 }
0x2658   : > { %7474 = vpow2.f32 %v4683_v43  ;;  %v4678_v20 = vsub.f32 %v4662_v61, %v4674_v19  ;;  %v4953_v61 = vsel %vm1003_vm3, %v6383_v56, 0 }
0x2659   : > { %v4757_v15 = vpack.c.bf16 %v4704_v14, %v4704_v14 }
0x265a   : > { %v4685_v21 = vmul.f32 1.442695, %v4678_v20 }
0x265b   : > { %7137 = vmatmul.mubr.msk.bf16.vlgmr.msra.gmra.mrb[140].mxu0 %vm750_vm2, %v4757_v15  ;;  %v5050_v15 = vsel %vm1003_vm3, %v6384_v30, 0  ;;  %v5120_v30 = vrot.slane %v8525_v55, %v7916_v54 }
0x265c   : > { %7148 = vmatprep.mubr.msk.bf16.mxu0 %vm7571_vm0, %v7570_v1  ;;  %7476 = vpow2.f32 %v4685_v21  ;;  %7147 = vmatpush3.bf16.msra.mxu0 %v4857_v13 }
0x265d   : > { %7158 = vmatprep.subr.bf16.mxu0 %v7570_v1 }
0x265e   : > { %v7473_v60 = vpop.eup %7472 }
0x265f   : > { %v4687_v8 = vsel %vm750_vm2, %v7473_v60, 0.0 }
0x2660   : > { %4688 = vadd.xlane.f32.xlu1 %v4687_v8 }
0x2662   : > { %v7475_v45 = vpop.eup %7474 }
0x2663   : > { %v4693_v17 = vsel %vm750_vm2, %v7475_v45, 0.0 }
0x2664   : > { %4694 = vadd.xlane.f32.xlu0 %v4693_v17  ;;  %v7378_v17 = vld [vmem:[%s8892_s12 + $0x10] sm:$0xff]  }
0x2666   : > { %v7477_v23 = vpop.eup %7476 }
0x2667   : > { %v4696_v24 = vsel %vm750_vm2, %v7477_v23, 0.0 }
0x2671   : > { %4708 = vrot.lane.b32.xlu1 %v8531_v4, %s8954_s23 }
0x2675   : > { %4900 = vrot.lane.b32.xlu1 %v8531_v4, %s8955_s2 }
0x2699   : > { %4697 = vadd.xlane.f32.xlu1 %v4696_v24  ;;  %v7379_v24 = vld [vmem:[%s8892_s12 + $0x18] sm:$0xff]  }
0x26aa   : > { %4997 = vrot.lane.b32.xlu1 %v8531_v4, %s8956_s20 }
0x26ed   : > { %v4689_v25 = vpop.xlane.xlu1 %4688 }
0x26ee   : > { %7478 = vrcp.f32 %v4689_v25 }
0x26f1   : > { %v4709_v59 = vpop.permute.xlu1 %4708  ;;  %v4695_v4 = vpop.xlane.xlu0 %4694 }
0x26f2   : > { %v4714_v26 = vsel %vm1003_vm3, %v4709_v59, 0  ;;  %7480 = vrcp.f32 %v4695_v4 }
0x26f3   : > { %7129 = vmatpush3.bf16.msra.mxu1 %v4714_v26 }
0x26f4   : > { %7140 = vmatprep.subr.bf16.mxu1 %v7570_v1 }
0x26f5   : > { %v4901_v34 = vpop.permute.xlu1 %4900 }
0x26f6   : > { %v4906_v40 = vsel %vm1003_vm3, %v4901_v34, 0 }
0x26f8   : > { %v7479_v27 = vpop.eup %7478 }
0x26f9   : > { %v4703_v29 = vmul.f32 %v7479_v27, %v7473_v60 }
0x26fb   : > { %v4707_v31 = vpack.c.bf16 %v4703_v29, %v4703_v29 }
0x26fc   : > { %v7481_v22 = vpop.eup %7480 }
0x26fd   : > { %7131 = vmatmul.mubr.msk.bf16.vlgmr.msra.gmra.mrb[132].mxu1 %vm750_vm2, %v4707_v31  ;;  %v4705_v42 = vmul.f32 %v7481_v22, %v7475_v45 }
0x26fe   : > { %7141 = vmatpush3.bf16.msra.mxu1 %v4811_v32  ;;  %7142 = vmatprep.mubr.msk.bf16.mxu1 %vm7571_vm0, %v7570_v1 }
0x26ff   : > { %7152 = vmatprep.subr.bf16.mxu1 %v7570_v1  ;;  %v4899_v11 = vpack.c.bf16 %v4705_v42, %v4705_v42 }
0x2726   : > { %v4698_v35 = vpop.xlane.xlu1 %4697 }
0x2727   : > { %7482 = vrcp.f32 %v4698_v35  ;;  %v5096_v35 = vrot.slane %v8525_v55, %v7889_v33 }
0x272a   : > { %v4998_v44 = vpop.permute.xlu1 %4997 }
0x272b   : > { %v5003_v48 = vsel %vm1003_vm3, %v4998_v44, 0 }
0x272e   : > { %v4800_v36 = vpop.f32.mrb[140].mxu0 }
0x272f   : > { %v4806_v52 = vpack.c.bf16 %v4800_v36, %v4800_v36  ;;  %v7138_v38 = vpop.f32.mrb[141].mxu0 }
0x2730   : > { %v4803_v39 = vpop.f32.mrb[142].mxu0 }
0x2731   : > { %v7139_v41 = vpop.f32.mrb[143].mxu0  ;;  %7143 = vmatmul.mubr.msk.bf16.vlgmr.msra.gmra.mrb[136].mxu1 %vm750_vm2, %v4806_v52  ;;  %v7483_v46 = vpop.eup %7482 }
0x2732   : > { %7153 = vmatpush3.bf16.msra.mxu1 %v4906_v40  ;;  %7154 = vmatprep.mubr.msk.bf16.mxu1 %vm7571_vm0, %v7570_v1  ;;  %v4706_v5 = vmul.f32 %v7483_v46, %v7477_v23 }
0x2733   : > { %7164 = vmatprep.subr.bf16.mxu1 %v7570_v1 }
0x2734   : > { %v4996_v49 = vpack.c.bf16 %v4706_v5, %v4706_v5 }
0x2739   : > { %7155 = vmatmul.mubr.msk.bf16.vlgmr.msra.gmra.mrb[140].mxu1 %vm750_vm2, %v4899_v11 }
0x273a   : > { %7165 = vmatpush3.bf16.msra.mxu1 %v5003_v48  ;;  %7166 = vmatprep.mubr.msk.bf16.mxu1 %vm7571_vm0, %v7570_v1  ;;  %v5200_v48 = vrot.slane %v8525_v55, %v7942_v16  ;;  %v7380_v16 = vld [vmem:[%s8891_s11 + $0x10] sm:$0xff]  }
0x273b   : > { %7176 = vmatprep.subr.bf16.mxu1 %v7570_v1 }
0x2741   : > { %7167 = vmatmul.mubr.msk.bf16.vlgmr.msra.gmra.mrb[144].mxu1 %vm750_vm2, %v4996_v49 }
0x2742   : > { %7180 = vmatprep.mubr.msk.bf16.mxu1 %vm7571_vm0, %v7570_v1  ;;  %7177 = vmatpush3.bf16.msra.mxu1 %v7380_v16 }
0x2743   : > { %7178 = vmatprep.subr.bf16.mxu1 %v7570_v1 }
0x27d0   : > { %v4750_v12 = vpop.f32.mrb[132].mxu1 }
0x27d1   : > { %v4756_v57 = vpack.c.bf16 %v4750_v12, %v4750_v12  ;;  %v7132_v58 = vpop.f32.mrb[133].mxu1 }
0x27d2   : > { %v4753_v62 = vpop.f32.mrb[134].mxu1 }
0x27d3   : > { %v7133_v63 = vpop.f32.mrb[135].mxu1  ;;  %7149 = vmatmul.mubr.msk.bf16.vlgmr.msra.gmra.mrb[144].mxu0 %vm750_vm2, %v4756_v57 }
0x27d4   : > { %7159 = vmatpush3.bf16.msra.mxu0 %v4953_v61  ;;  %7160 = vmatprep.mubr.msk.bf16.mxu0 %vm7571_vm0, %v7570_v1  ;;  %v7381_v61 = vld [vmem:[%s8891_s11 + $0x18] sm:$0xff]  }
0x27d5   : > { %7170 = vmatprep.subr.bf16.mxu0 %v7570_v1  ;;  %7179 = vmatpush3.bf16.msra.mxu1 %v7381_v61 }
0x27d6   : > { %7192 = vmatprep.subr.bf16.mxu1 %v7570_v1 }
0x2804   : > { %v4847_v2 = vpop.f32.mrb[136].mxu1 }
0x2805   : > { %v7144_v3 = vpop.f32.mrb[137].mxu1 }
0x2806   : > { %v4850_v7 = vpop.f32.mrb[138].mxu1  ;;  %v5115_v3 = vrot.slane %v8525_v55, %v7913_v53 }
0x2807   : > { %v7145_v6 = vpop.f32.mrb[139].mxu1 }
0x280c   : > { %v4942_v51 = vpop.f32.mrb[140].mxu1 }
0x280d   : > { %v4948_v43 = vpack.c.bf16 %v4942_v51, %v4942_v51  ;;  %v7156_v14 = vpop.f32.mrb[141].mxu1 }
0x280e   : > { %v4945_v60 = vpop.f32.mrb[142].mxu1 }
0x280f   : > { %v7157_v8 = vpop.f32.mrb[143].mxu1  ;;  %7161 = vmatmul.mubr.msk.bf16.vlgmr.msra.gmra.mrb[148].mxu0 %vm750_vm2, %v4948_v43  ;;  %v5141_v60 = vrot.slane %v8525_v55, %v7934_v0 }
0x2810   : > { %7171 = vmatpush3.bf16.msra.mxu0 %v5050_v15  ;;  %7172 = vmatprep.mubr.msk.bf16.mxu0 %vm7571_vm0, %v7570_v1 }
0x2811   : > { %7184 = vmatprep.subr.bf16.mxu0 %v7570_v1 }
0x2814   : > { %v5039_v45 = vpop.f32.mrb[144].mxu1 }
0x2815   : > { %v5045_v19 = vpack.c.bf16 %v5039_v45, %v5039_v45  ;;  %v7168_v20 = vpop.f32.mrb[145].mxu1 }
0x2816   : > { %v5042_v21 = vpop.f32.mrb[146].mxu1 }
0x2817   : > { %v7169_v23 = vpop.f32.mrb[147].mxu1  ;;  %7173 = vmatmul.mubr.msk.bf16.vlgmr.msra.gmra.mrb[152].mxu0 %vm750_vm2, %v5045_v19 }
0x2818   : > { %7185 = vmatpush3.bf16.msra.mxu0 %v7378_v17  ;;  %7188 = vmatprep.mubr.msk.bf16.mxu0 %vm7571_vm0, %v7570_v1 }
0x2819   : > { %7186 = vmatprep.subr.bf16.mxu0 %v7570_v1 }
0x281c   : > { %7187 = vmatpush3.bf16.msra.mxu0 %v7379_v24 }
0x281d   : > { %7198 = vmatprep.subr.bf16.mxu0 %v7570_v1 }
0x281f   : > { %7189 = vmatmul.mubr.msk.bf16.vlgmr.msra.gmra.mrb[156].mxu0 %vm648_vm1, %v8315_v18 }
0x2820   : > { %7200 = vmatprep.mubr.msk.bf16.mxu0 %vm7571_vm0, %v7570_v1 }
0x28a6   : > { %v4893_v25 = vpop.f32.mrb[144].mxu0 }
0x28a7   : > { %v4894_v59 = vadd.f32 %v4893_v25, %v4847_v2  ;;  %v7150_v26 = vpop.f32.mrb[145].mxu0 }
0x28a8   : > { %v4896_v27 = vpop.f32.mrb[146].mxu0 }
0x28a9   : > { %v7151_v28 = vpop.f32.mrb[147].mxu0 }
0x28e2   : > { %v4989_v29 = vpop.f32.mrb[148].mxu0 }
0x28e3   : > { %v4995_v31 = vadd.f32 %v4989_v29, %v4894_v59  ;;  %v7162_v32 = vpop.f32.mrb[149].mxu0 }
0x28e4   : > { %v4992_v4 = vpop.f32.mrb[150].mxu0 }
0x28e5   : > { %v7163_v34 = vpop.f32.mrb[151].mxu0 }
0x28ea   : > { %v5086_v36 = vpop.f32.mrb[152].mxu0 }
0x28eb   : > { %v5092_v52 = vadd.f32 %v5086_v36, %v4995_v31  ;;  %v7174_v38 = vpop.f32.mrb[153].mxu0 }
0x28ec   : > { %v5089_v18 = vpop.f32.mrb[154].mxu0 }
0x28ed   : > { %v5097_v22 = vadd.f32 %v5096_v35, %v5092_v52  ;;  %v7175_v39 = vpop.f32.mrb[155].mxu0 }
0x28ef   : > { %v5098_v40 = vadd.f32 %v5097_v22, %v8504_v47 }
0x28f1   : > { %v5099_v41 = vsel %vm648_vm1, %v5098_v40, 0.0 }
0x28f2   : > { %5100 = vadd.xlane.f32.xlu0 %v5099_v41  ;;  %v5247_v42 = vpop.f32.mrb[156].mxu0 }
0x28f3   : > { %v7190_v44 = vpop.f32.mrb[157].mxu0  ;;  %v5248_v5 = vadd.f32 %v5247_v42, %v5200_v48 }
0x28f4   : > { %v5250_v11 = vpop.f32.mrb[158].mxu0 }
0x28f5   : > { %v7191_v46 = vpop.f32.mrb[159].mxu0  ;;  %v8657_v49 = vpack.c.bf16 %v5248_v5, %v5248_v5 }
0x28f7   : > { %v5259_v15 = vsel %vm750_vm2, %v8657_v49, 0 }
0x2908   : > { %5305 = vrot.lane.b32.xlu0 %v8657_v49, %s8950_s0 }
0x297f   : > { %v5101_v50 = vpop.xlane.xlu0 %5100 }
0x2980   : > { %v5102_v13 = vmul.f32 0.03125, %v5101_v50 }
0x2982   : > { %v5103_v56 = vsub.f32 %v5098_v40, %v5102_v13 }
0x2983   : > { %v5306_v47 = vpop.permute.xlu0 %5305 }
0x2984   : > { %v5311_v12 = vsel %vm750_vm2, %v5306_v47, 0  ;;  %v5104_v57 = vmul.f32 %v5103_v56, %v5103_v56 }
0x2985   : > { %7199 = vmatpush3.bf16.xpose.msra.mxu0 %v5311_v12 }
0x2986   : > { %v5105_v58 = vsel %vm648_vm1, %v5104_v57, 0.0  ;;  %7210 = vmatprep.subr.bf16.mxu0 %v7570_v1 }
0x2987   : > { %5106 = vadd.xlane.f32.xlu1 %v5105_v58 }
0x2998   : > { %5405 = vrot.lane.b32.xlu1 %v8657_v49, %s8952_s28 }
0x2a14   : > { %v5107_v62 = vpop.xlane.xlu1 %5106 }
0x2a15   : > { %v5108_v63 = vmul.f32 0.03125, %v5107_v62 }
0x2a17   : > { %v5109_v2 = vadd.f32 1e-05, %v5108_v63 }
0x2a18   : > { %v5406_v23 = vpop.permute.xlu1 %5405 }
0x2a19   : > { %7484 = vrsqrt.f32 %v5109_v2  ;;  %v5411_v25 = vsel %vm750_vm2, %v5406_v23, 0 }
0x2a23   : > { %v7485_v7 = vpop.eup %7484 }
0x2a24   : > { %v5111_v6 = vmul.f32 %v7485_v7, %v5103_v56 }
0x2a26   : > { %v5116_v51 = vmul.f32 %v5115_v3, %v5111_v6 }
0x2a28   : > { %v8678_v43 = vadd.f32 %v5120_v30, %v5116_v51 }
0x2a2a   : > { %v5137_v14 = vpack.c.bf16 %v8678_v43, %v8678_v43 }
0x2a2c   : > { %7181 = vmatmul.mubr.msk.bf16.vlgmr.msra.gmra.mrb[148].mxu1 %vm648_vm1, %v5137_v14 }
0x2a2d   : > { %7193 = vmatpush3.bf16.xpose.msra.mxu1 %v5259_v15  ;;  %7194 = vmatprep.mubr.msk.bf16.mxu1 %vm7571_vm0, %v7570_v1 }
0x2a2e   : > { %7204 = vmatprep.subr.bf16.mxu1 %v7570_v1 }
0x2aff   : > { %v5191_v8 = vpop.f32.mrb[148].mxu1 }
0x2b00   : > { %v5192_v45 = vadd.f32 %v5191_v8, %v5141_v60  ;;  %v7182_v17 = vpop.f32.mrb[149].mxu1 }
0x2b01   : > { %v5194_v19 = vpop.f32.mrb[150].mxu1 }
0x2b02   : > { %v5253_v20 = vpack.c.bf16 %v5192_v45, %v5192_v45  ;;  %v7183_v21 = vpop.f32.mrb[151].mxu1 }
0x2b04   : > { %5302 = vrot.lane.b32.xlu0 %v5253_v20, %s8950_s0  ;;  %7195 = vmatmul.mubr.msk.bf16.vlgmr.msra.gmra.mrb[152].mxu1 %vm750_vm2, %v5253_v20  ;;  %s6169_s0 = sshll.u32 %s606_s3, 4  ;;  %s8840_s0 = int_to_ptr.vmem [resolvable:$true] %s6169_s0 }
0x2b05   : > { %7206 = vmatprep.mubr.msk.bf16.mxu1 %vm7571_vm0, %v7570_v1  ;;  %s7506_s1 = scalar_lea.vmem %s8840_s0, 128 }
0x2b06   : > { %p7507_p11 = scmp.ne.s32.totalorder %s8840_s0, %s7506_s1 }
0x2b08   : > { %5355 = vrot.lane.b32.xlu0 %v8657_v49, %s8951_s27  ;;  %p7508_p12 = pnand %p7507_p11, %p7718_p5 }
0x2b0a   : > { %p7509_p13 = pneg %p7508_p12 }
0x2b0c   : > { %5353 = vrot.lane.b32.xlu0 %v5253_v20, %s8951_s27 }
0x2b10   : > { %5403 = vrot.lane.b32.xlu0 %v5253_v20, %s8952_s28 }
0x2b76   : > { %v5303_v24 = vpop.permute.xlu0 %5302 }
0x2b77   : > { %7201 = vmatmul.mubr.msk.bf16.vlgmr.msra.gmra.mrb[160].mxu0 %vm750_vm2, %v5303_v24 }
0x2b78   : > { %7211 = vmatpush3.bf16.xpose.msra.mxu0 %v5411_v25  ;;  %7212 = vmatprep.mubr.msk.bf16.mxu0 %vm7571_vm0, %v7570_v1 }
0x2b79   : > { %7222 = vmatprep.subr.bf16.mxu0 %v7570_v1 }
0x2b7a   : > { %v5356_v59 = vpop.permute.xlu0 %5355 }
0x2b7b   : > { %v5361_v26 = vsel %vm750_vm2, %v5356_v59, 0 }
0x2b7c   : > { %7205 = vmatpush3.bf16.xpose.msra.mxu1 %v5361_v26 }
0x2b7d   : > { %7216 = vmatprep.subr.bf16.mxu1 %v7570_v1 }
0x2b7e   : > { %v5354_v27 = vpop.permute.xlu0 %5353 }
0x2b82   : > { %v5404_v28 = vpop.permute.xlu0 %5403 }
0x2b83   : > { %7207 = vmatmul.mubr.msk.bf16.vlgmr.msra.gmra.mrb[156].mxu1 %vm750_vm2, %v5354_v27  ;;  %7213 = vmatmul.mubr.msk.bf16.vlgmr.msra.gmra.mrb[164].mxu0 %vm750_vm2, %v5404_v28 }
0x2b84   : > { %7224 = vmatprep.mubr.msk.bf16.mxu0 %vm7571_vm0, %v7570_v1  ;;  %7218 = vmatprep.mubr.msk.bf16.mxu1 %vm7571_vm0, %v7570_v1 }
0x2bd7   : > { %v5295_v29 = vpop.f32.mrb[152].mxu1 }
0x2bd8   : > { %v7196_v31 = vpop.f32.mrb[153].mxu1  ;;  %v5453_v58 = vmul.f32 0.35355338, %v5295_v29 }
0x2bd9   : > { %v5298_v32 = vpop.f32.mrb[154].mxu1  ;;  %v6412_v31 = vld [vmem:[%s8893_s13 + $0x14] sm:$0xf] }
0x2bda   : > { %v7197_v4 = vpop.f32.mrb[155].mxu1  ;;  %v5457_v62 = vsel %vm750_vm2, %v5453_v58, -inf }
0x2c4a   : > { %v5347_v34 = vpop.f32.mrb[160].mxu0 }
0x2c4b   : > { %v5454_v35 = vmul.f32 0.35355338, %v5347_v34  ;;  %v7202_v36 = vpop.f32.mrb[161].mxu0  ;;  %v5605_v34 = vsel %vm1003_vm3, %v6412_v31, 0 }
0x2c4c   : > { %v5350_v52 = vpop.f32.mrb[162].mxu0 }
0x2c4d   : > { %v7203_v38 = vpop.f32.mrb[163].mxu0  ;;  %v5460_v18 = vsel %vm750_vm2, %v5454_v35, -inf }
0x2c4e   : > { %5461 = vmax.xlane.f32.xlu0 %v5460_v18 }
0x2c56   : > { %v5397_v22 = vpop.f32.mrb[156].mxu1  ;;  %v5447_v39 = vpop.f32.mrb[164].mxu0 }
0x2c57   : > { %v7208_v40 = vpop.f32.mrb[157].mxu1  ;;  %v7214_v41 = vpop.f32.mrb[165].mxu0  ;;  %v5456_v48 = vmul.f32 0.35355338, %v5447_v39  ;;  %v5455_v61 = vmul.f32 0.35355338, %v5397_v22 }
0x2c58   : > { %v5400_v42 = vpop.f32.mrb[158].mxu1  ;;  %v5450_v44 = vpop.f32.mrb[166].mxu0 }
0x2c59   : > { %v7209_v11 = vpop.f32.mrb[159].mxu1  ;;  %v7215_v46 = vpop.f32.mrb[167].mxu0  ;;  %v5466_v5 = vsel %vm750_vm2, %v5456_v48, -inf  ;;  %v5463_v63 = vsel %vm750_vm2, %v5455_v61, -inf }
0x2c64   : > { %5552 = vrot.lane.b32.xlu0 %v8657_v49, %s8953_s25  ;;  %s8963_s25 = sld [smem:[#allocation19_spill]] }
0x2c83   : > { %5467 = vmax.xlane.f32.xlu0 %v5466_v5 }
0x2c99   : > { %5694 = vrot.lane.b32.xlu0 %v8657_v49, %s8955_s2  ;;  %s6156_s2 = scalar_lea.sflag [#allocation3], %s604_s21 }
0x2cdb   : > { %v5462_v50 = vpop.xlane.xlu0 %5461 }
0x2cdc   : > { %v5470_v13 = vsub.f32 %v5454_v35, %v5462_v50 }
0x2cde   : > { %v5475_v56 = vmul.f32 1.442695, %v5470_v13  ;;  %v6411_v13 = vld [vmem:[%s8893_s13 + $0x10] sm:$0xf] }
0x2cdf   : > { %v5553_v47 = vpop.permute.xlu0 %5552 }
0x2ce0   : > { %7486 = vpow2.f32 %v5475_v56  ;;  %v5558_v12 = vsel %vm1003_vm3, %v5553_v47, 0  ;;  %v5651_v56 = vsel %vm1003_vm3, %v6411_v13, 0  ;;  %v6413_v47 = vld [vmem:[%s8893_s13 + $0x18] sm:$0xf] }
0x2ce1   : > { %7223 = vmatpush3.bf16.msra.mxu0 %v5558_v12 }
0x2ce2   : > { %7234 = vmatprep.subr.bf16.mxu0 %v7570_v1 }
0x2cea   : > { %v7487_v57 = vpop.eup %7486 }
0x2ceb   : > { %v5484_v16 = vsel %vm750_vm2, %v7487_v57, 0.0 }
0x2cec   : > { %5485 = vadd.xlane.f32.xlu1 %v5484_v16  ;;  %v5747_v16 = vsel %vm1003_vm3, %v6413_v47, 0 }
0x2cf0   : > { %5458 = vmax.xlane.f32.xlu1 %v5457_v62 }
0x2cf4   : > { %5464 = vmax.xlane.f32.xlu1 %v5463_v63 }
0x2d10   : > { %v5468_v17 = vpop.xlane.xlu0 %5467 }
0x2d11   : > { %v5472_v19 = vsub.f32 %v5456_v48, %v5468_v17 }
0x2d13   : > { %v5479_v21 = vmul.f32 1.442695, %v5472_v19 }
0x2d14   : > { %v5695_v36 = vpop.permute.xlu0 %5694 }
0x2d15   : > { %v5700_v40 = vsel %vm1003_vm3, %v5695_v36, 0 }
0x2d79   : > { %v5486_v2 = vpop.xlane.xlu1 %5485 }
0x2d7a   : > { %7488 = vrcp.f32 %v5486_v2 }
0x2d7d   : > { %v5459_v3 = vpop.xlane.xlu1 %5458 }
0x2d7e   : > { %v5469_v7 = vsub.f32 %v5453_v58, %v5459_v3 }
0x2d80   : > { %v5473_v6 = vmul.f32 1.442695, %v5469_v7 }
0x2d81   : > { %v5465_v8 = vpop.xlane.xlu1 %5464 }
0x2d82   : > { %7490 = vpow2.f32 %v5473_v6  ;;  %v5471_v45 = vsub.f32 %v5455_v61, %v5465_v8  ;;  %v6414_v6 = vld [vmem:[%s8893_s13 + $0x1c] sm:$0xf] }
0x2d84   : > { %v7489_v30 = vpop.eup %7488  ;;  %v5477_v20 = vmul.f32 1.442695, %v5471_v45 }
0x2d85   : > { %v5498_v51 = vmul.f32 %v7489_v30, %v7487_v57 }
0x2d86   : > { %7492 = vpow2.f32 %v5477_v20 }
0x2d87   : > { %v5551_v14 = vpack.c.bf16 %v5498_v51, %v5498_v51  ;;  %7494 = vpow2.f32 %v5479_v21 }
0x2d89   : > { %7225 = vmatmul.mubr.msk.bf16.vlgmr.msra.gmra.mrb[168].mxu0 %vm750_vm2, %v5551_v14 }
0x2d8a   : > { %7236 = vmatprep.mubr.msk.bf16.mxu0 %vm7571_vm0, %v7570_v1  ;;  %7235 = vmatpush3.bf16.msra.mxu0 %v5651_v56 }
0x2d8b   : > { %7246 = vmatprep.subr.bf16.mxu0 %v7570_v1 }
0x2d8c   : > { %v7491_v15 = vpop.eup %7490 }
0x2d8d   : > { %v5481_v60 = vsel %vm750_vm2, %v7491_v15, 0.0 }
0x2d8e   : > { %5482 = vadd.xlane.f32.xlu1 %v5481_v60 }
0x2d90   : > { %v7493_v23 = vpop.eup %7492 }
0x2d91   : > { %v5487_v24 = vsel %vm750_vm2, %v7493_v23, 0.0  ;;  %v7495_v25 = vpop.eup %7494 }
0x2d92   : > { %v5490_v59 = vsel %vm750_vm2, %v7495_v25, 0.0 }
0x2d9f   : > { %5502 = vrot.lane.b32.xlu1 %v8657_v49, %s8954_s23  ;;  %s8838_s23 = scalar_lea.hbm %s8963_s25, %s6458_s19 }
0x2dc3   : > { %5488 = vadd.xlane.f32.xlu1 %v5487_v24 }
0x2dc7   : > { %5491 = vadd.xlane.f32.xlu1 %v5490_v59 }
0x2dd8   : > { %5791 = vrot.lane.b32.xlu1 %v8657_v49, %s8956_s20  ;;  %s7579_s20 = smov [#allocation2]  }
0x2dd9   : > { %s7510_s24 = sshll.u32 %s7579_s20, 4  ;;  %s7511_s24 = int_to_ptr.vmem [resolvable:$false] %s7510_s24 }
0x2dda   : > { %s7512_s26 = scalar_lea.vmem %s7511_s24, 256  ;;  %p7513_p0 = scmp.lt.s32.totalorder %s8840_s0, %s7511_s24 }
0x2ddb   : > { %p7514_p1 = scmp.lt.s32.totalorder %s7512_s26, %s7506_s1 }
0x2ddd   : > { %p7515_p2 = por %p7514_p1, %p7513_p0 }
0x2ddf   : > { %p7516_p3 = pnand %p7515_p2, %p7509_p13 }
0x2e1b   : > { %v5483_v26 = vpop.xlane.xlu1 %5482 }
0x2e1c   : > { %7496 = vrcp.f32 %v5483_v26 }
0x2e1f   : > { %v5503_v27 = vpop.permute.xlu1 %5502 }
0x2e20   : > { %v5508_v28 = vsel %vm1003_vm3, %v5503_v27, 0 }
0x2e21   : > { %7217 = vmatpush3.bf16.msra.mxu1 %v5508_v28 }
0x2e22   : > { %7228 = vmatprep.subr.bf16.mxu1 %v7570_v1 }
0x2e26   : > { %v7497_v29 = vpop.eup %7496 }
0x2e27   : > { %v5497_v32 = vmul.f32 %v7497_v29, %v7491_v15  ;;  %v5844_v15 = vsel %vm1003_vm3, %v6414_v6, 0 }
0x2e29   : > { %v5501_v4 = vpack.c.bf16 %v5497_v32, %v5497_v32 }
0x2e2b   : > { %7219 = vmatmul.mubr.msk.bf16.vlgmr.msra.gmra.mrb[160].mxu1 %vm750_vm2, %v5501_v4  ;;  %v5890_v4 = vrot.slane %v8525_v55, %v7957_v37  ;;  %v7382_v37 = vld [vmem:[%s8894_s14 + $0x10] sm:$0xff]   ;;  %v7383_v55 = vld [vmem:[%s8894_s14 + $0x18] sm:$0xff]  }
0x2e2c   : > { %7229 = vmatpush3.bf16.msra.mxu1 %v5605_v34  ;;  %7230 = vmatprep.mubr.msk.bf16.mxu1 %vm7571_vm0, %v7570_v1 }
0x2e2d   : > { %7240 = vmatprep.subr.bf16.mxu1 %v7570_v1 }
0x2e50   : > { %v5489_v49 = vpop.xlane.xlu1 %5488 }
0x2e51   : > { %7498 = vrcp.f32 %v5489_v49 }
0x2e54   : > { %v5492_v35 = vpop.xlane.xlu1 %5491 }
0x2e55   : > { %7500 = vrcp.f32 %v5492_v35 }
0x2e58   : > { %v5792_v44 = vpop.permute.xlu1 %5791 }
0x2e59   : > { %v5797_v48 = vsel %vm1003_vm3, %v5792_v44, 0 }
0x2e5b   : > { %v7499_v22 = vpop.eup %7498 }
0x2e5c   : > { %v5594_v52 = vpop.f32.mrb[168].mxu0  ;;  %v5499_v42 = vmul.f32 %v7499_v22, %v7493_v23 }
0x2e5d   : > { %v5600_v38 = vpack.c.bf16 %v5594_v52, %v5594_v52  ;;  %v7226_v18 = vpop.f32.mrb[169].mxu0 }
0x2e5e   : > { %v5597_v39 = vpop.f32.mrb[170].mxu0  ;;  %v5693_v11 = vpack.c.bf16 %v5499_v42, %v5499_v42 }
0x2e5f   : > { %v7227_v41 = vpop.f32.mrb[171].mxu0  ;;  %7231 = vmatmul.mubr.msk.bf16.vlgmr.msra.gmra.mrb[164].mxu1 %vm750_vm2, %v5600_v38  ;;  %v7501_v46 = vpop.eup %7500 }
0x2e60   : > { %7241 = vmatpush3.bf16.msra.mxu1 %v5700_v40  ;;  %7242 = vmatprep.mubr.msk.bf16.mxu1 %vm7571_vm0, %v7570_v1  ;;  %v5500_v5 = vmul.f32 %v7501_v46, %v7495_v25 }
0x2e61   : > { %7252 = vmatprep.subr.bf16.mxu1 %v7570_v1 }
0x2e62   : > { %v5790_v50 = vpack.c.bf16 %v5500_v5, %v5500_v5 }
0x2e67   : > { %7243 = vmatmul.mubr.msk.bf16.vlgmr.msra.gmra.mrb[168].mxu1 %vm750_vm2, %v5693_v11  ;;  %v7385_v11 = vld [vmem:[%s8895_s15 + $0x28] sm:$0xff]  }
0x2e68   : > { %7253 = vmatpush3.bf16.msra.mxu1 %v5797_v48  ;;  %7254 = vmatprep.mubr.msk.bf16.mxu1 %vm7571_vm0, %v7570_v1 }
0x2e69   : > { %7264 = vmatprep.subr.bf16.mxu1 %v7570_v1 }
0x2e6f   : > { %7255 = vmatmul.mubr.msk.bf16.vlgmr.msra.gmra.mrb[172].mxu1 %vm750_vm2, %v5790_v50  ;;  %v6372_v50 = vld [vmem:[%s8896_s16 + $0x18] sm:$0x3f] }
0x2e70   : > { %7268 = vmatprep.mubr.msk.bf16.mxu1 %vm7571_vm0, %v7570_v1  ;;  %7265 = vmatpush3.bf16.msra.mxu1 %v7382_v37  ;;  %v5909_v13 = vrot.slane %v6372_v50, %v7777_v10  ;;  %v7387_v10 = vld [vmem:[%s8895_s15 + $0x38] sm:$0xff]  }
0x2e71   : > { %7266 = vmatprep.subr.bf16.mxu1 %v7570_v1 }
0x2e74   : > { %7267 = vmatpush3.bf16.msra.mxu1 %v7383_v55 }
0x2e75   : > { %7284 = vmatprep.subr.bf16.mxu1 %v7570_v1 }
0x2efe   : > { %v5544_v12 = vpop.f32.mrb[160].mxu1 }
0x2eff   : > { %v5550_v57 = vpack.c.bf16 %v5544_v12, %v5544_v12  ;;  %v7220_v58 = vpop.f32.mrb[161].mxu1  ;;  %v5914_v12 = vrot.slane %v6372_v50, %v7774_v9  ;;  %v5934_v9 = vrot.slane %v6372_v50, %v7889_v33 }
0x2f00   : > { %v5547_v61 = vpop.f32.mrb[162].mxu1 }
0x2f01   : > { %v7221_v62 = vpop.f32.mrb[163].mxu1  ;;  %7237 = vmatmul.mubr.msk.bf16.vlgmr.msra.gmra.mrb[172].mxu0 %vm750_vm2, %v5550_v57  ;;  %v7386_v61 = vld [vmem:[%s8895_s15 + $0x30] sm:$0xff]  }
0x2f02   : > { %7247 = vmatpush3.bf16.msra.mxu0 %v5747_v16  ;;  %7248 = vmatprep.mubr.msk.bf16.mxu0 %vm7571_vm0, %v7570_v1 }
0x2f03   : > { %7258 = vmatprep.subr.bf16.mxu0 %v7570_v1 }
0x2f32   : > { %v5641_v63 = vpop.f32.mrb[164].mxu1 }
0x2f33   : > { %v7232_v2 = vpop.f32.mrb[165].mxu1 }
0x2f34   : > { %v5644_v3 = vpop.f32.mrb[166].mxu1 }
0x2f35   : > { %v7233_v7 = vpop.f32.mrb[167].mxu1 }
0x2f3a   : > { %v5736_v30 = vpop.f32.mrb[168].mxu1 }
0x2f3b   : > { %v5742_v51 = vpack.c.bf16 %v5736_v30, %v5736_v30  ;;  %v7244_v14 = vpop.f32.mrb[169].mxu1 }
0x2f3c   : > { %v5739_v60 = vpop.f32.mrb[170].mxu1 }
0x2f3d   : > { %v7245_v8 = vpop.f32.mrb[171].mxu1  ;;  %7249 = vmatmul.mubr.msk.bf16.vlgmr.msra.gmra.mrb[176].mxu0 %vm750_vm2, %v5742_v51  ;;  %v5995_v51 = vrot.slane %v6372_v50, %v7913_v53  ;;  %v7388_v53 = vld [vmem:[%s8897_s17] sm:$0xff]  }
0x2f3e   : > { %7259 = vmatpush3.bf16.msra.mxu0 %v5844_v15  ;;  %7260 = vmatprep.mubr.msk.bf16.mxu0 %vm7571_vm0, %v7570_v1 }
0x2f3f   : > { %7272 = vmatprep.subr.bf16.mxu0 %v7570_v1 }
0x2f42   : > { %v5833_v45 = vpop.f32.mrb[172].mxu1 }
0x2f43   : > { %v5839_v17 = vpack.c.bf16 %v5833_v45, %v5833_v45  ;;  %v7256_v19 = vpop.f32.mrb[173].mxu1 }
0x2f44   : > { %v5836_v20 = vpop.f32.mrb[174].mxu1 }
0x2f45   : > { %v7257_v21 = vpop.f32.mrb[175].mxu1  ;;  %7261 = vmatmul.mubr.msk.bf16.vlgmr.msra.gmra.mrb[180].mxu0 %vm750_vm2, %v5839_v17 }
0x2f46   : > { %7280 = vmatprep.mubr.msk.bf16.mxu0 %vm7571_vm0, %v7570_v1 }
0x2fd4   : > { %v5687_v23 = vpop.f32.mrb[172].mxu0 }
0x2fd5   : > { %v5688_v24 = vadd.f32 %v5687_v23, %v5641_v63  ;;  %v7238_v25 = vpop.f32.mrb[173].mxu0 }
0x2fd6   : > { %v5690_v59 = vpop.f32.mrb[174].mxu0  ;;  %v7389_v25 = vld [vmem:[%s8897_s17 + $0x8] sm:$0xff]  }
0x2fd7   : > { %v7239_v26 = vpop.f32.mrb[175].mxu0 }
0x3010   : > { %v5783_v27 = vpop.f32.mrb[176].mxu0 }
0x3011   : > { %v5789_v28 = vadd.f32 %v5783_v27, %v5688_v24  ;;  %v7250_v29 = vpop.f32.mrb[177].mxu0 }
0x3012   : > { %v5786_v31 = vpop.f32.mrb[178].mxu0 }
0x3013   : > { %v7251_v32 = vpop.f32.mrb[179].mxu0 }
0x3014   : > { %v6085_v32 = vrot.slane %v6372_v50, %v7934_v0 }
0x3018   : > { %v5880_v34 = vpop.f32.mrb[180].mxu0 }
0x3019   : > { %v5886_v49 = vadd.f32 %v5880_v34, %v5789_v28  ;;  %v7262_v35 = vpop.f32.mrb[181].mxu0  ;;  %v6080_v28 = vrot.slane %v6372_v50, %v7916_v54 }
0x301a   : > { %v5883_v36 = vpop.f32.mrb[182].mxu0 }
0x301b   : > { %v5891_v52 = vadd.f32 %v5890_v4, %v5886_v49  ;;  %v7263_v38 = vpop.f32.mrb[183].mxu0 }
0x301d   : > { %v5892_v18 = vadd.f32 %v5891_v52, %v8678_v43  ;;  %v7384_v43 = vld [vmem:[%s8895_s15 + $0x20] sm:$0xff]  }
0x301e   : > { %7273 = vmatpush3.bf16.msra.mxu0 %v7384_v43 }
0x301f   : > { %v5893_v22 = vsel %vm648_vm1, %v5892_v18, 0.0  ;;  %7274 = vmatprep.subr.bf16.mxu0 %v7570_v1 }
0x3020   : > { %5894 = vadd.xlane.f32.xlu1 %v5893_v22 }
0x3022   : > { %7275 = vmatpush3.bf16.msra.mxu0 %v7385_v11 }
0x3023   : > { %7276 = vmatprep.subr.bf16.mxu0 %v7570_v1 }
0x3026   : > { %7277 = vmatpush3.bf16.msra.mxu0 %v7386_v61 }
0x3027   : > { %7278 = vmatprep.subr.bf16.mxu0 %v7570_v1 }
0x302a   : > { %7279 = vmatpush3.bf16.msra.mxu0 %v7387_v10 }
0x30ad   : > { %v5895_v39 = vpop.xlane.xlu1 %5894 }
0x30ae   : > { %v5896_v40 = vmul.f32 0.03125, %v5895_v39 }
0x30b0   : > { %v5897_v41 = vsub.f32 %v5892_v18, %v5896_v40 }
0x30b2   : > { %v5898_v42 = vmul.f32 %v5897_v41, %v5897_v41 }
0x30b4   : > { %v5899_v44 = vsel %vm648_vm1, %v5898_v42, 0.0 }
0x30b5   : > { %5900 = vadd.xlane.f32.xlu0 %v5899_v44 }
0x3142   : > { %v5901_v46 = vpop.xlane.xlu0 %5900 }
0x3143   : > { %v5902_v48 = vmul.f32 0.03125, %v5901_v46 }
0x3145   : > { %v5903_v5 = vadd.f32 1e-05, %v5902_v48 }
0x3147   : > { %7502 = vrsqrt.f32 %v5903_v5 }
0x3151   : > { %v7503_v56 = vpop.eup %7502 }
0x3152   : > { %v5905_v47 = vmul.f32 %v7503_v56, %v5897_v41 }
0x3154   : > { %v5910_v57 = vmul.f32 %v5909_v13, %v5905_v47 }
0x3156   : > { %v5915_v58 = vadd.f32 %v5914_v12, %v5910_v57 }
0x3158   : > { %v5930_v16 = vpack.c.bf16 %v5915_v58, %v5915_v58 }
0x315a   : > { %7269 = vmatmul.mubr.msk.bf16.vlgmr.msra.gmra.mrb[176].mxu1 %vm648_vm1, %v5930_v16 }
0x315b   : > { %7288 = vmatprep.mubr.msk.bf16.mxu1 %vm7571_vm0, %v7570_v1  ;;  %7285 = vmatpush3.bf16.msra.mxu1 %v7388_v53 }
0x315c   : > { %7286 = vmatprep.subr.bf16.mxu1 %v7570_v1  ;;  %v6453_v1 = vld [vmem:[%s8961_s5] ss:$0 sm:$0xff] }
0x315f   : > { %7287 = vmatpush3.bf16.msra.mxu1 %v7389_v25 }
0x322d   : > { %v5984_v62 = vpop.f32.mrb[176].mxu1 }
0x322e   : > { %v5985_v63 = vadd.f32 %v5984_v62, %v5934_v9  ;;  %v7270_v2 = vpop.f32.mrb[177].mxu1 }
0x322f   : > { %v5987_v3 = vpop.f32.mrb[178].mxu1 }
0x3230   : > { %v5990_v7 = vmax.f32 %v5985_v63, 0.0  ;;  %v7271_v6 = vpop.f32.mrb[179].mxu1 }
0x3232   : > { %v5991_v30 = vpack.c.bf16 %v5990_v7, %v5990_v7 }
0x3234   : > { %7281 = vmatmul.mubr.msk.bf16.vlgmr.msra.gmra.mrb[184].mxu0 %vm1516_vm4, %v5991_v30 }
0x3307   : > { %v6057_v14 = vpop.f32.mrb[184].mxu0 }
0x3308   : > { %v6058_v15 = vadd.f32 %v6057_v14, %v5995_v51  ;;  %v7282_v60 = vpop.f32.mrb[185].mxu0 }
0x3309   : > { %v6060_v8 = vpop.f32.mrb[186].mxu0 }
0x330a   : > { %v6063_v45 = vadd.f32 %v6058_v15, %v5915_v58  ;;  %v7283_v17 = vpop.f32.mrb[187].mxu0 }
0x330c   : > { %v6064_v19 = vsel %vm648_vm1, %v6063_v45, 0.0 }
0x330d   : > { %6065 = vadd.xlane.f32.xlu1 %v6064_v19 }
0x339a   : > { %v6066_v33 = vpop.xlane.xlu1 %6065 }
0x339b   : > { %v6067_v20 = vmul.f32 0.03125, %v6066_v33 }
0x339d   : > { %v6068_v21 = vsub.f32 %v6063_v45, %v6067_v20 }
0x339f   : > { %v6069_v23 = vmul.f32 %v6068_v21, %v6068_v21 }
0x33a1   : > { %v6070_v24 = vsel %vm648_vm1, %v6069_v23, 0.0 }
0x33a2   : > { %6071 = vadd.xlane.f32.xlu1 %v6070_v24 }
0x342f   : > { %v6072_v59 = vpop.xlane.xlu1 %6071 }
0x3430   : > { %v6073_v26 = vmul.f32 0.03125, %v6072_v59 }
0x3432   : > { %v6074_v27 = vadd.f32 1e-05, %v6073_v26 }
0x3434   : > { %7504 = vrsqrt.f32 %v6074_v27 }
0x343e   : > { %v7505_v29 = vpop.eup %7504 }
0x343f   : > { %v6076_v31 = vmul.f32 %v7505_v29, %v6068_v21 }
0x3441   : > { %v6081_v4 = vmul.f32 %v6080_v28, %v6076_v31 }
0x3443   : > { %v6086_v34 = vadd.f32 %v6085_v32, %v6081_v4 }
0x3445   : > { %v6091_v49 = vpack.c.bf16 %v6086_v34, %v6086_v34 }
0x3447   : > { %7289 = vmatmul.mubr.msk.bf16.vlgmr.msra.gmra.mrb[180].mxu1 %vm648_vm1, %v6091_v49 }
0x351a   : > { %v6148_v54 = vpop.f32.mrb[180].mxu1 }
0x351b   : > { %v6149_v35 = vadd.f32 %v6453_v1, %v6148_v54  ;;  %v7290_v36 = vpop.f32.mrb[181].mxu1 }
0x351c   : > { %v6151_v0 = vpop.f32.mrb[182].mxu1 }
0x351d   : > { %6154 = vst [vmem:[%s606_s3] sm:$0xff] %v6149_v35  ;;  %v7291_v52 = vpop.f32.mrb[183].mxu1 }
0x351e   : > { %7519 = shalt.err (!%p7516_p3)
}
0x351f   : > { %s7520_s21 = scalar_lea.hbm %s8838_s23, 128  ;;  %s7524_s4 = scalar_lea.hbm %s8963_s25, 256 }
0x3520   : > { %p7521_p4 = scmp.ne.s32.totalorder %s8838_s23, %s7520_s21  ;;  %p7525_p9 = scmp.lt.u32.totalorder %s8838_s23, %s8963_s25 }
0x3521   : > { %p7526_p10 = scmp.lt.u32.totalorder %s7524_s4, %s7520_s21  ;;  %p7528_p12 = scmp.lt.u32.totalorder %s7520_s21, %s8838_s23 }
0x3522   : > { %p7522_p7 = pnand %p7521_p4, %p7718_p5 }
0x3523   : > { %p7527_p11 = por %p7526_p10, %p7525_p9 }
0x3524   : > { %p7523_p8 = pneg %p7522_p7 }
0x3525   : > { %p7529_p13 = por %p7528_p12, %p7527_p11 }
0x3527   : > { %p7530_p0 = pnand %p7529_p13, %p7523_p8 }
0x3529   : > { %7533 = shalt.err (!%p7530_p0)
}
0x352a   : > { %7292 = dma.vmem_to_hbm [thread:$0]  (%p7718_p5), %s8840_s0, 128, %s8838_s23, %s6156_s2  }
0x352b PF: > { %s8964_s3 = sld [smem:[#allocation7_spill]]  ;;  %s8965_s27 = sld [smem:[#allocation5_spill]] }
0x3531   : > { %p7298_p1 = scmp.ge.s32.totalorder %s8964_s3, 2  ;;  %s6181_s1 = sand.u32 1, %s8965_s27  }
0x3532   : > { %s6182_s20 = scalar_lea.sflag [#allocation3], %s6181_s1 }
0x3533   : > { %p7295_p2 = pnand %p7298_p1, %p7722_p6 }
0x3535   : > { %7551 = dma.done.wait (!%p7295_p2), %s6182_s20, 128  }
0x3536   : > { %7553 = vsyncadd (!%p7295_p2), %s6182_s20, 4294967168  ;;  %s8967_s21 = sld [smem:[#allocation8_spill]]  ;;  %s8968_s24 = sld [smem:[#allocation6_spill]] }
0x3537   : > { %s8969_s20 = sld [smem:[#allocation9_spill]]  ;;  %s8970_s0 = smov %s7560_s30 }
0x353c   : > { %p29_p3 = scmp.ge.s32.totalorder %s8967_s21, 4   ;;  %s8971_s30 = smov %s8968_s24 }
0x353e   :  { %31 = sbr.rel (!%p29_p3) target bundleno = 12 (0xc), region = 149 }
0x3545   :  { %6187 = vsyncpa [#allocation3], 1 }
0x3546   :  { %6189 = vsyncpa [#allocation3 + $0x1], 1 }

</bundles_post_ra>
